<compile_context>
chip_gen: v7x
topology: tpu7x:2x2x1
jax: 0.10.0
libtpu: 0.0.40
codegen_flags: <defaults>
</compile_context>

<pallas_src>
import functools

import jax
import jax.numpy as jnp
from jax.experimental import pallas as pl
from jax.experimental.pallas import tpu as pltpu


def _const_spec(block_shape):
    """Constant-index weight spec, single-buffered (one DMA, half the VMEM)."""
    n = len(block_shape)
    index_map = lambda *_: (0,) * n
    try:
        return pl.BlockSpec(block_shape, index_map, pipeline_mode=pl.Buffered(1))
    except Exception:  # older Pallas without pipeline_mode / Buffered(1)
        return pl.BlockSpec(block_shape, index_map)


# ----------------------------------------------------------------------------
# Kernel 1: fused conv-as-matmul + per-frame pooling + projection + hoisted
#           LSTM layer-0 input projection; grid over frame groups ("parallel")
# ----------------------------------------------------------------------------
def _cnn_to_gates_kernel(p_ref, cw_ref, cb_ref, pw_ref, pb_ref, w0_ref, b0_ref,
                         o_ref, *, frames_per_tile, hw):
    bf16 = jnp.bfloat16
    # 3x3 conv expressed as one matmul over bf16 im2col patches (+bias, ReLU).
    conv = jnp.dot(p_ref[...], cw_ref[...],
                   preferred_element_type=jnp.float32)          # (FPT*HW, Cc)
    conv = jnp.maximum(conv + cb_ref[...], 0.0)
    # Per-frame global average pool in f32 via a sublane (XLU) reduction;
    # replaces the dense O(BT^2*HW*Cc) pooling matmul + pool_mat HBM traffic.
    cc = conv.shape[-1]
    pooled = jnp.sum(conv.reshape(frames_per_tile, hw, cc), axis=1) * (1.0 / hw)
    # Projection to cnn feature size.
    feat = jnp.dot(pooled.astype(bf16), pw_ref[...],
                   preferred_element_type=jnp.float32) + pb_ref[...]   # (FPT, F)
    # Hoisted LSTM layer-0 input projection (x @ W_ih0 + b_ih0 + b_hh0) done for
    # all frames here instead of T tiny matmuls on the serial recurrent path.
    gates0 = jnp.dot(feat.astype(bf16), w0_ref[...],
                     preferred_element_type=jnp.float32) + b0_ref[...]
    o_ref[...] = gates0


def pallas_cnn_to_gates(patches, kp, *, frames_per_tile, hw):
    """patches: (n_frames*HW, Kp) bf16, time-major frame order."""
    rows, kpad = patches.shape
    n_frames = rows // hw
    assert n_frames % frames_per_tile == 0
    cc = kp["conv_w"].shape[1]
    f = kp["proj_w"].shape[1]
    g4 = kp["w_ih0"].shape[1]
    return pl.pallas_call(
        functools.partial(_cnn_to_gates_kernel,
                          frames_per_tile=frames_per_tile, hw=hw),
        out_shape=jax.ShapeDtypeStruct((n_frames, g4), jnp.float32),
        grid=(n_frames // frames_per_tile,),
        in_specs=[
            pl.BlockSpec((frames_per_tile * hw, kpad), lambda i: (i, 0)),
            _const_spec((kpad, cc)),   # conv weight (im2col layout, bf16)
            _const_spec((1, cc)),      # conv bias (f32)
            _const_spec((cc, f)),      # projection weight
            _const_spec((1, f)),       # projection bias
            _const_spec((f, g4)),      # LSTM layer-0 W_ih
            _const_spec((1, g4)),      # LSTM layer-0 b_ih + b_hh
        ],
        out_specs=pl.BlockSpec((frames_per_tile, g4), lambda i: (i, 0)),
        compiler_params=pltpu.CompilerParams(
            dimension_semantics=("parallel",),       # megacore / v7x 2-TC split
            vmem_limit_bytes=32 * 1024 * 1024),
    )(patches, kp["conv_w"], kp["conv_b"], kp["proj_w"], kp["proj_b"],
      kp["w_ih0"], kp["b0"])


# ----------------------------------------------------------------------------
# Kernel 2: fused 3-layer LSTM + FC head, grid=(T,), state in VMEM scratch
# ----------------------------------------------------------------------------
def _lstm3_fc_kernel(g0_ref, whh0_ref, wcat1_ref, b1_ref, wcat2_ref, b2_ref,
                     fcw_ref, fcb_ref, out_ref,
                     xh1, xh2, c0, c1, c2, *, hidden):
    t = pl.program_id(0)
    bf16 = jnp.bfloat16
    H = hidden

    @pl.when(t == 0)
    def _init():
        xh1[...] = jnp.zeros_like(xh1)      # [h0, h1] bf16 staging (layer-1 in)
        xh2[...] = jnp.zeros_like(xh2)      # [h1, h2] bf16 staging (layer-2 in)
        c0[...] = jnp.zeros_like(c0)
        c1[...] = jnp.zeros_like(c1)
        c2[...] = jnp.zeros_like(c2)
        out_ref[...] = jnp.zeros_like(out_ref)

    def cell(gates, c_prev):
        # PyTorch gate order: i, f, g, o
        i_g = jax.nn.sigmoid(gates[:, 0:H])
        f_g = jax.nn.sigmoid(gates[:, H:2 * H])
        g_g = jnp.tanh(gates[:, 2 * H:3 * H])
        o_g = jax.nn.sigmoid(gates[:, 3 * H:4 * H])
        c_new = f_g * c_prev + i_g * g_g
        h_new = o_g * jnp.tanh(c_new)
        return h_new, c_new

    # ---- layer 0: x @ W_ih0 + b0 was hoisted into kernel 1 ------------------
    gates = g0_ref[...] + jnp.dot(xh1[:, :H], whh0_ref[...],
                                  preferred_element_type=jnp.float32)
    h0n, c0n = cell(gates, c0[...])
    c0[...] = c0n
    xh1[:, :H] = h0n.astype(bf16)           # layer-1 input half of [x, h]

    # ---- layer 1: single MXU push with K=2H via [x, h] @ [W_ih; W_hh] -------
    gates = jnp.dot(xh1[...], wcat1_ref[...],
                    preferred_element_type=jnp.float32) + b1_ref[...]
    h1n, c1n = cell(gates, c1[...])
    c1[...] = c1n
    xh1[:, H:] = h1n.astype(bf16)            # recurrent half for next step
    xh2[:, :H] = h1n.astype(bf16)            # layer-2 input half

    # ---- layer 2 -------------------------------------------------------------
    gates = jnp.dot(xh2[...], wcat2_ref[...],
                    preferred_element_type=jnp.float32) + b2_ref[...]
    h2n, c2n = cell(gates, c2[...])
    c2[...] = c2n
    xh2[:, H:] = h2n.astype(bf16)

    # ---- FC head fused into the final timestep (lane-dense padded output) ----
    @pl.when(t == pl.num_programs(0) - 1)
    def _store():
        out_ref[...] = (jnp.dot(h2n.astype(bf16), fcw_ref[...],
                                preferred_element_type=jnp.float32)
                        + fcb_ref[...]).astype(out_ref.dtype)


def pallas_lstm3_fc(gates0, kp):
    """gates0: (T, B, 4H) time-major layer-0 pre-activations (no transpose)."""
    T, B, G4 = gates0.shape
    H = G4 // 4
    NP = kp["fc_w_pad"].shape[1]
    return pl.pallas_call(
        functools.partial(_lstm3_fc_kernel, hidden=H),
        out_shape=jax.ShapeDtypeStruct((B, NP), jnp.float32),
        grid=(T,),
        in_specs=[
            pl.BlockSpec((None, B, G4), lambda t: (t, 0, 0)),   # gates0[t]
            _const_spec((H, G4)),       # W_hh layer 0
            _const_spec((2 * H, G4)),   # [W_ih1; W_hh1]
            _const_spec((1, G4)),       # b1
            _const_spec((2 * H, G4)),   # [W_ih2; W_hh2]
            _const_spec((1, G4)),       # b2
            _const_spec((H, NP)),       # fc_w (padded to 128 lanes)
            _const_spec((1, NP)),       # fc_b (padded)
        ],
        out_specs=pl.BlockSpec((B, NP), lambda t: (0, 0)),
        scratch_shapes=[
            pltpu.VMEM((B, 2 * H), jnp.bfloat16),   # xh1 = [h0, h1]
            pltpu.VMEM((B, 2 * H), jnp.bfloat16),   # xh2 = [h1, h2]
            pltpu.VMEM((B, H), jnp.float32),        # c0
            pltpu.VMEM((B, H), jnp.float32),        # c1
            pltpu.VMEM((B, H), jnp.float32),        # c2
        ],
        compiler_params=pltpu.CompilerParams(
            dimension_semantics=("arbitrary",),      # serial recurrence
            vmem_limit_bytes=32 * 1024 * 1024),
        # NOTE: with B=2 each chained matmul uses ~2/256 MXU rows -> the
        # recurrence is latency-bound; batch more sequences for throughput.
    )(gates0, kp["w_hh0"], kp["w_cat1"], kp["b1"], kp["w_cat2"], kp["b2"],
      kp["fc_w_pad"], kp["fc_b_pad"])


# ----------------------------------------------------------------------------
# Plain-JAX glue (all fused under jit)
# ----------------------------------------------------------------------------
def im2col_3x3_nhwc(frames_nchw, k_pad):
    """3x3 conv, stride 1, pad 1 im2col built in NHWC order, directly in bf16.

    (N, C, H, W) -> (N, H*W, k_pad); last dim zero-padded from 9*C to k_pad.
    """
    N, C, H, W = frames_nchw.shape
    x = frames_nchw.transpose(0, 2, 3, 1).astype(jnp.bfloat16)   # NHWC, bf16
    xp = jnp.pad(x, ((0, 0), (1, 1), (1, 1), (0, 0)))
    shifts = [xp[:, dy:dy + H, dx:dx + W, :]
              for dy in range(3) for dx in range(3)]
    patches = jnp.concatenate(shifts, axis=-1)                   # (N, H, W, 9C)
    patches = patches.reshape(N, H * W, 9 * C)
    if k_pad > 9 * C:
        patches = jnp.pad(patches, ((0, 0), (0, 0), (0, k_pad - 9 * C)))
    return patches


def init_params(key, *, in_ch, conv_ch, cnn_out, lstm_hidden, out_size):
    """Torch-like parameterization (weights already transposed for x @ W)."""
    ks = jax.random.split(key, 32)
    s = 0.05
    it = iter(range(32))

    def rnd(shape):
        return s * jax.random.normal(ks[next(it)], shape, jnp.float32)

    p = {
        "conv_w": rnd((in_ch * 9, conv_ch)),
        "conv_b": rnd((conv_ch,)),
        "proj_w": rnd((conv_ch, cnn_out)),
        "proj_b": rnd((cnn_out,)),
        "fc_w": rnd((lstm_hidden, out_size)),
        "fc_b": rnd((out_size,)),
        "lstm": [],
    }
    for layer in range(3):                                   # lstm_num_layers=3
        in_sz = cnn_out if layer == 0 else lstm_hidden
        p["lstm"].append({
            "w_ih": rnd((in_sz, 4 * lstm_hidden)),
            "w_hh": rnd((lstm_hidden, 4 * lstm_hidden)),
            "b_ih": rnd((4 * lstm_hidden,)),
            "b_hh": rnd((4 * lstm_hidden,)),
        })
    return p


def prepare_kernel_params(p, *, k_pad, out_pad):
    """Kernel-ready params: bf16 weights, padded/concatenated layouts, folded biases."""
    l0, l1, l2 = p["lstm"]
    K = p["conv_w"].shape[0]
    out = p["fc_w"].shape[1]
    kp = {
        "conv_w": jnp.pad(p["conv_w"], ((0, k_pad - K), (0, 0))).astype(jnp.bfloat16),
        "conv_b": p["conv_b"].reshape(1, -1),
        "proj_w": p["proj_w"].astype(jnp.bfloat16),
        "proj_b": p["proj_b"].reshape(1, -1),
        "w_ih0": l0["w_ih"].astype(jnp.bfloat16),
        "b0": (l0["b_ih"] + l0["b_hh"]).reshape(1, -1),
        "w_hh0": l0["w_hh"].astype(jnp.bfloat16),
        "w_cat1": jnp.concatenate([l1["w_ih"], l1["w_hh"]], axis=0).astype(jnp.bfloat16),
        "b1": (l1["b_ih"] + l1["b_hh"]).reshape(1, -1),
        "w_cat2": jnp.concatenate([l2["w_ih"], l2["w_hh"]], axis=0).astype(jnp.bfloat16),
        "b2": (l2["b_ih"] + l2["b_hh"]).reshape(1, -1),
        "fc_w_pad": jnp.pad(p["fc_w"], ((0, 0), (0, out_pad - out))).astype(jnp.bfloat16),
        "fc_b_pad": jnp.pad(p["fc_b"], (0, out_pad - out)).reshape(1, -1),
    }
    return kp


def cnn_lstm_forward(kp, x, *, out_size, frames_per_tile=8):
    """x: (B, T, C, H, W) float32 -> (B, out_size) float32."""
    B, T, C, H, W = x.shape
    HW = H * W
    Hh = kp["w_hh0"].shape[0]
    assert (T * B) % frames_per_tile == 0

    # Time-major frame order so kernel 1 emits gates0 as (T, B, 4H) directly
    # (no HBM transpose between the two kernels).
    frames = x.transpose(1, 0, 2, 3, 4).reshape(T * B, C, H, W)
    patches = im2col_3x3_nhwc(frames, kp["conv_w"].shape[0])        # (TB, HW, Kp)
    patches = patches.reshape(T * B * HW, -1)                       # bf16

    gates0 = pallas_cnn_to_gates(patches, kp,
                                 frames_per_tile=frames_per_tile, hw=HW)
    gates0 = gates0.reshape(T, B, 4 * Hh)                           # free reshape

    # Fused 3-layer LSTM + FC head (dropout is identity in eval mode).
    out_pad = pallas_lstm3_fc(gates0, kp)                           # (B, 128)
    return out_pad[:, :out_size]


def reference_forward(kp, x, *, out_size):
    """Pure-JAX reference mirroring the kernel math (incl. bf16 operand casts)."""
    bf16 = jnp.bfloat16
    B, T, C, H, W = x.shape
    Hh = kp["w_hh0"].shape[0]
    frames = x.transpose(1, 0, 2, 3, 4).reshape(T * B, C, H, W)
    patches = im2col_3x3_nhwc(frames, kp["conv_w"].shape[0])
    conv = jnp.einsum("npk,kc->npc", patches, kp["conv_w"],
                      preferred_element_type=jnp.float32) + kp["conv_b"]
    conv = jnp.maximum(conv, 0.0)
    pooled = conv.mean(axis=1)
    feat = jnp.dot(pooled.astype(bf16), kp["proj_w"],
                   preferred_element_type=jnp.float32) + kp["proj_b"]
    gates0 = (jnp.dot(feat.astype(bf16), kp["w_ih0"],
                      preferred_element_type=jnp.float32) + kp["b0"])
    gates0 = gates0.reshape(T, B, 4 * Hh)

    def cell(g, c_prev):
        i = jax.nn.sigmoid(g[:, :Hh]); f = jax.nn.sigmoid(g[:, Hh:2 * Hh])
        gg = jnp.tanh(g[:, 2 * Hh:3 * Hh]); o = jax.nn.sigmoid(g[:, 3 * Hh:])
        c = f * c_prev + i * gg
        return o * jnp.tanh(c), c

    h0 = jnp.zeros((B, Hh), bf16); h1 = jnp.zeros((B, Hh), bf16)
    h2 = jnp.zeros((B, Hh), bf16)
    c0 = jnp.zeros((B, Hh), jnp.float32); c1 = c0; c2 = c0
    for t in range(T):
        g = gates0[t] + jnp.dot(h0, kp["w_hh0"], preferred_element_type=jnp.float32)
        h0f, c0 = cell(g, c0); h0 = h0f.astype(bf16)
        g = jnp.dot(jnp.concatenate([h0, h1], -1), kp["w_cat1"],
                    preferred_element_type=jnp.float32) + kp["b1"]
        h1f, c1 = cell(g, c1); h1 = h1f.astype(bf16)
        g = jnp.dot(jnp.concatenate([h1, h2], -1), kp["w_cat2"],
                    preferred_element_type=jnp.float32) + kp["b2"]
        h2f, c2 = cell(g, c2); h2 = h2f.astype(bf16)
    out = jnp.dot(h2, kp["fc_w_pad"], preferred_element_type=jnp.float32) + kp["fc_b_pad"]
    return out[:, :out_size]


# ----------------------------------------------------------------------------
if __name__ == "__main__":
    # Small deterministic config consistent with the module's forward:
    # (batch, seq, C, H, W); scaled-down feature/hidden sizes, lane-dense (128).
    B, T, C, H, W = 2, 8, 3, 16, 16
    CONV_CH = 128        # conv channels of the resnet18 stand-in (lane-dense)
    CNN_OUT = 128        # scaled-down cnn_output_size (512 in the module)
    LSTM_HIDDEN = 128    # scaled-down lstm_hidden_size (2048 in the module)
    OUT_SIZE = 2
    K_PAD = 32           # im2col contraction padded from 27
    OUT_PAD = 128        # lane-dense FC head output (sliced back to OUT_SIZE)

    key = jax.random.PRNGKey(0)
    k_x, k_p = jax.random.split(key)
    x = jax.random.normal(k_x, (B, T, C, H, W), jnp.float32)
    params = init_params(k_p, in_ch=C, conv_ch=CONV_CH, cnn_out=CNN_OUT,
                         lstm_hidden=LSTM_HIDDEN, out_size=OUT_SIZE)
    kp = prepare_kernel_params(params, k_pad=K_PAD, out_pad=OUT_PAD)

    fwd = jax.jit(functools.partial(cnn_lstm_forward, out_size=OUT_SIZE))
    out = jax.block_until_ready(fwd(kp, x))

    ref = jax.block_until_ready(
        jax.jit(functools.partial(reference_forward, out_size=OUT_SIZE))(kp, x))

    assert out.shape == (B, OUT_SIZE) and out.dtype == jnp.float32
    assert bool(jnp.all(jnp.isfinite(out)))
    assert bool(jnp.allclose(out, ref, atol=2e-2, rtol=2e-2)), (out, ref)
    print("KERNEL_OK")
</pallas_src>

<mosaic_0001>
module attributes {stable_mosaic.version = 11 : i64} {
  func.func @_cnn_to_gates_kernel(%arg0: i32, %arg1: memref<2048x32xbf16, #tpu.memory_space<vmem>>, %arg2: memref<32x128xbf16, #tpu.memory_space<vmem>>, %arg3: memref<1x128xf32, #tpu.memory_space<vmem>>, %arg4: memref<128x128xbf16, #tpu.memory_space<vmem>>, %arg5: memref<1x128xf32, #tpu.memory_space<vmem>>, %arg6: memref<128x512xbf16, #tpu.memory_space<vmem>>, %arg7: memref<1x512xf32, #tpu.memory_space<vmem>>, %arg8: memref<8x512xf32, #tpu.memory_space<vmem>>) attributes {dimension_semantics = [#tpu.dimension_semantics<parallel>], iteration_bounds = array<i64: 2>, scalar_prefetch = 0 : i64, scratch_operands = 0 : i64, tpu.core_type = #tpu.core_type<tc>, window_params = [{transform_indices = @transform_0, window_bounds = array<i64: 2048, 32>}, {pipeline_mode = #tpu.pipeline_mode<synchronous>, transform_indices = @transform_1, window_bounds = array<i64: 32, 128>}, {pipeline_mode = #tpu.pipeline_mode<synchronous>, transform_indices = @transform_2, window_bounds = array<i64: 1, 128>}, {pipeline_mode = #tpu.pipeline_mode<synchronous>, transform_indices = @transform_3, window_bounds = array<i64: 128, 128>}, {pipeline_mode = #tpu.pipeline_mode<synchronous>, transform_indices = @transform_4, window_bounds = array<i64: 1, 128>}, {pipeline_mode = #tpu.pipeline_mode<synchronous>, transform_indices = @transform_5, window_bounds = array<i64: 128, 512>}, {pipeline_mode = #tpu.pipeline_mode<synchronous>, transform_indices = @transform_6, window_bounds = array<i64: 1, 512>}, {transform_indices = @transform_7, window_bounds = array<i64: 8, 512>}]} {
    %c0 = arith.constant 0 : index
    %c0_0 = arith.constant 0 : index
    %0 = vector.load %arg1[%c0, %c0_0] : memref<2048x32xbf16, #tpu.memory_space<vmem>>, vector<2048x32xbf16>
    %c0_1 = arith.constant 0 : index
    %c0_2 = arith.constant 0 : index
    %1 = vector.load %arg2[%c0_1, %c0_2] : memref<32x128xbf16, #tpu.memory_space<vmem>>, vector<32x128xbf16>
    %cst = arith.constant dense<0.000000e+00> : vector<2048x128xf32>
    %2 = tpu.matmul %0, %1, %cst {dimension_numbers = #tpu.dot_dimension_numbers<[1], [0], [0], [1], [0, 0, 1, 1], [], []>} : vector<2048x32xbf16>, vector<32x128xbf16>, vector<2048x128xf32> -> vector<2048x128xf32>
    %c0_3 = arith.constant 0 : index
    %c0_4 = arith.constant 0 : index
    %3 = vector.load %arg3[%c0_3, %c0_4] : memref<1x128xf32, #tpu.memory_space<vmem>>, vector<1x128xf32>
    %4 = vector.broadcast %3 : vector<1x128xf32> to vector<2048x128xf32>
    %5 = arith.addf %2, %4 : vector<2048x128xf32>
    %cst_5 = arith.constant 0.000000e+00 : f32
    %6 = vector.broadcast %cst_5 : f32 to vector<2048x128xf32>
    %7 = arith.maximumf %5, %6 : vector<2048x128xf32>
    %8 = vector.shape_cast %7 : vector<2048x128xf32> to vector<8x256x128xf32>
    %cst_6 = arith.constant dense<0.000000e+00> : vector<8x128xf32>
    %9 = vector.multi_reduction <add>, %8, %cst_6 [1] : vector<8x256x128xf32> to vector<8x128xf32>
    %cst_7 = arith.constant 3.906250e-03 : f32
    %10 = vector.broadcast %cst_7 : f32 to vector<8x128xf32>
    %11 = arith.mulf %9, %10 : vector<8x128xf32>
    %12 = arith.truncf %11 : vector<8x128xf32> to vector<8x128xbf16>
    %c0_8 = arith.constant 0 : index
    %c0_9 = arith.constant 0 : index
    %13 = vector.load %arg4[%c0_8, %c0_9] : memref<128x128xbf16, #tpu.memory_space<vmem>>, vector<128x128xbf16>
    %cst_10 = arith.constant dense<0.000000e+00> : vector<8x128xf32>
    %14 = tpu.matmul %12, %13, %cst_10 {dimension_numbers = #tpu.dot_dimension_numbers<[1], [0], [0], [1], [0, 0, 1, 1], [], []>} : vector<8x128xbf16>, vector<128x128xbf16>, vector<8x128xf32> -> vector<8x128xf32>
    %c0_11 = arith.constant 0 : index
    %c0_12 = arith.constant 0 : index
    %15 = vector.load %arg5[%c0_11, %c0_12] : memref<1x128xf32, #tpu.memory_space<vmem>>, vector<1x128xf32>
    %16 = vector.broadcast %15 : vector<1x128xf32> to vector<8x128xf32>
    %17 = arith.addf %14, %16 : vector<8x128xf32>
    %18 = arith.truncf %17 : vector<8x128xf32> to vector<8x128xbf16>
    %c0_13 = arith.constant 0 : index
    %c0_14 = arith.constant 0 : index
    %19 = vector.load %arg6[%c0_13, %c0_14] : memref<128x512xbf16, #tpu.memory_space<vmem>>, vector<128x512xbf16>
    %cst_15 = arith.constant dense<0.000000e+00> : vector<8x512xf32>
    %20 = tpu.matmul %18, %19, %cst_15 {dimension_numbers = #tpu.dot_dimension_numbers<[1], [0], [0], [1], [0, 0, 1, 1], [], []>} : vector<8x128xbf16>, vector<128x512xbf16>, vector<8x512xf32> -> vector<8x512xf32>
    %c0_16 = arith.constant 0 : index
    %c0_17 = arith.constant 0 : index
    %21 = vector.load %arg7[%c0_16, %c0_17] : memref<1x512xf32, #tpu.memory_space<vmem>>, vector<1x512xf32>
    %22 = vector.broadcast %21 : vector<1x512xf32> to vector<8x512xf32>
    %23 = arith.addf %20, %22 : vector<8x512xf32>
    %c0_18 = arith.constant 0 : index
    %c0_19 = arith.constant 0 : index
    %24 = vector.load %arg8[%c0_18, %c0_19] : memref<8x512xf32, #tpu.memory_space<vmem>>, vector<8x512xf32>
    tpu.vector_store %arg8[%c0_18, %c0_19], %23 {strides = array<i32>} : memref<8x512xf32, #tpu.memory_space<vmem>>, vector<8x512xf32>,
    return
  }
  func.func @transform_0(%arg0: i32) -> (i32, i32) {
    %c0_i32 = arith.constant 0 : i32
    %c0_i32_0 = arith.constant 0 : i32
    return %arg0, %c0_i32 : i32, i32
  }
  func.func @transform_1(%arg0: i32) -> (i32, i32) {
    %c0_i32 = arith.constant 0 : i32
    %c0_i32_0 = arith.constant 0 : i32
    %c0_i32_1 = arith.constant 0 : i32
    return %c0_i32, %c0_i32_0 : i32, i32
  }
  func.func @transform_2(%arg0: i32) -> (i32, i32) {
    %c0_i32 = arith.constant 0 : i32
    %c0_i32_0 = arith.constant 0 : i32
    %c0_i32_1 = arith.constant 0 : i32
    return %c0_i32, %c0_i32_0 : i32, i32
  }
  func.func @transform_3(%arg0: i32) -> (i32, i32) {
    %c0_i32 = arith.constant 0 : i32
    %c0_i32_0 = arith.constant 0 : i32
    %c0_i32_1 = arith.constant 0 : i32
    return %c0_i32, %c0_i32_0 : i32, i32
  }
  func.func @transform_4(%arg0: i32) -> (i32, i32) {
    %c0_i32 = arith.constant 0 : i32
    %c0_i32_0 = arith.constant 0 : i32
    %c0_i32_1 = arith.constant 0 : i32
    return %c0_i32, %c0_i32_0 : i32, i32
  }
  func.func @transform_5(%arg0: i32) -> (i32, i32) {
    %c0_i32 = arith.constant 0 : i32
    %c0_i32_0 = arith.constant 0 : i32
    %c0_i32_1 = arith.constant 0 : i32
    return %c0_i32, %c0_i32_0 : i32, i32
  }
  func.func @transform_6(%arg0: i32) -> (i32, i32) {
    %c0_i32 = arith.constant 0 : i32
    %c0_i32_0 = arith.constant 0 : i32
    %c0_i32_1 = arith.constant 0 : i32
    return %c0_i32, %c0_i32_0 : i32, i32
  }
  func.func @transform_7(%arg0: i32) -> (i32, i32) {
    %c0_i32 = arith.constant 0 : i32
    %c0_i32_0 = arith.constant 0 : i32
    return %arg0, %c0_i32 : i32, i32
  }
}

module attributes {stable_mosaic.version = 11 : i64} {
  func.func @_lstm3_fc_kernel(%arg0: i32, %arg1: memref<1x2x512xf32, #tpu.memory_space<vmem>>, %arg2: memref<128x512xbf16, #tpu.memory_space<vmem>>, %arg3: memref<256x512xbf16, #tpu.memory_space<vmem>>, %arg4: memref<1x512xf32, #tpu.memory_space<vmem>>, %arg5: memref<256x512xbf16, #tpu.memory_space<vmem>>, %arg6: memref<1x512xf32, #tpu.memory_space<vmem>>, %arg7: memref<128x128xbf16, #tpu.memory_space<vmem>>, %arg8: memref<1x128xf32, #tpu.memory_space<vmem>>, %arg9: memref<2x128xf32, #tpu.memory_space<vmem>>, %arg10: memref<2x256xbf16, #tpu.memory_space<vmem>>, %arg11: memref<2x256xbf16, #tpu.memory_space<vmem>>, %arg12: memref<2x128xf32, #tpu.memory_space<vmem>>, %arg13: memref<2x128xf32, #tpu.memory_space<vmem>>, %arg14: memref<2x128xf32, #tpu.memory_space<vmem>>) attributes {dimension_semantics = [#tpu.dimension_semantics<arbitrary>], iteration_bounds = array<i64: 8>, scalar_prefetch = 0 : i64, scratch_operands = 5 : i64, tpu.core_type = #tpu.core_type<tc>, window_params = [{transform_indices = @transform_0, window_bounds = array<i64: 1, 2, 512>}, {pipeline_mode = #tpu.pipeline_mode<synchronous>, transform_indices = @transform_1, window_bounds = array<i64: 128, 512>}, {pipeline_mode = #tpu.pipeline_mode<synchronous>, transform_indices = @transform_2, window_bounds = array<i64: 256, 512>}, {pipeline_mode = #tpu.pipeline_mode<synchronous>, transform_indices = @transform_3, window_bounds = array<i64: 1, 512>}, {pipeline_mode = #tpu.pipeline_mode<synchronous>, transform_indices = @transform_4, window_bounds = array<i64: 256, 512>}, {pipeline_mode = #tpu.pipeline_mode<synchronous>, transform_indices = @transform_5, window_bounds = array<i64: 1, 512>}, {pipeline_mode = #tpu.pipeline_mode<synchronous>, transform_indices = @transform_6, window_bounds = array<i64: 128, 128>}, {pipeline_mode = #tpu.pipeline_mode<synchronous>, transform_indices = @transform_7, window_bounds = array<i64: 1, 128>}, {pipeline_mode = #tpu.pipeline_mode<synchronous>, transform_indices = @transform_8, window_bounds = array<i64: 2, 128>}]} {
    %c0_i32 = arith.constant 0 : i32
    %0 = arith.cmpi eq, %arg0, %c0_i32 : i32
    %1 = arith.extui %0 : i1 to i32
    %c0_i32_0 = arith.constant 0 : i32
    %2 = arith.cmpi ne, %1, %c0_i32_0 : i32
    scf.if %2 {
      %cst_50 = arith.constant 0.000000e+00 : bf16
      %113 = vector.broadcast %cst_50 : bf16 to vector<2x256xbf16>
      %c0_51 = arith.constant 0 : index
      %c0_52 = arith.constant 0 : index
      %114 = vector.load %arg10[%c0_51, %c0_52] : memref<2x256xbf16, #tpu.memory_space<vmem>>, vector<2x256xbf16>
      tpu.vector_store %arg10[%c0_51, %c0_52], %113 {strides = array<i32>} : memref<2x256xbf16, #tpu.memory_space<vmem>>, vector<2x256xbf16>,
      %cst_53 = arith.constant 0.000000e+00 : bf16
      %115 = vector.broadcast %cst_53 : bf16 to vector<2x256xbf16>
      %c0_54 = arith.constant 0 : index
      %c0_55 = arith.constant 0 : index
      %116 = vector.load %arg11[%c0_54, %c0_55] : memref<2x256xbf16, #tpu.memory_space<vmem>>, vector<2x256xbf16>
      tpu.vector_store %arg11[%c0_54, %c0_55], %115 {strides = array<i32>} : memref<2x256xbf16, #tpu.memory_space<vmem>>, vector<2x256xbf16>,
      %cst_56 = arith.constant 0.000000e+00 : f32
      %117 = vector.broadcast %cst_56 : f32 to vector<2x128xf32>
      %c0_57 = arith.constant 0 : index
      %c0_58 = arith.constant 0 : index
      %118 = vector.load %arg12[%c0_57, %c0_58] : memref<2x128xf32, #tpu.memory_space<vmem>>, vector<2x128xf32>
      tpu.vector_store %arg12[%c0_57, %c0_58], %117 {strides = array<i32>} : memref<2x128xf32, #tpu.memory_space<vmem>>, vector<2x128xf32>,
      %cst_59 = arith.constant 0.000000e+00 : f32
      %119 = vector.broadcast %cst_59 : f32 to vector<2x128xf32>
      %c0_60 = arith.constant 0 : index
      %c0_61 = arith.constant 0 : index
      %120 = vector.load %arg13[%c0_60, %c0_61] : memref<2x128xf32, #tpu.memory_space<vmem>>, vector<2x128xf32>
      tpu.vector_store %arg13[%c0_60, %c0_61], %119 {strides = array<i32>} : memref<2x128xf32, #tpu.memory_space<vmem>>, vector<2x128xf32>,
      %cst_62 = arith.constant 0.000000e+00 : f32
      %121 = vector.broadcast %cst_62 : f32 to vector<2x128xf32>
      %c0_63 = arith.constant 0 : index
      %c0_64 = arith.constant 0 : index
      %122 = vector.load %arg14[%c0_63, %c0_64] : memref<2x128xf32, #tpu.memory_space<vmem>>, vector<2x128xf32>
      tpu.vector_store %arg14[%c0_63, %c0_64], %121 {strides = array<i32>} : memref<2x128xf32, #tpu.memory_space<vmem>>, vector<2x128xf32>,
      %cst_65 = arith.constant 0.000000e+00 : f32
      %123 = vector.broadcast %cst_65 : f32 to vector<2x128xf32>
      %c0_66 = arith.constant 0 : index
      %c0_67 = arith.constant 0 : index
      %124 = vector.load %arg9[%c0_66, %c0_67] : memref<2x128xf32, #tpu.memory_space<vmem>>, vector<2x128xf32>
      tpu.vector_store %arg9[%c0_66, %c0_67], %123 {strides = array<i32>} : memref<2x128xf32, #tpu.memory_space<vmem>>, vector<2x128xf32>,
    } else {
    }
    %c0 = arith.constant 0 : index
    %c0_1 = arith.constant 0 : index
    %c0_2 = arith.constant 0 : index
    %3 = vector.load %arg1[%c0, %c0_1, %c0_2] : memref<1x2x512xf32, #tpu.memory_space<vmem>>, vector<1x2x512xf32>
    %4 = vector.shape_cast %3 : vector<1x2x512xf32> to vector<2x512xf32>
    %c0_3 = arith.constant 0 : index
    %c0_4 = arith.constant 0 : index
    %5 = vector.load %arg10[%c0_3, %c0_4] : memref<2x256xbf16, #tpu.memory_space<vmem>>, vector<2x128xbf16>
    %c0_5 = arith.constant 0 : index
    %c0_6 = arith.constant 0 : index
    %6 = vector.load %arg2[%c0_5, %c0_6] : memref<128x512xbf16, #tpu.memory_space<vmem>>, vector<128x512xbf16>
    %cst = arith.constant dense<0.000000e+00> : vector<2x512xf32>
    %7 = tpu.matmul %5, %6, %cst {dimension_numbers = #tpu.dot_dimension_numbers<[1], [0], [0], [1], [0, 0, 1, 1], [], []>} : vector<2x128xbf16>, vector<128x512xbf16>, vector<2x512xf32> -> vector<2x512xf32>
    %8 = arith.addf %4, %7 : vector<2x512xf32>
    %c0_7 = arith.constant 0 : index
    %c0_8 = arith.constant 0 : index
    %9 = vector.load %arg12[%c0_7, %c0_8] : memref<2x128xf32, #tpu.memory_space<vmem>>, vector<2x128xf32>
    %10 = vector.extract_strided_slice %8 {offsets = [0, 0], sizes = [2, 128], strides = [1, 1]} : vector<2x512xf32> to vector<2x128xf32>
    %11 = arith.negf %10 : vector<2x128xf32>
    %12 = math.exp %11 : vector<2x128xf32>
    %cst_9 = arith.constant 1.000000e+00 : f32
    %13 = vector.broadcast %cst_9 : f32 to vector<2x128xf32>
    %14 = arith.addf %13, %12 : vector<2x128xf32>
    %15 = arith.divf %13, %14 : vector<2x128xf32>
    %16 = vector.extract_strided_slice %8 {offsets = [0, 128], sizes = [2, 128], strides = [1, 1]} : vector<2x512xf32> to vector<2x128xf32>
    %17 = arith.negf %16 : vector<2x128xf32>
    %18 = math.exp %17 : vector<2x128xf32>
    %cst_10 = arith.constant 1.000000e+00 : f32
    %19 = vector.broadcast %cst_10 : f32 to vector<2x128xf32>
    %20 = arith.addf %19, %18 : vector<2x128xf32>
    %21 = arith.divf %19, %20 : vector<2x128xf32>
    %22 = vector.extract_strided_slice %8 {offsets = [0, 256], sizes = [2, 128], strides = [1, 1]} : vector<2x512xf32> to vector<2x128xf32>
    %23 = math.tanh %22 : vector<2x128xf32>
    %24 = vector.extract_strided_slice %8 {offsets = [0, 384], sizes = [2, 128], strides = [1, 1]} : vector<2x512xf32> to vector<2x128xf32>
    %25 = arith.negf %24 : vector<2x128xf32>
    %26 = math.exp %25 : vector<2x128xf32>
    %cst_11 = arith.constant 1.000000e+00 : f32
    %27 = vector.broadcast %cst_11 : f32 to vector<2x128xf32>
    %28 = arith.addf %27, %26 : vector<2x128xf32>
    %29 = arith.divf %27, %28 : vector<2x128xf32>
    %30 = arith.mulf %21, %9 : vector<2x128xf32>
    %31 = arith.mulf %15, %23 : vector<2x128xf32>
    %32 = arith.addf %30, %31 : vector<2x128xf32>
    %33 = math.tanh %32 : vector<2x128xf32>
    %34 = arith.mulf %29, %33 : vector<2x128xf32>
    %c0_12 = arith.constant 0 : index
    %c0_13 = arith.constant 0 : index
    %35 = vector.load %arg12[%c0_12, %c0_13] : memref<2x128xf32, #tpu.memory_space<vmem>>, vector<2x128xf32>
    tpu.vector_store %arg12[%c0_12, %c0_13], %32 {strides = array<i32>} : memref<2x128xf32, #tpu.memory_space<vmem>>, vector<2x128xf32>,
    %36 = arith.truncf %34 : vector<2x128xf32> to vector<2x128xbf16>
    %c0_14 = arith.constant 0 : index
    %c0_15 = arith.constant 0 : index
    %37 = vector.load %arg10[%c0_14, %c0_15] : memref<2x256xbf16, #tpu.memory_space<vmem>>, vector<2x128xbf16>
    tpu.vector_store %arg10[%c0_14, %c0_15], %36 {strides = array<i32>} : memref<2x256xbf16, #tpu.memory_space<vmem>>, vector<2x128xbf16>,
    %c0_16 = arith.constant 0 : index
    %c0_17 = arith.constant 0 : index
    %38 = vector.load %arg10[%c0_16, %c0_17] : memref<2x256xbf16, #tpu.memory_space<vmem>>, vector<2x256xbf16>
    %c0_18 = arith.constant 0 : index
    %c0_19 = arith.constant 0 : index
    %39 = vector.load %arg3[%c0_18, %c0_19] : memref<256x512xbf16, #tpu.memory_space<vmem>>, vector<256x512xbf16>
    %cst_20 = arith.constant dense<0.000000e+00> : vector<2x512xf32>
    %40 = tpu.matmul %38, %39, %cst_20 {dimension_numbers = #tpu.dot_dimension_numbers<[1], [0], [0], [1], [0, 0, 1, 1], [], []>} : vector<2x256xbf16>, vector<256x512xbf16>, vector<2x512xf32> -> vector<2x512xf32>
    %c0_21 = arith.constant 0 : index
    %c0_22 = arith.constant 0 : index
    %41 = vector.load %arg4[%c0_21, %c0_22] : memref<1x512xf32, #tpu.memory_space<vmem>>, vector<1x512xf32>
    %42 = vector.broadcast %41 : vector<1x512xf32> to vector<2x512xf32>
    %43 = arith.addf %40, %42 : vector<2x512xf32>
    %c0_23 = arith.constant 0 : index
    %c0_24 = arith.constant 0 : index
    %44 = vector.load %arg13[%c0_23, %c0_24] : memref<2x128xf32, #tpu.memory_space<vmem>>, vector<2x128xf32>
    %45 = vector.extract_strided_slice %43 {offsets = [0, 0], sizes = [2, 128], strides = [1, 1]} : vector<2x512xf32> to vector<2x128xf32>
    %46 = arith.negf %45 : vector<2x128xf32>
    %47 = math.exp %46 : vector<2x128xf32>
    %cst_25 = arith.constant 1.000000e+00 : f32
    %48 = vector.broadcast %cst_25 : f32 to vector<2x128xf32>
    %49 = arith.addf %48, %47 : vector<2x128xf32>
    %50 = arith.divf %48, %49 : vector<2x128xf32>
    %51 = vector.extract_strided_slice %43 {offsets = [0, 128], sizes = [2, 128], strides = [1, 1]} : vector<2x512xf32> to vector<2x128xf32>
    %52 = arith.negf %51 : vector<2x128xf32>
    %53 = math.exp %52 : vector<2x128xf32>
    %cst_26 = arith.constant 1.000000e+00 : f32
    %54 = vector.broadcast %cst_26 : f32 to vector<2x128xf32>
    %55 = arith.addf %54, %53 : vector<2x128xf32>
    %56 = arith.divf %54, %55 : vector<2x128xf32>
    %57 = vector.extract_strided_slice %43 {offsets = [0, 256], sizes = [2, 128], strides = [1, 1]} : vector<2x512xf32> to vector<2x128xf32>
    %58 = math.tanh %57 : vector<2x128xf32>
    %59 = vector.extract_strided_slice %43 {offsets = [0, 384], sizes = [2, 128], strides = [1, 1]} : vector<2x512xf32> to vector<2x128xf32>
    %60 = arith.negf %59 : vector<2x128xf32>
    %61 = math.exp %60 : vector<2x128xf32>
    %cst_27 = arith.constant 1.000000e+00 : f32
    %62 = vector.broadcast %cst_27 : f32 to vector<2x128xf32>
    %63 = arith.addf %62, %61 : vector<2x128xf32>
    %64 = arith.divf %62, %63 : vector<2x128xf32>
    %65 = arith.mulf %56, %44 : vector<2x128xf32>
    %66 = arith.mulf %50, %58 : vector<2x128xf32>
    %67 = arith.addf %65, %66 : vector<2x128xf32>
    %68 = math.tanh %67 : vector<2x128xf32>
    %69 = arith.mulf %64, %68 : vector<2x128xf32>
    %c0_28 = arith.constant 0 : index
    %c0_29 = arith.constant 0 : index
    %70 = vector.load %arg13[%c0_28, %c0_29] : memref<2x128xf32, #tpu.memory_space<vmem>>, vector<2x128xf32>
    tpu.vector_store %arg13[%c0_28, %c0_29], %67 {strides = array<i32>} : memref<2x128xf32, #tpu.memory_space<vmem>>, vector<2x128xf32>,
    %71 = arith.truncf %69 : vector<2x128xf32> to vector<2x128xbf16>
    %c0_30 = arith.constant 0 : index
    %c128 = arith.constant 128 : index
    %72 = vector.load %arg10[%c0_30, %c128] : memref<2x256xbf16, #tpu.memory_space<vmem>>, vector<2x128xbf16>
    tpu.vector_store %arg10[%c0_30, %c128], %71 {strides = array<i32>} : memref<2x256xbf16, #tpu.memory_space<vmem>>, vector<2x128xbf16>,
    %73 = arith.truncf %69 : vector<2x128xf32> to vector<2x128xbf16>
    %c0_31 = arith.constant 0 : index
    %c0_32 = arith.constant 0 : index
    %74 = vector.load %arg11[%c0_31, %c0_32] : memref<2x256xbf16, #tpu.memory_space<vmem>>, vector<2x128xbf16>
    tpu.vector_store %arg11[%c0_31, %c0_32], %73 {strides = array<i32>} : memref<2x256xbf16, #tpu.memory_space<vmem>>, vector<2x128xbf16>,
    %c0_33 = arith.constant 0 : index
    %c0_34 = arith.constant 0 : index
    %75 = vector.load %arg11[%c0_33, %c0_34] : memref<2x256xbf16, #tpu.memory_space<vmem>>, vector<2x256xbf16>
    %c0_35 = arith.constant 0 : index
    %c0_36 = arith.constant 0 : index
    %76 = vector.load %arg5[%c0_35, %c0_36] : memref<256x512xbf16, #tpu.memory_space<vmem>>, vector<256x512xbf16>
    %cst_37 = arith.constant dense<0.000000e+00> : vector<2x512xf32>
    %77 = tpu.matmul %75, %76, %cst_37 {dimension_numbers = #tpu.dot_dimension_numbers<[1], [0], [0], [1], [0, 0, 1, 1], [], []>} : vector<2x256xbf16>, vector<256x512xbf16>, vector<2x512xf32> -> vector<2x512xf32>
    %c0_38 = arith.constant 0 : index
    %c0_39 = arith.constant 0 : index
    %78 = vector.load %arg6[%c0_38, %c0_39] : memref<1x512xf32, #tpu.memory_space<vmem>>, vector<1x512xf32>
    %79 = vector.broadcast %78 : vector<1x512xf32> to vector<2x512xf32>
    %80 = arith.addf %77, %79 : vector<2x512xf32>
    %c0_40 = arith.constant 0 : index
    %c0_41 = arith.constant 0 : index
    %81 = vector.load %arg14[%c0_40, %c0_41] : memref<2x128xf32, #tpu.memory_space<vmem>>, vector<2x128xf32>
    %82 = vector.extract_strided_slice %80 {offsets = [0, 0], sizes = [2, 128], strides = [1, 1]} : vector<2x512xf32> to vector<2x128xf32>
    %83 = arith.negf %82 : vector<2x128xf32>
    %84 = math.exp %83 : vector<2x128xf32>
    %cst_42 = arith.constant 1.000000e+00 : f32
    %85 = vector.broadcast %cst_42 : f32 to vector<2x128xf32>
    %86 = arith.addf %85, %84 : vector<2x128xf32>
    %87 = arith.divf %85, %86 : vector<2x128xf32>
    %88 = vector.extract_strided_slice %80 {offsets = [0, 128], sizes = [2, 128], strides = [1, 1]} : vector<2x512xf32> to vector<2x128xf32>
    %89 = arith.negf %88 : vector<2x128xf32>
    %90 = math.exp %89 : vector<2x128xf32>
    %cst_43 = arith.constant 1.000000e+00 : f32
    %91 = vector.broadcast %cst_43 : f32 to vector<2x128xf32>
    %92 = arith.addf %91, %90 : vector<2x128xf32>
    %93 = arith.divf %91, %92 : vector<2x128xf32>
    %94 = vector.extract_strided_slice %80 {offsets = [0, 256], sizes = [2, 128], strides = [1, 1]} : vector<2x512xf32> to vector<2x128xf32>
    %95 = math.tanh %94 : vector<2x128xf32>
    %96 = vector.extract_strided_slice %80 {offsets = [0, 384], sizes = [2, 128], strides = [1, 1]} : vector<2x512xf32> to vector<2x128xf32>
    %97 = arith.negf %96 : vector<2x128xf32>
    %98 = math.exp %97 : vector<2x128xf32>
    %cst_44 = arith.constant 1.000000e+00 : f32
    %99 = vector.broadcast %cst_44 : f32 to vector<2x128xf32>
    %100 = arith.addf %99, %98 : vector<2x128xf32>
    %101 = arith.divf %99, %100 : vector<2x128xf32>
    %102 = arith.mulf %93, %81 : vector<2x128xf32>
    %103 = arith.mulf %87, %95 : vector<2x128xf32>
    %104 = arith.addf %102, %103 : vector<2x128xf32>
    %105 = math.tanh %104 : vector<2x128xf32>
    %106 = arith.mulf %101, %105 : vector<2x128xf32>
    %c0_45 = arith.constant 0 : index
    %c0_46 = arith.constant 0 : index
    %107 = vector.load %arg14[%c0_45, %c0_46] : memref<2x128xf32, #tpu.memory_space<vmem>>, vector<2x128xf32>
    tpu.vector_store %arg14[%c0_45, %c0_46], %104 {strides = array<i32>} : memref<2x128xf32, #tpu.memory_space<vmem>>, vector<2x128xf32>,
    %108 = arith.truncf %106 : vector<2x128xf32> to vector<2x128xbf16>
    %c0_47 = arith.constant 0 : index
    %c128_48 = arith.constant 128 : index
    %109 = vector.load %arg11[%c0_47, %c128_48] : memref<2x256xbf16, #tpu.memory_space<vmem>>, vector<2x128xbf16>
    tpu.vector_store %arg11[%c0_47, %c128_48], %108 {strides = array<i32>} : memref<2x256xbf16, #tpu.memory_space<vmem>>, vector<2x128xbf16>,
    %c7_i32 = arith.constant 7 : i32
    %110 = arith.cmpi eq, %arg0, %c7_i32 : i32
    %111 = arith.extui %110 : i1 to i32
    %c0_i32_49 = arith.constant 0 : i32
    %112 = arith.cmpi ne, %111, %c0_i32_49 : i32
    scf.if %112 {
      %113 = arith.truncf %106 : vector<2x128xf32> to vector<2x128xbf16>
      %c0_50 = arith.constant 0 : index
      %c0_51 = arith.constant 0 : index
      %114 = vector.load %arg7[%c0_50, %c0_51] : memref<128x128xbf16, #tpu.memory_space<vmem>>, vector<128x128xbf16>
      %cst_52 = arith.constant dense<0.000000e+00> : vector<2x128xf32>
      %115 = tpu.matmul %113, %114, %cst_52 {dimension_numbers = #tpu.dot_dimension_numbers<[1], [0], [0], [1], [0, 0, 1, 1], [], []>} : vector<2x128xbf16>, vector<128x128xbf16>, vector<2x128xf32> -> vector<2x128xf32>
      %c0_53 = arith.constant 0 : index
      %c0_54 = arith.constant 0 : index
      %116 = vector.load %arg8[%c0_53, %c0_54] : memref<1x128xf32, #tpu.memory_space<vmem>>, vector<1x128xf32>
      %117 = vector.broadcast %116 : vector<1x128xf32> to vector<2x128xf32>
      %118 = arith.addf %115, %117 : vector<2x128xf32>
      %c0_55 = arith.constant 0 : index
      %c0_56 = arith.constant 0 : index
      %119 = vector.load %arg9[%c0_55, %c0_56] : memref<2x128xf32, #tpu.memory_space<vmem>>, vector<2x128xf32>
      tpu.vector_store %arg9[%c0_55, %c0_56], %118 {strides = array<i32>} : memref<2x128xf32, #tpu.memory_space<vmem>>, vector<2x128xf32>,
    } else {
    }
    return
  }
  func.func @transform_0(%arg0: i32) -> (i32, i32, i32) {
    %c0_i32 = arith.constant 0 : i32
    %c0_i32_0 = arith.constant 0 : i32
    %c0_i32_1 = arith.constant 0 : i32
    return %arg0, %c0_i32, %c0_i32_0 : i32, i32, i32
  }
  func.func @transform_1(%arg0: i32) -> (i32, i32) {
    %c0_i32 = arith.constant 0 : i32
    %c0_i32_0 = arith.constant 0 : i32
    %c0_i32_1 = arith.constant 0 : i32
    return %c0_i32, %c0_i32_0 : i32, i32
  }
  func.func @transform_2(%arg0: i32) -> (i32, i32) {
    %c0_i32 = arith.constant 0 : i32
    %c0_i32_0 = arith.constant 0 : i32
    %c0_i32_1 = arith.constant 0 : i32
    return %c0_i32, %c0_i32_0 : i32, i32
  }
  func.func @transform_3(%arg0: i32) -> (i32, i32) {
    %c0_i32 = arith.constant 0 : i32
    %c0_i32_0 = arith.constant 0 : i32
    %c0_i32_1 = arith.constant 0 : i32
    return %c0_i32, %c0_i32_0 : i32, i32
  }
  func.func @transform_4(%arg0: i32) -> (i32, i32) {
    %c0_i32 = arith.constant 0 : i32
    %c0_i32_0 = arith.constant 0 : i32
    %c0_i32_1 = arith.constant 0 : i32
    return %c0_i32, %c0_i32_0 : i32, i32
  }
  func.func @transform_5(%arg0: i32) -> (i32, i32) {
    %c0_i32 = arith.constant 0 : i32
    %c0_i32_0 = arith.constant 0 : i32
    %c0_i32_1 = arith.constant 0 : i32
    return %c0_i32, %c0_i32_0 : i32, i32
  }
  func.func @transform_6(%arg0: i32) -> (i32, i32) {
    %c0_i32 = arith.constant 0 : i32
    %c0_i32_0 = arith.constant 0 : i32
    %c0_i32_1 = arith.constant 0 : i32
    return %c0_i32, %c0_i32_0 : i32, i32
  }
  func.func @transform_7(%arg0: i32) -> (i32, i32) {
    %c0_i32 = arith.constant 0 : i32
    %c0_i32_0 = arith.constant 0 : i32
    %c0_i32_1 = arith.constant 0 : i32
    return %c0_i32, %c0_i32_0 : i32, i32
  }
  func.func @transform_8(%arg0: i32) -> (i32, i32) {
    %c0_i32 = arith.constant 0 : i32
    %c0_i32_0 = arith.constant 0 : i32
    %c0_i32_1 = arith.constant 0 : i32
    return %c0_i32, %c0_i32_0 : i32, i32
  }
}

</mosaic_0001>

<bundles_post_ra>
// kernel: cnn_lstm_forward.3
= control target key start
LH: loop header
LB: loop body
LE: loop exit
PB: predicated region body
PF: predicated region fallthrough
CT: control target
= control target key end

     0   :  { %13 = vsyncpa [#allocation8], 0  ;;  %s2515_s27 = smov 0   ;;  %s3092_s0 = inlined_call_operand.vmem [shape: f32[8,2,512], index: 0, kind: input, shape index: {}]   ;;  %s3093_s1 = inlined_call_operand.vmem [shape: bf16[128,512], index: 1, kind: input, shape index: {}]   ;;  %s3094_s2 = inlined_call_operand.vmem [shape: bf16[256,512], index: 2, kind: input, shape index: {}]   ;;  %s3095_s3 = inlined_call_operand.vmem [shape: f32[1,512], index: 3, kind: input, shape index: {}]   ;;  %s3096_s4 = inlined_call_operand.vmem [shape: bf16[256,512], index: 4, kind: input, shape index: {}]   ;;  %s3097_s5 = inlined_call_operand.vmem [shape: f32[1,512], index: 5, kind: input, shape index: {}]   ;;  %s3098_s6 = inlined_call_operand.vmem [shape: bf16[128,128], index: 6, kind: input, shape index: {}]   ;;  %s3099_s7 = inlined_call_operand.vmem [shape: f32[1,128], index: 7, kind: input, shape index: {}]   ;;  %s3100_s8 = inlined_call_operand.hbm [shape: f32[2,128], index: 8, kind: output, shape index: {}]  }
   0x1 LB: > { %s2521_s28 = sadd.s32 4294967295, %s2460_s27   ;;  %p1887_p0 = scmp.ge.s32.totalorder %s2460_s27, 1  ;;  %s2460_s27 = sphi %s2515_s27, %s19_s27  }
   0x2   : > { %p258_p1 = scmp.lt.s32.totalorder %s2460_s27, 9 }
   0x4   : > { %p259_p2 = pnand %p1887_p0, %p258_p1 }
   0x5   : > { %p287_p3 = scmp.lt.s32.totalorder (!%p259_p2), %s2521_s28, 7  ;;  %p1890_p4 = scmp.ne.s32.totalorder (!%p259_p2), %s2521_s28, 0 }
   0x6   : > { %262 = sbr.rel (%p259_p2) target bundleno = 1109 (0x455), region = 52 }
   0xd   : > { %s288_s29 = scalar_select %p287_p3, %s2521_s28, 7 }
   0xe   : > { %296 = sbr.rel (%p1890_p4) target bundleno = 21 (0x15), region = 56  ;;  %v2462_v0 = vmov (!%p1890_p4), 0   ;;  %v2463_v1 = vmov (!%p1890_p4), 0.0  }
   0xf   : > { %s2076_s30 = sshll.u32 %s288_s29, 3  ;;  %297 = vst [vmem:[#allocation2] sm:$0x3] (!%p1890_p4), %v2462_v0  ;;  %298 = vst [vmem:[#allocation3] sm:$0x3] (!%p1890_p4), %v2462_v0 }
  0x10   : > { %s2530_s11 = scalar_lea.vmem %s3092_s0, %s2076_s30  ;;  %299 = vst [vmem:[#allocation4] sm:$0x3] (!%p1890_p4), %v2463_v1  ;;  %300 = vst [vmem:[#allocation5] sm:$0x3] (!%p1890_p4), %v2463_v1 }
  0x11   : > { %301 = vst [vmem:[#allocation6] sm:$0x3] (!%p1890_p4), %v2463_v1  ;;  %302 = vst [vmem:[#allocation7] sm:$0x3] (!%p1890_p4), %v2463_v1 }
  0x15 PF: > { %v2128_v2 = vld [vmem:[%s3093_s1 + $0x4] ss:$16 sps:$4 sm:$0xff]   ;;  %v2130_v3 = vld [vmem:[%s3093_s1 + $0xc] ss:$16 sps:$4 sm:$0xff]   ;;  %v2464_v4 = vmov 0   ;;  %p2062_p5 = scmp.ne.s32.totalorder %s2521_s28, 7 }
  0x16   : > { %529 = vmatprep.mubr.bf16.mxu0 %v2464_v4  ;;  %570 = vmatprep.mubr.bf16.mxu1 %v2464_v4  ;;  %v2132_v5 = vld [vmem:[%s3093_s1] ss:$16 sps:$4 sm:$0xff]   ;;  %v2133_v6 = vld [vmem:[%s3093_s1 + $0x8] ss:$16 sps:$4 sm:$0xff]   ;;  %v2134_v7 = vld [vmem:[%s3093_s1 + $0x24] ss:$16 sps:$4 sm:$0xff]  }
  0x17   : > { %497 = vmatprep.subr.bf16.mxu0 %v2128_v2  ;;  %538 = vmatprep.subr.bf16.mxu1 %v2130_v3  ;;  %v2136_v8 = vld [vmem:[%s3093_s1 + $0x2c] ss:$16 sps:$4 sm:$0xff]   ;;  %v2138_v9 = vld [vmem:[%s3093_s1 + $0x20] ss:$16 sps:$4 sm:$0xff]   ;;  %v2139_v10 = vld [vmem:[%s3093_s1 + $0x28] ss:$16 sps:$4 sm:$0xff]  }
  0x18   : > { %498 = vmatpush1.bf16.msra.mxu0 %v2132_v5  ;;  %539 = vmatpush1.bf16.msra.mxu1 %v2133_v6  ;;  %v2140_v11 = vld [vmem:[%s3093_s1 + $0x44] ss:$16 sps:$4 sm:$0xff]   ;;  %v2142_v12 = vld [vmem:[%s3093_s1 + $0x4c] ss:$16 sps:$4 sm:$0xff]   ;;  %v2144_v13 = vld [vmem:[%s3093_s1 + $0x40] ss:$16 sps:$4 sm:$0xff]  }
  0x19   : > { %499 = vmatprep.subr.bf16.mxu0 %v2134_v7  ;;  %540 = vmatprep.subr.bf16.mxu1 %v2136_v8  ;;  %v2145_v14 = vld [vmem:[%s3093_s1 + $0x48] ss:$16 sps:$4 sm:$0xff]   ;;  %v2146_v15 = vld [vmem:[%s3093_s1 + $0x64] ss:$16 sps:$4 sm:$0xff]   ;;  %v2148_v16 = vld [vmem:[%s3093_s1 + $0x6c] ss:$16 sps:$4 sm:$0xff]  }
  0x1a   : > { %v2150_v17 = vld [vmem:[%s3093_s1 + $0x60] ss:$16 sps:$4 sm:$0xff]   ;;  %v2151_v18 = vld [vmem:[%s3093_s1 + $0x68] ss:$16 sps:$4 sm:$0xff]   ;;  %v2152_v19 = vld [vmem:[%s3093_s1 + $0x84] ss:$16 sps:$4 sm:$0xff]  }
  0x1b   : > { %v2154_v20 = vld [vmem:[%s3093_s1 + $0x8c] ss:$16 sps:$4 sm:$0xff]   ;;  %v2156_v21 = vld [vmem:[%s3093_s1 + $0x80] ss:$16 sps:$4 sm:$0xff]   ;;  %v2157_v22 = vld [vmem:[%s3093_s1 + $0x88] ss:$16 sps:$4 sm:$0xff]  }
  0x1c   : > { %500 = vmatpush1.bf16.msra.mxu0 %v2138_v9  ;;  %541 = vmatpush1.bf16.msra.mxu1 %v2139_v10  ;;  %v2158_v23 = vld [vmem:[%s3093_s1 + $0xa4] ss:$16 sps:$4 sm:$0xff]   ;;  %v2160_v24 = vld [vmem:[%s3093_s1 + $0xac] ss:$16 sps:$4 sm:$0xff]   ;;  %v2162_v25 = vld [vmem:[%s3093_s1 + $0xa0] ss:$16 sps:$4 sm:$0xff]  }
  0x1d   : > { %501 = vmatprep.subr.bf16.mxu0 %v2140_v11  ;;  %542 = vmatprep.subr.bf16.mxu1 %v2142_v12  ;;  %v2163_v26 = vld [vmem:[%s3093_s1 + $0xa8] ss:$16 sps:$4 sm:$0xff]   ;;  %v2164_v27 = vld [vmem:[%s3093_s1 + $0xc4] ss:$16 sps:$4 sm:$0xff]   ;;  %v2166_v28 = vld [vmem:[%s3093_s1 + $0xcc] ss:$16 sps:$4 sm:$0xff]  }
  0x1e   : > { %v2168_v29 = vld [vmem:[%s3093_s1 + $0xc0] ss:$16 sps:$4 sm:$0xff]   ;;  %v2169_v30 = vld [vmem:[%s3093_s1 + $0xc8] ss:$16 sps:$4 sm:$0xff]   ;;  %v2170_v31 = vld [vmem:[%s3093_s1 + $0xe4] ss:$16 sps:$4 sm:$0xff]  }
  0x1f   : > { %v2172_v32 = vld [vmem:[%s3093_s1 + $0xec] ss:$16 sps:$4 sm:$0xff]   ;;  %v2174_v33 = vld [vmem:[%s3093_s1 + $0xe0] ss:$16 sps:$4 sm:$0xff]   ;;  %v2175_v34 = vld [vmem:[%s3093_s1 + $0xe8] ss:$16 sps:$4 sm:$0xff]  }
  0x20   : > { %502 = vmatpush1.bf16.msra.mxu0 %v2144_v13  ;;  %543 = vmatpush1.bf16.msra.mxu1 %v2145_v14  ;;  %v304_v35 = vld [vmem:[#allocation2] sm:$0x1]  ;;  %v2178_v36 = vld [vmem:[%s3094_s2 + $0x4] ss:$16 sps:$4 sm:$0xff]   ;;  %v2181_v37 = vld [vmem:[%s3094_s2 + $0xc] ss:$16 sps:$4 sm:$0xff]  }
  0x21   : > { %503 = vmatprep.subr.bf16.mxu0 %v2146_v15  ;;  %544 = vmatprep.subr.bf16.mxu1 %v2148_v16  ;;  %v2176_v38 = vld [vmem:[%s3094_s2] ss:$16 sps:$4 sm:$0xff]   ;;  %v2179_v39 = vld [vmem:[%s3094_s2 + $0x8] ss:$16 sps:$4 sm:$0xff]   ;;  %v2184_v40 = vld [vmem:[%s3094_s2 + $0x24] ss:$16 sps:$4 sm:$0xff]  }
  0x22   : > { %v2187_v41 = vld [vmem:[%s3094_s2 + $0x2c] ss:$16 sps:$4 sm:$0xff]   ;;  %v2182_v42 = vld [vmem:[%s3094_s2 + $0x20] ss:$16 sps:$4 sm:$0xff]   ;;  %v2185_v43 = vld [vmem:[%s3094_s2 + $0x28] ss:$16 sps:$4 sm:$0xff]  }
  0x23   : > { %v2190_v44 = vld [vmem:[%s3094_s2 + $0x44] ss:$16 sps:$4 sm:$0xff]   ;;  %v2193_v45 = vld [vmem:[%s3094_s2 + $0x4c] ss:$16 sps:$4 sm:$0xff]   ;;  %v2188_v46 = vld [vmem:[%s3094_s2 + $0x40] ss:$16 sps:$4 sm:$0xff]  }
  0x24   : > { %504 = vmatpush1.bf16.msra.mxu0 %v2150_v17  ;;  %545 = vmatpush1.bf16.msra.mxu1 %v2151_v18  ;;  %v2191_v47 = vld [vmem:[%s3094_s2 + $0x48] ss:$16 sps:$4 sm:$0xff]   ;;  %v2196_v48 = vld [vmem:[%s3094_s2 + $0x64] ss:$16 sps:$4 sm:$0xff]   ;;  %v2199_v49 = vld [vmem:[%s3094_s2 + $0x6c] ss:$16 sps:$4 sm:$0xff]  }
  0x25   : > { %505 = vmatprep.subr.bf16.mxu0 %v2152_v19  ;;  %546 = vmatprep.subr.bf16.mxu1 %v2154_v20  ;;  %v2194_v50 = vld [vmem:[%s3094_s2 + $0x60] ss:$16 sps:$4 sm:$0xff]   ;;  %v2197_v51 = vld [vmem:[%s3094_s2 + $0x68] ss:$16 sps:$4 sm:$0xff]   ;;  %v2202_v52 = vld [vmem:[%s3094_s2 + $0x84] ss:$16 sps:$4 sm:$0xff]  }
  0x26   : > { %v2205_v53 = vld [vmem:[%s3094_s2 + $0x8c] ss:$16 sps:$4 sm:$0xff]   ;;  %v2200_v54 = vld [vmem:[%s3094_s2 + $0x80] ss:$16 sps:$4 sm:$0xff]   ;;  %v2203_v55 = vld [vmem:[%s3094_s2 + $0x88] ss:$16 sps:$4 sm:$0xff]  }
  0x27   : > { %v2208_v56 = vld [vmem:[%s3094_s2 + $0xa4] ss:$16 sps:$4 sm:$0xff]   ;;  %v2211_v57 = vld [vmem:[%s3094_s2 + $0xac] ss:$16 sps:$4 sm:$0xff]   ;;  %v2206_v58 = vld [vmem:[%s3094_s2 + $0xa0] ss:$16 sps:$4 sm:$0xff]  }
  0x28   : > { %506 = vmatpush1.bf16.msra.mxu0 %v2156_v21  ;;  %547 = vmatpush1.bf16.msra.mxu1 %v2157_v22  ;;  %v2209_v59 = vld [vmem:[%s3094_s2 + $0xa8] ss:$16 sps:$4 sm:$0xff]   ;;  %v2214_v60 = vld [vmem:[%s3094_s2 + $0xc4] ss:$16 sps:$4 sm:$0xff]   ;;  %v2217_v61 = vld [vmem:[%s3094_s2 + $0xcc] ss:$16 sps:$4 sm:$0xff]  }
  0x29   : > { %507 = vmatprep.subr.bf16.mxu0 %v2158_v23  ;;  %548 = vmatprep.subr.bf16.mxu1 %v2160_v24  ;;  %v2212_v62 = vld [vmem:[%s3094_s2 + $0xc0] ss:$16 sps:$4 sm:$0xff]   ;;  %v2215_v63 = vld [vmem:[%s3094_s2 + $0xc8] ss:$16 sps:$4 sm:$0xff]   ;;  %v2220_v0 = vld [vmem:[%s3094_s2 + $0xe4] ss:$16 sps:$4 sm:$0xff]  }
  0x2a   : > { %v2223_v1 = vld [vmem:[%s3094_s2 + $0xec] ss:$16 sps:$4 sm:$0xff]   ;;  %v2218_v2 = vld [vmem:[%s3094_s2 + $0xe0] ss:$16 sps:$4 sm:$0xff]   ;;  %v2221_v3 = vld [vmem:[%s3094_s2 + $0xe8] ss:$16 sps:$4 sm:$0xff]  }
  0x2b   : > { %v2226_v4 = vld [vmem:[%s3094_s2 + $0x104] ss:$16 sps:$4 sm:$0xff]   ;;  %v2229_v5 = vld [vmem:[%s3094_s2 + $0x10c] ss:$16 sps:$4 sm:$0xff]   ;;  %v2224_v6 = vld [vmem:[%s3094_s2 + $0x100] ss:$16 sps:$4 sm:$0xff]  }
  0x2c   : > { %508 = vmatpush1.bf16.msra.mxu0 %v2162_v25  ;;  %549 = vmatpush1.bf16.msra.mxu1 %v2163_v26  ;;  %v2227_v7 = vld [vmem:[%s3094_s2 + $0x108] ss:$16 sps:$4 sm:$0xff]   ;;  %v2232_v8 = vld [vmem:[%s3094_s2 + $0x124] ss:$16 sps:$4 sm:$0xff]   ;;  %v2235_v9 = vld [vmem:[%s3094_s2 + $0x12c] ss:$16 sps:$4 sm:$0xff]  }
  0x2d   : > { %509 = vmatprep.subr.bf16.mxu0 %v2164_v27  ;;  %550 = vmatprep.subr.bf16.mxu1 %v2166_v28  ;;  %v2230_v10 = vld [vmem:[%s3094_s2 + $0x120] ss:$16 sps:$4 sm:$0xff]   ;;  %v2233_v11 = vld [vmem:[%s3094_s2 + $0x128] ss:$16 sps:$4 sm:$0xff]   ;;  %v2238_v12 = vld [vmem:[%s3094_s2 + $0x144] ss:$16 sps:$4 sm:$0xff]  }
  0x2e   : > { %v2241_v13 = vld [vmem:[%s3094_s2 + $0x14c] ss:$16 sps:$4 sm:$0xff]   ;;  %v2236_v14 = vld [vmem:[%s3094_s2 + $0x140] ss:$16 sps:$4 sm:$0xff]   ;;  %v2239_v15 = vld [vmem:[%s3094_s2 + $0x148] ss:$16 sps:$4 sm:$0xff]  }
  0x2f   : > { %v2244_v16 = vld [vmem:[%s3094_s2 + $0x164] ss:$16 sps:$4 sm:$0xff]   ;;  %v2247_v17 = vld [vmem:[%s3094_s2 + $0x16c] ss:$16 sps:$4 sm:$0xff]   ;;  %v2242_v18 = vld [vmem:[%s3094_s2 + $0x160] ss:$16 sps:$4 sm:$0xff]  }
  0x30   : > { %510 = vmatpush1.bf16.msra.mxu0 %v2168_v29  ;;  %551 = vmatpush1.bf16.msra.mxu1 %v2169_v30  ;;  %v2245_v19 = vld [vmem:[%s3094_s2 + $0x168] ss:$16 sps:$4 sm:$0xff]   ;;  %v2250_v20 = vld [vmem:[%s3094_s2 + $0x184] ss:$16 sps:$4 sm:$0xff]   ;;  %v2253_v21 = vld [vmem:[%s3094_s2 + $0x18c] ss:$16 sps:$4 sm:$0xff]  }
  0x31   : > { %511 = vmatprep.subr.bf16.mxu0 %v2170_v31  ;;  %552 = vmatprep.subr.bf16.mxu1 %v2172_v32  ;;  %v2248_v22 = vld [vmem:[%s3094_s2 + $0x180] ss:$16 sps:$4 sm:$0xff]   ;;  %v2251_v23 = vld [vmem:[%s3094_s2 + $0x188] ss:$16 sps:$4 sm:$0xff]   ;;  %v2256_v25 = vld [vmem:[%s3094_s2 + $0x1a4] ss:$16 sps:$4 sm:$0xff]  }
  0x32   : > { %v2254_v24 = vld [vmem:[%s3094_s2 + $0x1a0] ss:$16 sps:$4 sm:$0xff]   ;;  %v2257_v26 = vld [vmem:[%s3094_s2 + $0x1a8] ss:$16 sps:$4 sm:$0xff]   ;;  %v2259_v27 = vld [vmem:[%s3094_s2 + $0x1ac] ss:$16 sps:$4 sm:$0xff]  }
  0x33   : > { %v2262_v28 = vld [vmem:[%s3094_s2 + $0x1c4] ss:$16 sps:$4 sm:$0xff]   ;;  %v2265_v29 = vld [vmem:[%s3094_s2 + $0x1cc] ss:$16 sps:$4 sm:$0xff]   ;;  %v2260_v30 = vld [vmem:[%s3094_s2 + $0x1c0] ss:$16 sps:$4 sm:$0xff]  }
  0x34   : > { %512 = vmatpush1.bf16.msra.mxu0 %v2174_v33  ;;  %553 = vmatpush1.bf16.msra.mxu1 %v2175_v34  ;;  %v2263_v31 = vld [vmem:[%s3094_s2 + $0x1c8] ss:$16 sps:$4 sm:$0xff]   ;;  %v2268_v32 = vld [vmem:[%s3094_s2 + $0x1e4] ss:$16 sps:$4 sm:$0xff]   ;;  %v2271_v33 = vld [vmem:[%s3094_s2 + $0x1ec] ss:$16 sps:$4 sm:$0xff]  }
  0x35   : > { %1069 = vmatprep.subr.bf16.mxu0 %v2178_v36  ;;  %1110 = vmatprep.subr.bf16.mxu1 %v2181_v37  ;;  %v2266_v34 = vld [vmem:[%s3094_s2 + $0x1e0] ss:$16 sps:$4 sm:$0xff]   ;;  %v2274_v36 = vld [vmem:[%s3096_s4 + $0x4] ss:$16 sps:$4 sm:$0xff]   ;;  %v2277_v37 = vld [vmem:[%s3096_s4 + $0xc] ss:$16 sps:$4 sm:$0xff]  }
  0x36   : > { %vm2468_vm0 = vmmov (!%p2062_p5), 0  }
  0x37   : > { %530 = vmatmul.mubr.bf16.vlgmr.msra.gmra.mrb[0].mxu0 %v304_v35  ;;  %571 = vmatmul.mubr.bf16.vlgmr.msra.gmra.mrb[0].mxu1 %v304_v35  ;;  %v2269_v35 = vld [vmem:[%s3094_s2 + $0x1e8] ss:$16 sps:$4 sm:$0xff]  }
  0x38   : > { %1070 = vmatpush1.bf16.msra.mxu0 %v2176_v38  ;;  %1111 = vmatpush1.bf16.msra.mxu1 %v2179_v39  ;;  %v2465_v38 = vmov 1983009808  }
  0x39   : > { %1071 = vmatprep.subr.bf16.mxu0 %v2184_v40  ;;  %1112 = vmatprep.subr.bf16.mxu1 %v2187_v41  ;;  %v586_v39 = vunpack.c.l.s4 %v2465_v38  ;;  %v588_v40 = vlaneseq  ;;  %v2290_v38 = vld [vmem:[%s3096_s4 + $0x60] ss:$16 sps:$4 sm:$0xff]  }
  0x3b   : > { %v587_v41 = vunpack.c.0.s8 %v586_v39  ;;  %v2293_v39 = vld [vmem:[%s3096_s4 + $0x68] ss:$16 sps:$4 sm:$0xff]  }
  0x3c   : > { %1072 = vmatpush1.bf16.msra.mxu0 %v2182_v42  ;;  %1113 = vmatpush1.bf16.msra.mxu1 %v2185_v43  ;;  %v2827_v42 = vshrl.u32 %v588_v40, 7  ;;  %v2298_v40 = vld [vmem:[%s3096_s4 + $0x84] ss:$16 sps:$4 sm:$0xff]  }
  0x3d   : > { %1073 = vmatprep.subr.bf16.mxu0 %v2190_v44  ;;  %1114 = vmatprep.subr.bf16.mxu1 %v2193_v45 }
  0x3e   : > { %v590_v45 = vsub.s32 %v587_v41, %v2827_v42  ;;  %v2301_v41 = vld [vmem:[%s3096_s4 + $0x8c] ss:$16 sps:$4 sm:$0xff]  }
  0x40   : > { %1074 = vmatpush1.bf16.msra.mxu0 %v2188_v46  ;;  %1115 = vmatpush1.bf16.msra.mxu1 %v2191_v47 }
  0x41   : > { %1075 = vmatprep.subr.bf16.mxu0 %v2196_v48  ;;  %1116 = vmatprep.subr.bf16.mxu1 %v2199_v49 }
  0x44   : > { %1076 = vmatpush1.bf16.msra.mxu0 %v2194_v50  ;;  %1117 = vmatpush1.bf16.msra.mxu1 %v2197_v51 }
  0x45   : > { %1077 = vmatprep.subr.bf16.mxu0 %v2202_v52  ;;  %1118 = vmatprep.subr.bf16.mxu1 %v2205_v53 }
  0x48   : > { %1078 = vmatpush1.bf16.msra.mxu0 %v2200_v54  ;;  %1119 = vmatpush1.bf16.msra.mxu1 %v2203_v55 }
  0x49   : > { %1079 = vmatprep.subr.bf16.mxu0 %v2208_v56  ;;  %1120 = vmatprep.subr.bf16.mxu1 %v2211_v57  ;;  %v303_v56 = vld [vmem:[%s2530_s11] sm:$0xff] }
  0x4c   : > { %1080 = vmatpush1.bf16.msra.mxu0 %v2206_v58  ;;  %1121 = vmatpush1.bf16.msra.mxu1 %v2209_v59 }
  0x4d   : > { %1081 = vmatprep.subr.bf16.mxu0 %v2214_v60  ;;  %1122 = vmatprep.subr.bf16.mxu1 %v2217_v61 }
  0x50   : > { %1082 = vmatpush1.bf16.msra.mxu0 %v2212_v62  ;;  %1123 = vmatpush1.bf16.msra.mxu1 %v2215_v63 }
  0x51   : > { %1083 = vmatprep.subr.bf16.mxu0 %v2220_v0  ;;  %1124 = vmatprep.subr.bf16.mxu1 %v2223_v1 }
  0x54   : > { %1084 = vmatpush1.bf16.msra.mxu0 %v2218_v2  ;;  %1125 = vmatpush1.bf16.msra.mxu1 %v2221_v3 }
  0x55   : > { %1085 = vmatprep.subr.bf16.mxu0 %v2226_v4  ;;  %1126 = vmatprep.subr.bf16.mxu1 %v2229_v5 }
  0x58   : > { %1086 = vmatpush1.bf16.msra.mxu0 %v2224_v6  ;;  %1127 = vmatpush1.bf16.msra.mxu1 %v2227_v7  ;;  %v602_v7 = vld [vmem:[#allocation4] sm:$0x3] }
  0x59   : > { %1087 = vmatprep.subr.bf16.mxu0 %v2232_v8  ;;  %1128 = vmatprep.subr.bf16.mxu1 %v2235_v9 }
  0x5c   : > { %1088 = vmatpush1.bf16.msra.mxu0 %v2230_v10  ;;  %1129 = vmatpush1.bf16.msra.mxu1 %v2233_v11 }
  0x5d   : > { %1089 = vmatprep.subr.bf16.mxu0 %v2238_v12  ;;  %1130 = vmatprep.subr.bf16.mxu1 %v2241_v13 }
  0x60   : > { %1090 = vmatpush1.bf16.msra.mxu0 %v2236_v14  ;;  %1131 = vmatpush1.bf16.msra.mxu1 %v2239_v15 }
  0x61   : > { %1091 = vmatprep.subr.bf16.mxu0 %v2244_v16  ;;  %1132 = vmatprep.subr.bf16.mxu1 %v2247_v17 }
  0x64   : > { %1092 = vmatpush1.bf16.msra.mxu0 %v2242_v18  ;;  %1133 = vmatpush1.bf16.msra.mxu1 %v2245_v19  ;;  %v2466_v18 = vmov 1966171168  }
  0x65   : > { %1093 = vmatprep.subr.bf16.mxu0 %v2250_v20  ;;  %1134 = vmatprep.subr.bf16.mxu1 %v2253_v21  ;;  %v734_v19 = vunpack.c.l.s4 %v2466_v18  ;;  %v2361_v18 = vld [vmem:[%s3096_s4 + $0x1cc] ss:$16 sps:$4 sm:$0xff]  }
  0x67   : > { %v735_v20 = vunpack.c.0.s8 %v734_v19  ;;  %v2356_v19 = vld [vmem:[%s3096_s4 + $0x1c0] ss:$16 sps:$4 sm:$0xff]  }
  0x68   : > { %1094 = vmatpush1.bf16.msra.mxu0 %v2248_v22  ;;  %1135 = vmatpush1.bf16.msra.mxu1 %v2251_v23 }
  0x69   : > { %1095 = vmatprep.subr.bf16.mxu0 %v2256_v25  ;;  %1136 = vmatprep.subr.bf16.mxu1 %v2259_v27  ;;  %v2832_v22 = vsub.s32 %v735_v20, %v2827_v42  ;;  %v2272_v25 = vld [vmem:[%s3096_s4] ss:$16 sps:$4 sm:$0xff]   ;;  %v2359_v20 = vld [vmem:[%s3096_s4 + $0x1c8] ss:$16 sps:$4 sm:$0xff]  }
  0x6c   : > { %1096 = vmatpush1.bf16.msra.mxu0 %v2254_v24  ;;  %1137 = vmatpush1.bf16.msra.mxu1 %v2257_v26  ;;  %v2275_v26 = vld [vmem:[%s3096_s4 + $0x8] ss:$16 sps:$4 sm:$0xff]  }
  0x6d   : > { %1097 = vmatprep.subr.bf16.mxu0 %v2262_v28  ;;  %1138 = vmatprep.subr.bf16.mxu1 %v2265_v29  ;;  %v2280_v28 = vld [vmem:[%s3096_s4 + $0x24] ss:$16 sps:$4 sm:$0xff]   ;;  %v2283_v29 = vld [vmem:[%s3096_s4 + $0x2c] ss:$16 sps:$4 sm:$0xff]  }
  0x70   : > { %1098 = vmatpush1.bf16.msra.mxu0 %v2260_v30  ;;  %1139 = vmatpush1.bf16.msra.mxu1 %v2263_v31  ;;  %v2278_v30 = vld [vmem:[%s3096_s4 + $0x20] ss:$16 sps:$4 sm:$0xff]   ;;  %v2281_v31 = vld [vmem:[%s3096_s4 + $0x28] ss:$16 sps:$4 sm:$0xff]  }
  0x71   : > { %1099 = vmatprep.subr.bf16.mxu0 %v2268_v32  ;;  %1140 = vmatprep.subr.bf16.mxu1 %v2271_v33  ;;  %v2286_v32 = vld [vmem:[%s3096_s4 + $0x44] ss:$16 sps:$4 sm:$0xff]   ;;  %v2289_v33 = vld [vmem:[%s3096_s4 + $0x4c] ss:$16 sps:$4 sm:$0xff]  }
  0x74   : > { %1100 = vmatpush1.bf16.msra.mxu0 %v2266_v34  ;;  %1141 = vmatpush1.bf16.msra.mxu1 %v2269_v35  ;;  %v2284_v34 = vld [vmem:[%s3096_s4 + $0x40] ss:$16 sps:$4 sm:$0xff]   ;;  %v2287_v35 = vld [vmem:[%s3096_s4 + $0x48] ss:$16 sps:$4 sm:$0xff]  }
  0x75   : > { %1612 = vmatprep.subr.bf16.mxu0 %v2274_v36  ;;  %1653 = vmatprep.subr.bf16.mxu1 %v2277_v37  ;;  %v2292_v36 = vld [vmem:[%s3096_s4 + $0x64] ss:$16 sps:$4 sm:$0xff]   ;;  %v2295_v37 = vld [vmem:[%s3096_s4 + $0x6c] ss:$16 sps:$4 sm:$0xff]  }
 0x10a   : > { %v531_v43 = vpop.f32.mrb[0].mxu0  ;;  %v572_v44 = vpop.f32.mrb[0].mxu1 }
 0x10b   : > { %v533_v46 = vpop.f32.mrb[1].mxu0  ;;  %v574_v47 = vpop.f32.mrb[1].mxu1 }
 0x10c   : > { %v583_v48 = vcombine.low %v531_v43, %v533_v46  ;;  %v584_v49 = vcombine.low %v572_v44, %v574_v47  ;;  %v535_v50 = vpop.f32.mrb[2].mxu0  ;;  %v576_v51 = vpop.f32.mrb[2].mxu1  ;;  %v2296_v43 = vld [vmem:[%s3096_s4 + $0x80] ss:$16 sps:$4 sm:$0xff]   ;;  %v2299_v44 = vld [vmem:[%s3096_s4 + $0x88] ss:$16 sps:$4 sm:$0xff]  }
 0x10d   : > { %v536_v52 = vpop.f32.mrb[3].mxu0  ;;  %v577_v53 = vpop.f32.mrb[3].mxu1  ;;  %v2307_v46 = vld [vmem:[%s3096_s4 + $0xac] ss:$16 sps:$4 sm:$0xff]   ;;  %v2302_v47 = vld [vmem:[%s3096_s4 + $0xa0] ss:$16 sps:$4 sm:$0xff]  }
 0x10e   : > { %v591_v54 = vrot.slane %v583_v48, %v590_v45  ;;  %v598_v55 = vrot.slane %v584_v49, %v590_v45  ;;  %v2304_v45 = vld [vmem:[%s3096_s4 + $0xa4] ss:$16 sps:$4 sm:$0xff]   ;;  %v2305_v48 = vld [vmem:[%s3096_s4 + $0xa8] ss:$16 sps:$4 sm:$0xff]   ;;  %v2313_v50 = vld [vmem:[%s3096_s4 + $0xcc] ss:$16 sps:$4 sm:$0xff]  }
 0x10f   : > { %v2310_v49 = vld [vmem:[%s3096_s4 + $0xc4] ss:$16 sps:$4 sm:$0xff]   ;;  %v2308_v51 = vld [vmem:[%s3096_s4 + $0xc0] ss:$16 sps:$4 sm:$0xff]   ;;  %v2311_v52 = vld [vmem:[%s3096_s4 + $0xc8] ss:$16 sps:$4 sm:$0xff]  }
 0x110   : > { %v599_v57 = vcombine.low %v591_v54, %v598_v55  ;;  %v2316_v53 = vld [vmem:[%s3096_s4 + $0xe4] ss:$16 sps:$4 sm:$0xff]   ;;  %v2319_v54 = vld [vmem:[%s3096_s4 + $0xec] ss:$16 sps:$4 sm:$0xff]   ;;  %v2314_v55 = vld [vmem:[%s3096_s4 + $0xe0] ss:$16 sps:$4 sm:$0xff]  }
 0x112   : > { %v601_v58 = vadd.f32 %v599_v57, %v303_v56  ;;  %v2317_v56 = vld [vmem:[%s3096_s4 + $0xe8] ss:$16 sps:$4 sm:$0xff]   ;;  %v2322_v57 = vld [vmem:[%s3096_s4 + $0x104] ss:$16 sps:$4 sm:$0xff]  }
 0x114   : > { %v1923_v59 = vmul.f32 -1.442695, %v601_v58  ;;  %v610_v60 = vrot.slane %v601_v58, 2  ;;  %v621_v62 = vrot.slane %v601_v58, 6  ;;  %v618_v1 = vrot.slane %v601_v58, 4 }
 0x115   : > { %v2325_v58 = vld [vmem:[%s3096_s4 + $0x10c] ss:$16 sps:$4 sm:$0xff]  }
 0x116   : > { %2368 = vpow2.f32 %v1923_v59  ;;  %v1924_v61 = vmul.f32 -1.442695, %v610_v60  ;;  %v1925_v63 = vmul.f32 -1.442695, %v621_v62  ;;  %v2320_v59 = vld [vmem:[%s3096_s4 + $0x100] ss:$16 sps:$4 sm:$0xff]  }
 0x117   : > { %v2323_v60 = vld [vmem:[%s3096_s4 + $0x108] ss:$16 sps:$4 sm:$0xff]   ;;  %v2331_v62 = vld [vmem:[%s3096_s4 + $0x12c] ss:$16 sps:$4 sm:$0xff]  }
 0x118   : > { %2370 = vpow2.f32 %v1924_v61  ;;  %v2328_v61 = vld [vmem:[%s3096_s4 + $0x124] ss:$16 sps:$4 sm:$0xff]  }
 0x119   : > { %2372 = vpow2.f32 %v1925_v63  ;;  %v2326_v63 = vld [vmem:[%s3096_s4 + $0x120] ss:$16 sps:$4 sm:$0xff]  }
 0x120   : > { %v2369_v0 = vpop.eup %2368 }
 0x121   : > { %v606_v2 = vadd.f32 1.0, %v2369_v0  ;;  %v2329_v0 = vld [vmem:[%s3096_s4 + $0x128] ss:$16 sps:$4 sm:$0xff]  }
 0x122   : > { %v2371_v3 = vpop.eup %2370 }
 0x123   : > { %2374 = vrcp.f32 %v606_v2  ;;  %v615_v4 = vadd.f32 1.0, %v2371_v3  ;;  %v2373_v5 = vpop.eup %2372  ;;  %v2337_v2 = vld [vmem:[%s3096_s4 + $0x14c] ss:$16 sps:$4 sm:$0xff]   ;;  %v2332_v3 = vld [vmem:[%s3096_s4 + $0x140] ss:$16 sps:$4 sm:$0xff]  }
 0x124   : > { %2376 = vtanh.f32 %v618_v1  ;;  %v626_v10 = vadd.f32 1.0, %v2373_v5  ;;  %v2334_v1 = vld [vmem:[%s3096_s4 + $0x144] ss:$16 sps:$4 sm:$0xff]  }
 0x125   : > { %2378 = vrcp.f32 %v615_v4  ;;  %v2335_v4 = vld [vmem:[%s3096_s4 + $0x148] ss:$16 sps:$4 sm:$0xff]   ;;  %v2340_v5 = vld [vmem:[%s3096_s4 + $0x164] ss:$16 sps:$4 sm:$0xff]  }
 0x126   : > { %2380 = vrcp.f32 %v626_v10  ;;  %v2349_v10 = vld [vmem:[%s3096_s4 + $0x18c] ss:$16 sps:$4 sm:$0xff]  }
 0x12d   : > { %v2375_v6 = vpop.eup %2374 }
 0x12e   : > { %v2377_v8 = vpop.eup %2376 }
 0x12f   : > { %v2379_v9 = vpop.eup %2378  ;;  %v630_v12 = vmul.f32 %v2377_v8, %v2375_v6  ;;  %v2343_v6 = vld [vmem:[%s3096_s4 + $0x16c] ss:$16 sps:$4 sm:$0xff]   ;;  %v2341_v8 = vld [vmem:[%s3096_s4 + $0x168] ss:$16 sps:$4 sm:$0xff]  }
 0x130   : > { %v629_v11 = vmul.f32 %v2379_v9, %v602_v7  ;;  %v2381_v14 = vpop.eup %2380  ;;  %v2338_v7 = vld [vmem:[%s3096_s4 + $0x160] ss:$16 sps:$4 sm:$0xff]   ;;  %v2346_v9 = vld [vmem:[%s3096_s4 + $0x184] ss:$16 sps:$4 sm:$0xff]  }
 0x132   : > { %v631_v13 = vadd.f32 %v630_v12, %v629_v11  ;;  %v2344_v11 = vld [vmem:[%s3096_s4 + $0x180] ss:$16 sps:$4 sm:$0xff]   ;;  %v2347_v12 = vld [vmem:[%s3096_s4 + $0x188] ss:$16 sps:$4 sm:$0xff]  }
 0x134   : > { %2382 = vtanh.f32 %v631_v13  ;;  %634 = vst [vmem:[#allocation4] sm:$0x3] %v631_v13  ;;  %v2350_v13 = vld [vmem:[%s3096_s4 + $0x1a0] ss:$16 sps:$4 sm:$0xff]  }
 0x13e   : > { %v2383_v15 = vpop.eup %2382 }
 0x13f   : > { %v633_v16 = vmul.f32 %v2383_v15, %v2381_v14  ;;  %v2352_v14 = vld [vmem:[%s3096_s4 + $0x1a4] ss:$16 sps:$4 sm:$0xff]   ;;  %v2353_v15 = vld [vmem:[%s3096_s4 + $0x1a8] ss:$16 sps:$4 sm:$0xff]  }
 0x141   : > { %v635_v17 = vpack.c.bf16 %v633_v16, %v633_v16  ;;  %v2355_v16 = vld [vmem:[%s3096_s4 + $0x1ac] ss:$16 sps:$4 sm:$0xff]  }
 0x143   : > { %636 = vst [vmem:[#allocation2] sm:$0x1] %v635_v17  ;;  %v2358_v17 = vld [vmem:[%s3096_s4 + $0x1c4] ss:$16 sps:$4 sm:$0xff]  }
 0x14a   : > { %v1926_v21 = vld.sshfl [vmem:[#allocation2] sm:$0x11 pattern:$0x75316420] }
 0x14b   : > { %v732_v23 = vcombine.high %v1926_v21, %v1926_v21  ;;  %v739_v27 = vrot.slane %v1926_v21, %v2832_v22  ;;  %v2364_v21 = vld [vmem:[%s3096_s4 + $0x1e4] ss:$16 sps:$4 sm:$0xff]  }
 0x14d   : > { %v746_v24 = vrot.slane %v732_v23, %v2832_v22  ;;  %v2367_v23 = vld [vmem:[%s3096_s4 + $0x1ec] ss:$16 sps:$4 sm:$0xff]  }
 0x14f   : > { %1101 = vmatprep.mubr.bf16.mxu0 %v746_v24  ;;  %1142 = vmatprep.mubr.bf16.mxu1 %v746_v24  ;;  %v2362_v24 = vld [vmem:[%s3096_s4 + $0x1e0] ss:$16 sps:$4 sm:$0xff]  }
 0x150   : > { %1102 = vmatmul.mubr.bf16.vlgmr.msra.gmra.mrb[4].mxu0 %v739_v27  ;;  %1143 = vmatmul.mubr.bf16.vlgmr.msra.gmra.mrb[4].mxu1 %v739_v27  ;;  %v702_v27 = vld [vmem:[%s3095_s3] sm:$0xf] }
 0x151   : > { %1613 = vmatpush1.bf16.msra.mxu0 %v2272_v25  ;;  %1654 = vmatpush1.bf16.msra.mxu1 %v2275_v26  ;;  %v2365_v25 = vld [vmem:[%s3096_s4 + $0x1e8] ss:$16 sps:$4 sm:$0xff]   ;;  %v706_v26 = vsub.s32 0, %v2827_v42 }
 0x152   : > { %1614 = vmatprep.subr.bf16.mxu0 %v2280_v28  ;;  %1655 = vmatprep.subr.bf16.mxu1 %v2283_v29  ;;  %v710_v28 = vsub.s32 1, %v2827_v42 }
 0x153   : > { %v707_v29 = vrot.slane %v702_v27, %v706_v26 }
 0x155   : > { %1615 = vmatpush1.bf16.msra.mxu0 %v2278_v30  ;;  %1656 = vmatpush1.bf16.msra.mxu1 %v2281_v31  ;;  %v711_v30 = vrot.slane %v702_v27, %v710_v28 }
 0x156   : > { %1616 = vmatprep.subr.bf16.mxu0 %v2286_v32  ;;  %1657 = vmatprep.subr.bf16.mxu1 %v2289_v33  ;;  %v718_v33 = vsub.s32 3, %v2827_v42 }
 0x159   : > { %1617 = vmatpush1.bf16.msra.mxu0 %v2284_v34  ;;  %1658 = vmatpush1.bf16.msra.mxu1 %v2287_v35 }
 0x15a   : > { %1618 = vmatprep.subr.bf16.mxu0 %v2292_v36  ;;  %1659 = vmatprep.subr.bf16.mxu1 %v2295_v37 }
 0x15d   : > { %1619 = vmatpush1.bf16.msra.mxu0 %v2290_v38  ;;  %1660 = vmatpush1.bf16.msra.mxu1 %v2293_v39 }
 0x15e   : > { %1620 = vmatprep.subr.bf16.mxu0 %v2298_v40  ;;  %1661 = vmatprep.subr.bf16.mxu1 %v2301_v41 }
 0x161   : > { %1621 = vmatpush1.bf16.msra.mxu0 %v2296_v43  ;;  %1662 = vmatpush1.bf16.msra.mxu1 %v2299_v44 }
 0x162   : > { %1622 = vmatprep.subr.bf16.mxu0 %v2304_v45  ;;  %1663 = vmatprep.subr.bf16.mxu1 %v2307_v46  ;;  %v719_v45 = vrot.slane %v702_v27, %v718_v33  ;;  %v714_v46 = vsub.s32 2, %v2827_v42 }
 0x165   : > { %1623 = vmatpush1.bf16.msra.mxu0 %v2302_v47  ;;  %1664 = vmatpush1.bf16.msra.mxu1 %v2305_v48  ;;  %v715_v48 = vrot.slane %v702_v27, %v714_v46 }
 0x166   : > { %1624 = vmatprep.subr.bf16.mxu0 %v2310_v49  ;;  %1665 = vmatprep.subr.bf16.mxu1 %v2313_v50 }
 0x169   : > { %1625 = vmatpush1.bf16.msra.mxu0 %v2308_v51  ;;  %1666 = vmatpush1.bf16.msra.mxu1 %v2311_v52 }
 0x16a   : > { %1626 = vmatprep.subr.bf16.mxu0 %v2316_v53  ;;  %1667 = vmatprep.subr.bf16.mxu1 %v2319_v54 }
 0x16d   : > { %1627 = vmatpush1.bf16.msra.mxu0 %v2314_v55  ;;  %1668 = vmatpush1.bf16.msra.mxu1 %v2317_v56 }
 0x16e   : > { %1628 = vmatprep.subr.bf16.mxu0 %v2322_v57  ;;  %1669 = vmatprep.subr.bf16.mxu1 %v2325_v58  ;;  %v1151_v57 = vld [vmem:[#allocation5] sm:$0x3] }
 0x171   : > { %1629 = vmatpush1.bf16.msra.mxu0 %v2320_v59  ;;  %1670 = vmatpush1.bf16.msra.mxu1 %v2323_v60 }
 0x172   : > { %1630 = vmatprep.subr.bf16.mxu0 %v2328_v61  ;;  %1671 = vmatprep.subr.bf16.mxu1 %v2331_v62 }
 0x175   : > { %1631 = vmatpush1.bf16.msra.mxu0 %v2326_v63  ;;  %1672 = vmatpush1.bf16.msra.mxu1 %v2329_v0 }
 0x176   : > { %1632 = vmatprep.subr.bf16.mxu0 %v2334_v1  ;;  %1673 = vmatprep.subr.bf16.mxu1 %v2337_v2 }
 0x179   : > { %1633 = vmatpush1.bf16.msra.mxu0 %v2332_v3  ;;  %1674 = vmatpush1.bf16.msra.mxu1 %v2335_v4 }
 0x17a   : > { %1634 = vmatprep.subr.bf16.mxu0 %v2340_v5  ;;  %1675 = vmatprep.subr.bf16.mxu1 %v2343_v6 }
 0x17d   : > { %1635 = vmatpush1.bf16.msra.mxu0 %v2338_v7  ;;  %1676 = vmatpush1.bf16.msra.mxu1 %v2341_v8  ;;  %v1245_v8 = vld [vmem:[%s3097_s5] sm:$0xf] }
 0x17e   : > { %1636 = vmatprep.subr.bf16.mxu0 %v2346_v9  ;;  %1677 = vmatprep.subr.bf16.mxu1 %v2349_v10  ;;  %v1250_v9 = vrot.slane %v1245_v8, %v706_v26  ;;  %v1254_v10 = vrot.slane %v1245_v8, %v710_v28 }
 0x181   : > { %1637 = vmatpush1.bf16.msra.mxu0 %v2344_v11  ;;  %1678 = vmatpush1.bf16.msra.mxu1 %v2347_v12 }
 0x182   : > { %1638 = vmatprep.subr.bf16.mxu0 %v2352_v14  ;;  %1679 = vmatprep.subr.bf16.mxu1 %v2355_v16 }
 0x185   : > { %1639 = vmatpush1.bf16.msra.mxu0 %v2350_v13  ;;  %1680 = vmatpush1.bf16.msra.mxu1 %v2353_v15 }
 0x186   : > { %1640 = vmatprep.subr.bf16.mxu0 %v2358_v17  ;;  %1681 = vmatprep.subr.bf16.mxu1 %v2361_v18 }
 0x189   : > { %1641 = vmatpush1.bf16.msra.mxu0 %v2356_v19  ;;  %1682 = vmatpush1.bf16.msra.mxu1 %v2359_v20 }
 0x18a   : > { %1642 = vmatprep.subr.bf16.mxu0 %v2364_v21  ;;  %1683 = vmatprep.subr.bf16.mxu1 %v2367_v23  ;;  %v1262_v23 = vrot.slane %v1245_v8, %v718_v33 }
 0x18d   : > { %1643 = vmatpush1.bf16.msra.mxu0 %v2362_v24  ;;  %1684 = vmatpush1.bf16.msra.mxu1 %v2365_v25  ;;  %v1258_v25 = vrot.slane %v1245_v8, %v714_v46  ;;  %v2467_v46 = vmov (!%p2062_p5), 0.0  }
 0x18e   : > { %2086 = vmatprep.subr.bf16.mxu0 (!%p2062_p5), %v2467_v46 }
 0x223   : > { %v1103_v31 = vpop.f32.mrb[4].mxu0  ;;  %v1144_v32 = vpop.f32.mrb[4].mxu1 }
 0x224   : > { %v1104_v34 = vadd.f32 %v1103_v31, %v707_v29  ;;  %v1105_v35 = vpop.f32.mrb[5].mxu0  ;;  %v1146_v36 = vpop.f32.mrb[5].mxu1  ;;  %v1145_v50 = vadd.f32 %v1144_v32, %v715_v48  ;;  %v2418_v48 = vld [vmem:[%s3098_s6 + $0x10] sm:$0xff] (!%p2062_p5)  }
 0x225   : > { %v1106_v37 = vadd.f32 %v1105_v35, %v711_v30  ;;  %v1107_v38 = vpop.f32.mrb[6].mxu0  ;;  %v1148_v39 = vpop.f32.mrb[6].mxu1  ;;  %v1147_v47 = vadd.f32 %v1146_v36, %v719_v45  ;;  %v1694_v35 = vld [vmem:[#allocation6] sm:$0x3]  ;;  %v2416_v45 = vld [vmem:[%s3098_s6] sm:$0xff] (!%p2062_p5)  }
 0x226   : > { %v1991_v40 = vmul.f32 -1.442695, %v1104_v34  ;;  %v1108_v41 = vpop.f32.mrb[7].mxu0  ;;  %v1149_v43 = vpop.f32.mrb[7].mxu1 }
 0x227   : > { %v1992_v44 = vmul.f32 -1.442695, %v1106_v37  ;;  %v1993_v49 = vmul.f32 -1.442695, %v1147_v47  ;;  %v2417_v47 = vld [vmem:[%s3098_s6 + $0x8] sm:$0xff] (!%p2062_p5)  }
 0x228   : > { %2384 = vpow2.f32 %v1991_v40 }
 0x229   : > { %2386 = vpow2.f32 %v1992_v44 }
 0x22a   : > { %2388 = vpow2.f32 %v1993_v49  ;;  %v2419_v49 = vld [vmem:[%s3098_s6 + $0x18] sm:$0xff] (!%p2062_p5)  }
 0x22b   : > { %2390 = vtanh.f32 %v1145_v50  ;;  %v2420_v50 = vld [vmem:[%s3098_s6 + $0x20] sm:$0xff] (!%p2062_p5)  }
 0x232   : > { %v2385_v51 = vpop.eup %2384 }
 0x233   : > { %v2387_v52 = vpop.eup %2386  ;;  %v1155_v53 = vadd.f32 1.0, %v2385_v51  ;;  %v2421_v51 = vld [vmem:[%s3098_s6 + $0x28] sm:$0xff] (!%p2062_p5)  }
 0x234   : > { %v1161_v54 = vadd.f32 1.0, %v2387_v52  ;;  %v2389_v55 = vpop.eup %2388  ;;  %v2422_v52 = vld [vmem:[%s3098_s6 + $0x30] sm:$0xff] (!%p2062_p5)  }
 0x235   : > { %2392 = vrcp.f32 %v1155_v53  ;;  %v2391_v56 = vpop.eup %2390  ;;  %v1168_v61 = vadd.f32 1.0, %v2389_v55  ;;  %v2423_v53 = vld [vmem:[%s3098_s6 + $0x38] sm:$0xff] (!%p2062_p5)  }
 0x236   : > { %2394 = vrcp.f32 %v1161_v54  ;;  %v2063_v54 = vld [vmem:[%s3099_s7] ss:$0 sm:$0xff] (!%p2062_p5) }
 0x237   : > { %2396 = vrcp.f32 %v1168_v61 }
 0x23f   : > { %v2393_v58 = vpop.eup %2392 }
 0x240   : > { %v2395_v59 = vpop.eup %2394  ;;  %v1172_v60 = vmul.f32 %v2393_v58, %v2391_v56 }
 0x241   : > { %v1171_v62 = vmul.f32 %v2395_v59, %v1151_v57  ;;  %v2397_v0 = vpop.eup %2396 }
 0x243   : > { %v1173_v63 = vadd.f32 %v1172_v60, %v1171_v62 }
 0x245   : > { %2398 = vtanh.f32 %v1173_v63  ;;  %1176 = vst [vmem:[#allocation5] sm:$0x3] %v1173_v63 }
 0x24f   : > { %v2399_v1 = vpop.eup %2398 }
 0x250   : > { %v1175_v2 = vmul.f32 %v2399_v1, %v2397_v0 }
 0x252   : > { %v1177_v3 = vpack.c.bf16 %v1175_v2, %v1175_v2 }
 0x254   : > { %1178 = vst [vmem:[#allocation2 + $0x1] sm:$0x1] %v1177_v3  ;;  %1179 = vst [vmem:[#allocation3] sm:$0x1] %v1177_v3 }
 0x25b   : > { %v1994_v4 = vld.sshfl [vmem:[#allocation3] sm:$0x11 pattern:$0x75316420] }
 0x25c   : > { %v1275_v5 = vcombine.high %v1994_v4, %v1994_v4  ;;  %v1282_v7 = vrot.slane %v1994_v4, %v2832_v22 }
 0x25e   : > { %v1289_v6 = vrot.slane %v1275_v5, %v2832_v22 }
 0x260   : > { %1644 = vmatprep.mubr.bf16.mxu0 %v1289_v6  ;;  %1685 = vmatprep.mubr.bf16.mxu1 %v1289_v6 }
 0x261   : > { %1645 = vmatmul.mubr.bf16.vlgmr.msra.gmra.mrb[8].mxu0 %v1282_v7  ;;  %1686 = vmatmul.mubr.bf16.vlgmr.msra.gmra.mrb[8].mxu1 %v1282_v7 }
 0x262   : > { %2087 = vmatpush3.bf16.msra.mxu0 (!%p2062_p5), %v2416_v45  ;;  %2102 = vmatprep.mubr.msk.bf16.mxu0 (!%p2062_p5), %vm2468_vm0, %v2467_v46 }
 0x263   : > { %2088 = vmatprep.subr.bf16.mxu0 (!%p2062_p5), %v2467_v46 }
 0x266   : > { %2089 = vmatpush3.bf16.msra.mxu0 (!%p2062_p5), %v2417_v47 }
 0x267   : > { %2090 = vmatprep.subr.bf16.mxu0 (!%p2062_p5), %v2467_v46 }
 0x26a   : > { %2091 = vmatpush3.bf16.msra.mxu0 (!%p2062_p5), %v2418_v48 }
 0x26b   : > { %2092 = vmatprep.subr.bf16.mxu0 (!%p2062_p5), %v2467_v46 }
 0x26e   : > { %2093 = vmatpush3.bf16.msra.mxu0 (!%p2062_p5), %v2419_v49 }
 0x26f   : > { %2094 = vmatprep.subr.bf16.mxu0 (!%p2062_p5), %v2467_v46 }
 0x272   : > { %2095 = vmatpush3.bf16.msra.mxu0 (!%p2062_p5), %v2420_v50 }
 0x273   : > { %2096 = vmatprep.subr.bf16.mxu0 (!%p2062_p5), %v2467_v46 }
 0x276   : > { %2097 = vmatpush3.bf16.msra.mxu0 (!%p2062_p5), %v2421_v51 }
 0x277   : > { %2098 = vmatprep.subr.bf16.mxu0 (!%p2062_p5), %v2467_v46 }
 0x27a   : > { %2099 = vmatpush3.bf16.msra.mxu0 (!%p2062_p5), %v2422_v52 }
 0x27b   : > { %2100 = vmatprep.subr.bf16.mxu0 (!%p2062_p5), %v2467_v46 }
 0x27e   : > { %2101 = vmatpush3.bf16.msra.mxu0 (!%p2062_p5), %v2423_v53 }
 0x334   : > { %v1646_v11 = vpop.f32.mrb[8].mxu0  ;;  %v1687_v12 = vpop.f32.mrb[8].mxu1 }
 0x335   : > { %v1647_v13 = vadd.f32 %v1646_v11, %v1250_v9  ;;  %v1648_v14 = vpop.f32.mrb[9].mxu0  ;;  %v1689_v15 = vpop.f32.mrb[9].mxu1  ;;  %v1688_v27 = vadd.f32 %v1687_v12, %v1258_v25 }
 0x336   : > { %v1649_v16 = vadd.f32 %v1648_v14, %v1254_v10  ;;  %v1650_v17 = vpop.f32.mrb[10].mxu0  ;;  %v1691_v18 = vpop.f32.mrb[10].mxu1  ;;  %v1690_v24 = vadd.f32 %v1689_v15, %v1262_v23 }
 0x337   : > { %v2059_v19 = vmul.f32 -1.442695, %v1647_v13  ;;  %v1651_v22 = vpop.f32.mrb[11].mxu0  ;;  %v1692_v20 = vpop.f32.mrb[11].mxu1 }
 0x338   : > { %v2060_v21 = vmul.f32 -1.442695, %v1649_v16  ;;  %v2061_v26 = vmul.f32 -1.442695, %v1690_v24 }
 0x339   : > { %2400 = vpow2.f32 %v2059_v19 }
 0x33a   : > { %2402 = vpow2.f32 %v2060_v21 }
 0x33b   : > { %2404 = vpow2.f32 %v2061_v26 }
 0x33c   : > { %2406 = vtanh.f32 %v1688_v27 }
 0x343   : > { %v2401_v28 = vpop.eup %2400 }
 0x344   : > { %v2403_v29 = vpop.eup %2402  ;;  %v1698_v30 = vadd.f32 1.0, %v2401_v28 }
 0x345   : > { %v1704_v31 = vadd.f32 1.0, %v2403_v29  ;;  %v2405_v32 = vpop.eup %2404 }
 0x346   : > { %2408 = vrcp.f32 %v1698_v30  ;;  %v2407_v34 = vpop.eup %2406  ;;  %v1711_v37 = vadd.f32 1.0, %v2405_v32 }
 0x347   : > { %2410 = vrcp.f32 %v1704_v31 }
 0x348   : > { %2412 = vrcp.f32 %v1711_v37 }
 0x350   : > { %v2409_v36 = vpop.eup %2408 }
 0x351   : > { %v2411_v42 = vpop.eup %2410  ;;  %v1715_v33 = vmul.f32 %v2409_v36, %v2407_v34 }
 0x352   : > { %v1714_v38 = vmul.f32 %v2411_v42, %v1694_v35  ;;  %v2413_v40 = vpop.eup %2412 }
 0x354   : > { %v1716_v39 = vadd.f32 %v1715_v33, %v1714_v38 }
 0x356   : > { %2414 = vtanh.f32 %v1716_v39  ;;  %1719 = vst [vmem:[#allocation6] sm:$0x3] %v1716_v39 }
 0x35f   : > { %1725 = sbr.rel (%p2062_p5) target bundleno = 1084 (0x43c), region = 60 }
 0x360   : > { %v2415_v41 = vpop.eup %2414 }
 0x361   : > { %v1718_v43 = vmul.f32 %v2415_v41, %v2413_v40 }
 0x363   : > { %v1720_v44 = vpack.c.bf16 %v1718_v43, %v1718_v43 }
 0x365   : > { %1721 = vst [vmem:[#allocation3 + $0x1] sm:$0x1] %v1720_v44  ;;  %2103 = vmatmul.mubr.bf16.vlgmr.msra.gmra.mrb[0].mxu0 (!%p2062_p5), %v1720_v44 }
 0x438   : > { %v1831_v55 = vpop.f32.mrb[0].mxu0 }
 0x439   : > { %v1832_v56 = vadd.f32 %v2063_v54, %v1831_v55  ;;  %v2104_v57 = vpop.f32.mrb[1].mxu0 }
 0x43a   : > { %v1834_v58 = vpop.f32.mrb[2].mxu0 }
 0x43b   : > { %1837 = vst [vmem:[#allocation7] sm:$0x3] %v1832_v56  ;;  %v2105_v59 = vpop.f32.mrb[3].mxu0 }
 0x43c PF: > { %p2110_p6 = scmp.eq.s32.totalorder %s2521_s28, 7  ;;  %s2469_s23 = smov [#allocation7]  }
 0x43d   : > { %s1845_s24 = sshll.u32 %s2469_s23, 4  ;;  %s1846_s24 = int_to_ptr.vmem [resolvable:$true] %s1845_s24 }
 0x43e   : > { %s2424_s25 = scalar_lea.vmem %s1846_s24, 32  ;;  %p2431_p10 = scmp.lt.s32.totalorder %s1846_s24, %s1846_s24 }
 0x43f   : > { %p2425_p7 = scmp.ne.s32.totalorder %s1846_s24, %s2424_s25  ;;  %p2432_p11 = scmp.lt.s32.totalorder %s2424_s25, %s2424_s25 }
 0x441   : > { %p2426_p8 = pnand %p2425_p7, %p2110_p6  ;;  %p2433_p12 = por %p2432_p11, %p2431_p10 }
 0x443   : > { %p2427_p9 = pneg %p2426_p8 }
 0x445   : > { %p2434_p13 = pnand %p2433_p12, %p2427_p9 }
 0x447   : > { %2437 = shalt.err (!%p2434_p13)
}
 0x448   : > { %s2438_s30 = scalar_lea.hbm %s3100_s8, 32 }
 0x449   : > { %p2439_p0 = scmp.ne.s32.totalorder %s3100_s8, %s2438_s30  ;;  %p2444_p3 = scmp.lt.u32.totalorder %s2438_s30, %s3100_s8 }
 0x44b   : > { %p2440_p1 = pnand %p2439_p0, %p2110_p6 }
 0x44d   : > { %p2441_p2 = pneg %p2440_p1 }
 0x44f   : > { %p2446_p4 = pnand %p2444_p3, %p2441_p2 }
 0x451   : > { %2449 = shalt.err (!%p2446_p4)
}
 0x452   : > { %2107 = dma.vmem_to_hbm [thread:$0]  (%p2110_p6), %s1846_s24, 32, %s3100_s8, [#allocation8]  }
 0x453   : > { %2455 = dma.done.wait (%p2110_p6), [#allocation8], 32  }
 0x454   : > { %2457 = vsyncadd (%p2110_p6), [#allocation8], 4294967264 }
 0x455 PF: > { %s19_s27 = sadd.s32 1, %s2460_s27  }
 0x456   : > { %p16_p5 = scmp.ge.s32.totalorder %s19_s27, 10  }
 0x458   :  { %18 = sbr.rel (!%p16_p5) target bundleno = 1 (0x1), region = 87 }
 0x45f   :  { %1858 = vsyncpa [#allocation8], 1 }
 0x460   :  { %1860 = vsyncpa [#allocation8 + $0x1], 1 }

// kernel: cnn_lstm_forward.2
= control target key start
LH: loop header
LB: loop body
LE: loop exit
PB: predicated region body
PF: predicated region fallthrough
CT: control target
= control target key end

     0   :  { %s4695_s24 = smov 0   ;;  %s5450_s0 = inlined_call_operand.vmem [shape: bf16[4096,32], index: 0, kind: input, shape index: {}]   ;;  %s5451_s1 = inlined_call_operand.vmem [shape: bf16[32,128], index: 1, kind: input, shape index: {}]   ;;  %s5452_s2 = inlined_call_operand.vmem [shape: f32[1,128], index: 2, kind: input, shape index: {}]   ;;  %s5453_s3 = inlined_call_operand.vmem [shape: bf16[128,128], index: 3, kind: input, shape index: {}]   ;;  %s5454_s4 = inlined_call_operand.vmem [shape: f32[1,128], index: 4, kind: input, shape index: {}]   ;;  %s5455_s5 = inlined_call_operand.vmem [shape: bf16[128,512], index: 5, kind: input, shape index: {}]   ;;  %s5456_s6 = inlined_call_operand.vmem [shape: f32[1,512], index: 6, kind: input, shape index: {}]   ;;  %s5457_s7 = inlined_call_operand.vmem [shape: f32[16,512], index: 7, kind: output, shape index: {}]  }
   0x1 LB: > { %s4701_s25 = sadd.s32 4294967295, %s4650_s24   ;;  %p3714_p0 = scmp.ge.s32.totalorder %s4650_s24, 1  ;;  %s4650_s24 = sphi %s4695_s24, %s17_s24  }
   0x2   : > { %p238_p1 = scmp.lt.s32.totalorder %s4650_s24, 3 }
   0x4   : > { %p239_p2 = pnand %p3714_p0, %p238_p1 }
   0x5   : > { %v4456_v0 = vld [vmem:[%s5451_s1] sm:$0xff] (!%p239_p2)   ;;  %s3715_s28 = sshll.u32 (!%p239_p2), %s4701_s25, 8  ;;  %v4457_v1 = vld [vmem:[%s5451_s1 + $0x8] sm:$0xff] (!%p239_p2)   ;;  %vm1201_vm0 = vcmask (!%p239_p2), 261120   ;;  %vm3250_vm1 = vcmask (!%p239_p2), 1041409   ;;  %vm4653_vm2 = vmmov (!%p239_p2), 0  }
   0x6   : > { %242 = sbr.rel (%p239_p2) target bundleno = 1043 (0x413), region = 48  ;;  %p271_p3 = scmp.lt.s32.totalorder (!%p239_p2), %s3715_s28, 511  ;;  %4161 = vmatprep.subr.bf16.mxu0 (!%p239_p2), %v4456_v0  ;;  %4441 = vmatprep.subr.bf16.mxu1 (!%p239_p2), %v4456_v0  ;;  %vm3252_vm3 = vcmask (!%p239_p2), 1042434   ;;  %vm3254_vm4 = vcmask (!%p239_p2), 1043459   ;;  %vm3256_vm5 = vcmask (!%p239_p2), 1044484   ;;  %vm3258_vm6 = vcmask (!%p239_p2), 1045509  }
   0x7   : > { %4162 = vmatpush3.bf16.msra.mxu0 (!%p239_p2), %v4456_v0  ;;  %4443 = vmatpush3.bf16.msra.mxu1 (!%p239_p2), %v4456_v0  ;;  %vm3260_vm7 = vcmask (!%p239_p2), 1046534   ;;  %vm3262_vm8 = vcmask (!%p239_p2), 1047559   ;;  %p276_p4 = scmp.lt.s32.totalorder (!%p239_p2), %s4701_s25, 1 }
   0x8   : > { %4163 = vmatprep.subr.bf16.mxu0 (!%p239_p2), %v4457_v1  ;;  %4442 = vmatprep.subr.bf16.mxu1 (!%p239_p2), %v4457_v1 }
   0xb   : > { %4164 = vmatpush3.bf16.msra.mxu0 (!%p239_p2), %v4457_v1  ;;  %4444 = vmatpush3.bf16.msra.mxu1 (!%p239_p2), %v4457_v1 }
   0xd   : > { %s5459_s28 = smov (!%p271_p3, %s3715_s28), 511  ;;  %s5461_s25 = smov (!%p276_p4, %s4701_s25), 1 }
   0xe   : > { %s3716_s8 = sshll.u32 %s5459_s28, 2  ;;  %s4021_s18 = sshll.u32 %s5461_s25, 5 }
   0xf   : > { %s4715_s11 = scalar_lea.vmem %s5450_s0, %s3716_s8  ;;  %s280_s21 = scalar_lea.vmem %s5457_s7, %s4021_s18 }
  0x10   : > { %v4458_v2 = vld [vmem:[%s4715_s11] sm:$0xff]   ;;  %v4459_v3 = vld [vmem:[%s4715_s11 + $0x8] sm:$0xff]   ;;  %v4460_v4 = vld [vmem:[%s4715_s11 + $0x10] sm:$0xff]  }
  0x11   : > { %4165 = vmatprep.mubr.msk.bf16.mxu0 %vm1201_vm0, %v4458_v2  ;;  %v4461_v5 = vld [vmem:[%s4715_s11 + $0x18] sm:$0xff]   ;;  %v4462_v6 = vld [vmem:[%s4715_s11 + $0x20] sm:$0xff]   ;;  %v4463_v7 = vld [vmem:[%s4715_s11 + $0x28] sm:$0xff]  }
  0x12   : > { %4166 = vmatmul.mubr.msk.bf16.vlgmr.msra.gmra.mrb[0].mxu0 %vm1201_vm0, %v4459_v3  ;;  %v4464_v8 = vld [vmem:[%s4715_s11 + $0x30] sm:$0xff]   ;;  %v4465_v9 = vld [vmem:[%s4715_s11 + $0x38] sm:$0xff]   ;;  %v4466_v10 = vld [vmem:[%s4715_s11 + $0x40] sm:$0xff]  }
  0x13   : > { %4169 = vmatprep.mubr.msk.bf16.mxu0 %vm1201_vm0, %v4460_v4  ;;  %v4482_v11 = vld [vmem:[%s4715_s11 + $0x250] sm:$0xff]   ;;  %v4483_v12 = vld [vmem:[%s4715_s11 + $0x258] sm:$0xff]   ;;  %v4486_v13 = vld [vmem:[%s4715_s11 + $0x260] sm:$0xff]  }
  0x14   : > { %4313 = vmatprep.mubr.msk.bf16.mxu1 %vm1201_vm0, %v4482_v11  ;;  %v4467_v14 = vld [vmem:[%s4715_s11 + $0x48] sm:$0xff]   ;;  %v4468_v15 = vld [vmem:[%s4715_s11 + $0x50] sm:$0xff]   ;;  %v4469_v18 = vld [vmem:[%s4715_s11 + $0x58] sm:$0xff]  }
  0x15   : > { %4314 = vmatmul.mubr.msk.bf16.vlgmr.msra.gmra.mrb[0].mxu1 %vm1201_vm0, %v4483_v12  ;;  %v4487_v16 = vld [vmem:[%s4715_s11 + $0x268] sm:$0xff]   ;;  %v4490_v17 = vld [vmem:[%s4715_s11 + $0x270] sm:$0xff]   ;;  %v4470_v19 = vld [vmem:[%s4715_s11 + $0x60] sm:$0xff]  }
  0x16   : > { %4317 = vmatprep.mubr.msk.bf16.mxu1 %vm1201_vm0, %v4486_v13  ;;  %v4491_v20 = vld [vmem:[%s4715_s11 + $0x278] sm:$0xff]   ;;  %v4494_v21 = vld [vmem:[%s4715_s11 + $0x280] sm:$0xff]   ;;  %v4471_v22 = vld [vmem:[%s4715_s11 + $0x68] sm:$0xff]  }
  0x17   : > { %v4472_v23 = vld [vmem:[%s4715_s11 + $0x70] sm:$0xff]   ;;  %v4495_v24 = vld [vmem:[%s4715_s11 + $0x288] sm:$0xff]   ;;  %v4473_v26 = vld [vmem:[%s4715_s11 + $0x78] sm:$0xff]  }
  0x18   : > { %v4498_v25 = vld [vmem:[%s4715_s11 + $0x290] sm:$0xff]   ;;  %v4474_v27 = vld [vmem:[%s4715_s11 + $0x80] sm:$0xff]   ;;  %v4499_v28 = vld [vmem:[%s4715_s11 + $0x298] sm:$0xff]  }
  0x19   : > { %v4502_v29 = vld [vmem:[%s4715_s11 + $0x2a0] sm:$0xff]   ;;  %v4475_v30 = vld [vmem:[%s4715_s11 + $0x88] sm:$0xff]   ;;  %v4476_v31 = vld [vmem:[%s4715_s11 + $0x90] sm:$0xff]  }
  0x1a   : > { %4170 = vmatmul.mubr.msk.bf16.gmra.mrb[4].mxu0 %vm1201_vm0, %v4461_v5  ;;  %v4503_v32 = vld [vmem:[%s4715_s11 + $0x2a8] sm:$0xff]   ;;  %v4506_v33 = vld [vmem:[%s4715_s11 + $0x2b0] sm:$0xff]   ;;  %v4477_v34 = vld [vmem:[%s4715_s11 + $0x98] sm:$0xff]  }
  0x1b   : > { %4173 = vmatprep.mubr.msk.bf16.mxu0 %vm1201_vm0, %v4462_v6  ;;  %v4478_v35 = vld [vmem:[%s4715_s11 + $0xa0] sm:$0xff]   ;;  %v4507_v36 = vld [vmem:[%s4715_s11 + $0x2b8] sm:$0xff]   ;;  %v4479_v38 = vld [vmem:[%s4715_s11 + $0xa8] sm:$0xff]  }
  0x1c   : > { %v4510_v37 = vld [vmem:[%s4715_s11 + $0x2c0] sm:$0xff]   ;;  %v4480_v39 = vld [vmem:[%s4715_s11 + $0xb0] sm:$0xff]   ;;  %v4511_v40 = vld [vmem:[%s4715_s11 + $0x2c8] sm:$0xff]  }
  0x1d   : > { %4318 = vmatmul.mubr.msk.bf16.gmra.mrb[4].mxu1 %vm1201_vm0, %v4487_v16  ;;  %v4514_v41 = vld [vmem:[%s4715_s11 + $0x2d0] sm:$0xff]   ;;  %v4481_v42 = vld [vmem:[%s4715_s11 + $0xb8] sm:$0xff]   ;;  %v4484_v43 = vld [vmem:[%s4715_s11 + $0xc0] sm:$0xff]  }
  0x1e   : > { %4321 = vmatprep.mubr.msk.bf16.mxu1 %vm1201_vm0, %v4490_v17  ;;  %v4515_v44 = vld [vmem:[%s4715_s11 + $0x2d8] sm:$0xff]   ;;  %v4518_v45 = vld [vmem:[%s4715_s11 + $0x2e0] sm:$0xff]   ;;  %v4485_v46 = vld [vmem:[%s4715_s11 + $0xc8] sm:$0xff]  }
  0x1f   : > { %v4488_v47 = vld [vmem:[%s4715_s11 + $0xd0] sm:$0xff]   ;;  %v4519_v48 = vld [vmem:[%s4715_s11 + $0x2e8] sm:$0xff]   ;;  %v4489_v50 = vld [vmem:[%s4715_s11 + $0xd8] sm:$0xff]  }
  0x20   : > { %v4522_v49 = vld [vmem:[%s4715_s11 + $0x2f0] sm:$0xff]   ;;  %v4492_v51 = vld [vmem:[%s4715_s11 + $0xe0] sm:$0xff]   ;;  %v4523_v52 = vld [vmem:[%s4715_s11 + $0x2f8] sm:$0xff]  }
  0x21   : > { %v4526_v53 = vld [vmem:[%s4715_s11 + $0x300] sm:$0xff]   ;;  %v4493_v54 = vld [vmem:[%s4715_s11 + $0xe8] sm:$0xff]   ;;  %v4496_v55 = vld [vmem:[%s4715_s11 + $0xf0] sm:$0xff]  }
  0x22   : > { %4174 = vmatmul.mubr.msk.bf16.gmra.mrb[8].mxu0 %vm1201_vm0, %v4463_v7  ;;  %v4527_v56 = vld [vmem:[%s4715_s11 + $0x308] sm:$0xff]   ;;  %v4530_v57 = vld [vmem:[%s4715_s11 + $0x310] sm:$0xff]   ;;  %v4497_v58 = vld [vmem:[%s4715_s11 + $0xf8] sm:$0xff]  }
  0x23   : > { %4177 = vmatprep.mubr.msk.bf16.mxu0 %vm1201_vm0, %v4464_v8  ;;  %v4500_v59 = vld [vmem:[%s4715_s11 + $0x100] sm:$0xff]   ;;  %v4531_v60 = vld [vmem:[%s4715_s11 + $0x318] sm:$0xff]   ;;  %v4501_v62 = vld [vmem:[%s4715_s11 + $0x108] sm:$0xff]  }
  0x24   : > { %v4534_v61 = vld [vmem:[%s4715_s11 + $0x320] sm:$0xff]   ;;  %v4504_v63 = vld [vmem:[%s4715_s11 + $0x110] sm:$0xff]   ;;  %v4535_v0 = vld [vmem:[%s4715_s11 + $0x328] sm:$0xff]  }
  0x25   : > { %4322 = vmatmul.mubr.msk.bf16.gmra.mrb[8].mxu1 %vm1201_vm0, %v4491_v20  ;;  %v4538_v1 = vld [vmem:[%s4715_s11 + $0x330] sm:$0xff]   ;;  %v4505_v2 = vld [vmem:[%s4715_s11 + $0x118] sm:$0xff]   ;;  %v4508_v4 = vld [vmem:[%s4715_s11 + $0x120] sm:$0xff]  }
  0x26   : > { %4325 = vmatprep.mubr.msk.bf16.mxu1 %vm1201_vm0, %v4494_v21  ;;  %v4539_v3 = vld [vmem:[%s4715_s11 + $0x338] sm:$0xff]   ;;  %v4542_v5 = vld [vmem:[%s4715_s11 + $0x340] sm:$0xff]   ;;  %v4509_v6 = vld [vmem:[%s4715_s11 + $0x128] sm:$0xff]  }
  0x27   : > { %v4543_v7 = vld [vmem:[%s4715_s11 + $0x348] sm:$0xff]   ;;  %v4512_v8 = vld [vmem:[%s4715_s11 + $0x130] sm:$0xff]   ;;  %v4547_v11 = vld [vmem:[%s4715_s11 + $0x358] sm:$0xff]  }
  0x28   : > { %v4516_v12 = vld [vmem:[%s4715_s11 + $0x140] sm:$0xff]   ;;  %v4520_v16 = vld [vmem:[%s4715_s11 + $0x150] sm:$0xff]  }
  0x29   : > { %v4550_v13 = vld [vmem:[%s4715_s11 + $0x360] sm:$0xff]   ;;  %v4554_v17 = vld [vmem:[%s4715_s11 + $0x370] sm:$0xff]  }
  0x2a   : > { %4178 = vmatmul.mubr.msk.bf16.gmra.mrb[12].mxu0 %vm1201_vm0, %v4465_v9  ;;  %v4546_v9 = vld [vmem:[%s4715_s11 + $0x350] sm:$0xff]   ;;  %v4524_v20 = vld [vmem:[%s4715_s11 + $0x160] sm:$0xff]  }
  0x2b   : > { %4181 = vmatprep.mubr.msk.bf16.mxu0 %vm1201_vm0, %v4466_v10  ;;  %v4513_v10 = vld [vmem:[%s4715_s11 + $0x138] sm:$0xff]   ;;  %v4558_v21 = vld [vmem:[%s4715_s11 + $0x380] sm:$0xff]  }
  0x2d   : > { %4326 = vmatmul.mubr.msk.bf16.gmra.mrb[12].mxu1 %vm1201_vm0, %v4495_v24  ;;  %v4528_v24 = vld [vmem:[%s4715_s11 + $0x170] sm:$0xff]  }
  0x2e   : > { %4329 = vmatprep.mubr.msk.bf16.mxu1 %vm1201_vm0, %v4498_v25  ;;  %v4562_v25 = vld [vmem:[%s4715_s11 + $0x390] sm:$0xff]  }
  0x32   : > { %4182 = vmatmul.mubr.msk.bf16.gmra.mrb[16].mxu0 %vm1201_vm0, %v4467_v14  ;;  %v4517_v14 = vld [vmem:[%s4715_s11 + $0x148] sm:$0xff]  }
  0x33   : > { %4185 = vmatprep.mubr.msk.bf16.mxu0 %vm1201_vm0, %v4468_v15  ;;  %v4551_v15 = vld [vmem:[%s4715_s11 + $0x368] sm:$0xff]  }
  0x35   : > { %4330 = vmatmul.mubr.msk.bf16.gmra.mrb[16].mxu1 %vm1201_vm0, %v4499_v28  ;;  %v4532_v28 = vld [vmem:[%s4715_s11 + $0x180] sm:$0xff]  }
  0x36   : > { %4333 = vmatprep.mubr.msk.bf16.mxu1 %vm1201_vm0, %v4502_v29  ;;  %v4566_v29 = vld [vmem:[%s4715_s11 + $0x3a0] sm:$0xff]  }
  0x3a   : > { %4186 = vmatmul.mubr.msk.bf16.gmra.mrb[20].mxu0 %vm1201_vm0, %v4469_v18  ;;  %v4521_v18 = vld [vmem:[%s4715_s11 + $0x158] sm:$0xff]  }
  0x3b   : > { %4189 = vmatprep.mubr.msk.bf16.mxu0 %vm1201_vm0, %v4470_v19  ;;  %v4555_v19 = vld [vmem:[%s4715_s11 + $0x378] sm:$0xff]  }
  0x3d   : > { %4334 = vmatmul.mubr.msk.bf16.gmra.mrb[20].mxu1 %vm1201_vm0, %v4503_v32  ;;  %v4536_v32 = vld [vmem:[%s4715_s11 + $0x190] sm:$0xff]  }
  0x3e   : > { %4337 = vmatprep.mubr.msk.bf16.mxu1 %vm1201_vm0, %v4506_v33  ;;  %v4570_v33 = vld [vmem:[%s4715_s11 + $0x3b0] sm:$0xff]  }
  0x42   : > { %4190 = vmatmul.mubr.msk.bf16.gmra.mrb[24].mxu0 %vm1201_vm0, %v4471_v22  ;;  %v4525_v22 = vld [vmem:[%s4715_s11 + $0x168] sm:$0xff]  }
  0x43   : > { %4193 = vmatprep.mubr.msk.bf16.mxu0 %vm1201_vm0, %v4472_v23  ;;  %v4559_v23 = vld [vmem:[%s4715_s11 + $0x388] sm:$0xff]  }
  0x45   : > { %4338 = vmatmul.mubr.msk.bf16.gmra.mrb[24].mxu1 %vm1201_vm0, %v4507_v36  ;;  %v4540_v36 = vld [vmem:[%s4715_s11 + $0x1a0] sm:$0xff]  }
  0x46   : > { %4341 = vmatprep.mubr.msk.bf16.mxu1 %vm1201_vm0, %v4510_v37  ;;  %v4574_v37 = vld [vmem:[%s4715_s11 + $0x3c0] sm:$0xff]  }
  0x4a   : > { %4194 = vmatmul.mubr.msk.bf16.gmra.mrb[28].mxu0 %vm1201_vm0, %v4473_v26  ;;  %v4529_v26 = vld [vmem:[%s4715_s11 + $0x178] sm:$0xff]  }
  0x4b   : > { %4197 = vmatprep.mubr.msk.bf16.mxu0 %vm1201_vm0, %v4474_v27  ;;  %v4563_v27 = vld [vmem:[%s4715_s11 + $0x398] sm:$0xff]  }
  0x4d   : > { %4342 = vmatmul.mubr.msk.bf16.gmra.mrb[28].mxu1 %vm1201_vm0, %v4511_v40  ;;  %v4544_v40 = vld [vmem:[%s4715_s11 + $0x1b0] sm:$0xff]  }
  0x4e   : > { %4345 = vmatprep.mubr.msk.bf16.mxu1 %vm1201_vm0, %v4514_v41  ;;  %v4578_v41 = vld [vmem:[%s4715_s11 + $0x3d0] sm:$0xff]  }
  0x52   : > { %4198 = vmatmul.mubr.msk.bf16.gmra.mrb[32].mxu0 %vm1201_vm0, %v4475_v30  ;;  %v4533_v30 = vld [vmem:[%s4715_s11 + $0x188] sm:$0xff]  }
  0x53   : > { %4201 = vmatprep.mubr.msk.bf16.mxu0 %vm1201_vm0, %v4476_v31  ;;  %v4567_v31 = vld [vmem:[%s4715_s11 + $0x3a8] sm:$0xff]  }
  0x55   : > { %4346 = vmatmul.mubr.msk.bf16.gmra.mrb[32].mxu1 %vm1201_vm0, %v4515_v44 }
  0x56   : > { %4349 = vmatprep.mubr.msk.bf16.mxu1 %vm1201_vm0, %v4518_v45  ;;  %v4545_v45 = vld [vmem:[%s4715_s11 + $0x1b8] sm:$0xff]  }
  0x5a   : > { %4202 = vmatmul.mubr.msk.bf16.gmra.mrb[36].mxu0 %vm1201_vm0, %v4477_v34  ;;  %v4537_v34 = vld [vmem:[%s4715_s11 + $0x198] sm:$0xff]  }
  0x5b   : > { %4205 = vmatprep.mubr.msk.bf16.mxu0 %vm1201_vm0, %v4478_v35  ;;  %v4571_v35 = vld [vmem:[%s4715_s11 + $0x3b8] sm:$0xff]  }
  0x5d   : > { %4350 = vmatmul.mubr.msk.bf16.gmra.mrb[36].mxu1 %vm1201_vm0, %v4519_v48 }
  0x5e   : > { %4353 = vmatprep.mubr.msk.bf16.mxu1 %vm1201_vm0, %v4522_v49  ;;  %v4548_v49 = vld [vmem:[%s4715_s11 + $0x1c0] sm:$0xff]  }
  0x62   : > { %4206 = vmatmul.mubr.msk.bf16.gmra.mrb[40].mxu0 %vm1201_vm0, %v4479_v38  ;;  %v4541_v38 = vld [vmem:[%s4715_s11 + $0x1a8] sm:$0xff]  }
  0x63   : > { %4209 = vmatprep.mubr.msk.bf16.mxu0 %vm1201_vm0, %v4480_v39  ;;  %v4575_v39 = vld [vmem:[%s4715_s11 + $0x3c8] sm:$0xff]  }
  0x65   : > { %4354 = vmatmul.mubr.msk.bf16.gmra.mrb[40].mxu1 %vm1201_vm0, %v4523_v52 }
  0x66   : > { %4357 = vmatprep.mubr.msk.bf16.mxu1 %vm1201_vm0, %v4526_v53 }
  0x6a   : > { %4210 = vmatmul.mubr.msk.bf16.gmra.mrb[44].mxu0 %vm1201_vm0, %v4481_v42  ;;  %v4928_v42 = vld [vmem:[%s5452_s2] ss:$0 sm:$0xff] }
  0x6b   : > { %4213 = vmatprep.mubr.msk.bf16.mxu0 %vm1201_vm0, %v4484_v43 }
  0x6d   : > { %4358 = vmatmul.mubr.msk.bf16.gmra.mrb[44].mxu1 %vm1201_vm0, %v4527_v56 }
  0x6e   : > { %4361 = vmatprep.mubr.msk.bf16.mxu1 %vm1201_vm0, %v4530_v57 }
  0x72   : > { %4214 = vmatmul.mubr.msk.bf16.gmra.mrb[48].mxu0 %vm1201_vm0, %v4485_v46  ;;  %v4579_v46 = vld [vmem:[%s4715_s11 + $0x3d8] sm:$0xff]  }
  0x73   : > { %4217 = vmatprep.mubr.msk.bf16.mxu0 %vm1201_vm0, %v4488_v47 }
  0x75   : > { %4362 = vmatmul.mubr.msk.bf16.gmra.mrb[48].mxu1 %vm1201_vm0, %v4531_v60 }
  0x76   : > { %4365 = vmatprep.mubr.msk.bf16.mxu1 %vm1201_vm0, %v4534_v61  ;;  %v4549_v61 = vld [vmem:[%s4715_s11 + $0x1c8] sm:$0xff]  }
  0x7a   : > { %4218 = vmatmul.mubr.msk.bf16.gmra.mrb[52].mxu0 %vm1201_vm0, %v4489_v50  ;;  %v4582_v50 = vld [vmem:[%s4715_s11 + $0x3e0] sm:$0xff]  }
  0x7b   : > { %4221 = vmatprep.mubr.msk.bf16.mxu0 %vm1201_vm0, %v4492_v51 }
  0x7d   : > { %4366 = vmatmul.mubr.msk.bf16.gmra.mrb[52].mxu1 %vm1201_vm0, %v4535_v0 }
  0x7e   : > { %4369 = vmatprep.mubr.msk.bf16.mxu1 %vm1201_vm0, %v4538_v1 }
  0x82   : > { %4222 = vmatmul.mubr.msk.bf16.gmra.mrb[56].mxu0 %vm1201_vm0, %v4493_v54 }
  0x83   : > { %4225 = vmatprep.mubr.msk.bf16.mxu0 %vm1201_vm0, %v4496_v55 }
  0x85   : > { %4370 = vmatmul.mubr.msk.bf16.gmra.mrb[56].mxu1 %vm1201_vm0, %v4539_v3  ;;  %v4552_v3 = vld [vmem:[%s4715_s11 + $0x1d0] sm:$0xff]  }
  0x86   : > { %4373 = vmatprep.mubr.msk.bf16.mxu1 %vm1201_vm0, %v4542_v5 }
  0x8a   : > { %4226 = vmatmul.mubr.msk.bf16.gmra.mrb[60].mxu0 %vm1201_vm0, %v4497_v58 }
  0x8b   : > { %4229 = vmatprep.mubr.msk.bf16.mxu0 %vm1201_vm0, %v4500_v59 }
  0x8d   : > { %4374 = vmatmul.mubr.msk.bf16.gmra.mrb[60].mxu1 %vm1201_vm0, %v4543_v7 }
  0x8e   : > { %4377 = vmatprep.mubr.msk.bf16.mxu1 %vm1201_vm0, %v4546_v9 }
  0x92   : > { %4230 = vmatmul.mubr.msk.bf16.gmra.mrb[64].mxu0 %vm1201_vm0, %v4501_v62  ;;  %v4583_v62 = vld [vmem:[%s4715_s11 + $0x3e8] sm:$0xff]  }
  0x93   : > { %4233 = vmatprep.mubr.msk.bf16.mxu0 %vm1201_vm0, %v4504_v63 }
  0x95   : > { %4378 = vmatmul.mubr.msk.bf16.gmra.mrb[64].mxu1 %vm1201_vm0, %v4547_v11 }
  0x96   : > { %4381 = vmatprep.mubr.msk.bf16.mxu1 %vm1201_vm0, %v4550_v13 }
  0x9a   : > { %4234 = vmatmul.mubr.msk.bf16.gmra.mrb[68].mxu0 %vm1201_vm0, %v4505_v2 }
  0x9b   : > { %4237 = vmatprep.mubr.msk.bf16.mxu0 %vm1201_vm0, %v4508_v4  ;;  %v4584_v4 = vld [vmem:[%s4715_s11 + $0x3f0] sm:$0xff]  }
  0x9d   : > { %4382 = vmatmul.mubr.msk.bf16.gmra.mrb[68].mxu1 %vm1201_vm0, %v4551_v15 }
  0x9e   : > { %4385 = vmatprep.mubr.msk.bf16.mxu1 %vm1201_vm0, %v4554_v17  ;;  %v4553_v17 = vld [vmem:[%s4715_s11 + $0x1d8] sm:$0xff]  }
  0xa2   : > { %4238 = vmatmul.mubr.msk.bf16.gmra.mrb[72].mxu0 %vm1201_vm0, %v4509_v6 }
  0xa3   : > { %4241 = vmatprep.mubr.msk.bf16.mxu0 %vm1201_vm0, %v4512_v8 }
  0xa5   : > { %4386 = vmatmul.mubr.msk.bf16.gmra.mrb[72].mxu1 %vm1201_vm0, %v4555_v19 }
  0xa6   : > { %4389 = vmatprep.mubr.msk.bf16.mxu1 %vm1201_vm0, %v4558_v21 }
  0xaa   : > { %4242 = vmatmul.mubr.msk.bf16.gmra.mrb[76].mxu0 %vm1201_vm0, %v4513_v10 }
  0xab   : > { %4245 = vmatprep.mubr.msk.bf16.mxu0 %vm1201_vm0, %v4516_v12 }
  0xad   : > { %4390 = vmatmul.mubr.msk.bf16.gmra.mrb[76].mxu1 %vm1201_vm0, %v4559_v23  ;;  %v4556_v23 = vld [vmem:[%s4715_s11 + $0x1e0] sm:$0xff]  }
  0xae   : > { %4393 = vmatprep.mubr.msk.bf16.mxu1 %vm1201_vm0, %v4562_v25 }
  0xb2   : > { %4246 = vmatmul.mubr.msk.bf16.gmra.mrb[80].mxu0 %vm1201_vm0, %v4517_v14 }
  0xb3   : > { %4249 = vmatprep.mubr.msk.bf16.mxu0 %vm1201_vm0, %v4520_v16 }
  0xb5   : > { %4394 = vmatmul.mubr.msk.bf16.gmra.mrb[80].mxu1 %vm1201_vm0, %v4563_v27 }
  0xb6   : > { %4397 = vmatprep.mubr.msk.bf16.mxu1 %vm1201_vm0, %v4566_v29 }
  0xba   : > { %4250 = vmatmul.mubr.msk.bf16.gmra.mrb[84].mxu0 %vm1201_vm0, %v4521_v18  ;;  %v4585_v18 = vld [vmem:[%s4715_s11 + $0x3f8] sm:$0xff]  }
  0xbb   : > { %4253 = vmatprep.mubr.msk.bf16.mxu0 %vm1201_vm0, %v4524_v20 }
  0xbd   : > { %4398 = vmatmul.mubr.msk.bf16.gmra.mrb[84].mxu1 %vm1201_vm0, %v4567_v31 }
  0xbe   : > { %4401 = vmatprep.mubr.msk.bf16.mxu1 %vm1201_vm0, %v4570_v33 }
  0xc2   : > { %4254 = vmatmul.mubr.msk.bf16.gmra.mrb[88].mxu0 %vm1201_vm0, %v4525_v22 }
  0xc3   : > { %4257 = vmatprep.mubr.msk.bf16.mxu0 %vm1201_vm0, %v4528_v24 }
  0xc5   : > { %4402 = vmatmul.mubr.msk.bf16.gmra.mrb[88].mxu1 %vm1201_vm0, %v4571_v35 }
  0xc6   : > { %4405 = vmatprep.mubr.msk.bf16.mxu1 %vm1201_vm0, %v4574_v37 }
  0xca   : > { %4258 = vmatmul.mubr.msk.bf16.gmra.mrb[92].mxu0 %vm1201_vm0, %v4529_v26 }
  0xcb   : > { %4261 = vmatprep.mubr.msk.bf16.mxu0 %vm1201_vm0, %v4532_v28 }
  0xcd   : > { %4406 = vmatmul.mubr.msk.bf16.gmra.mrb[92].mxu1 %vm1201_vm0, %v4575_v39 }
  0xce   : > { %4409 = vmatprep.mubr.msk.bf16.mxu1 %vm1201_vm0, %v4578_v41 }
  0xd2   : > { %4262 = vmatmul.mubr.msk.bf16.gmra.mrb[96].mxu0 %vm1201_vm0, %v4533_v30 }
  0xd3   : > { %4265 = vmatprep.mubr.msk.bf16.mxu0 %vm1201_vm0, %v4536_v32 }
  0xd5   : > { %4410 = vmatmul.mubr.msk.bf16.gmra.mrb[96].mxu1 %vm1201_vm0, %v4579_v46  ;;  %v4560_v46 = vld [vmem:[%s4715_s11 + $0x1f0] sm:$0xff]  }
  0xd6   : > { %4413 = vmatprep.mubr.msk.bf16.mxu1 %vm1201_vm0, %v4582_v50 }
  0xda   : > { %4266 = vmatmul.mubr.msk.bf16.gmra.mrb[100].mxu0 %vm1201_vm0, %v4537_v34 }
  0xdb   : > { %4269 = vmatprep.mubr.msk.bf16.mxu0 %vm1201_vm0, %v4540_v36  ;;  %v4586_v36 = vld [vmem:[%s5453_s3] sm:$0xff]  }
  0xdd   : > { %4414 = vmatmul.mubr.msk.bf16.gmra.mrb[100].mxu1 %vm1201_vm0, %v4583_v62  ;;  %v4561_v62 = vld [vmem:[%s4715_s11 + $0x1f8] sm:$0xff]  }
  0xde   : > { %4417 = vmatprep.mubr.msk.bf16.mxu1 %vm1201_vm0, %v4584_v4  ;;  %v4564_v4 = vld [vmem:[%s4715_s11 + $0x200] sm:$0xff]  }
  0xe2   : > { %4270 = vmatmul.mubr.msk.bf16.gmra.mrb[104].mxu0 %vm1201_vm0, %v4541_v38  ;;  %v4557_v38 = vld [vmem:[%s4715_s11 + $0x1e8] sm:$0xff]  }
  0xe3   : > { %4273 = vmatprep.mubr.msk.bf16.mxu0 %vm1201_vm0, %v4544_v40  ;;  %v4652_v40 = vmov 0.0  }
  0xe4   : > { %4421 = vmatprep.subr.bf16.mxu1 %v4652_v40 }
  0xe5   : > { %v4167_v43 = vpop.f32.mrb[0].mxu0  ;;  %4418 = vmatmul.mubr.msk.bf16.gmra.mrb[104].mxu1 %vm1201_vm0, %v4585_v18 }
  0xe6   : > { %v1620_v44 = vpop.f32.mrb[1].mxu0  ;;  %v1629_v52 = vadd.f32 %v4167_v43, %v4928_v42  ;;  %4422 = vmatpush3.bf16.msra.mxu1 %v4586_v36  ;;  %4437 = vmatprep.mubr.msk.bf16.mxu1 %vm4653_vm2, %v4652_v40 }
  0xe7   : > { %v1621_v47 = vadd.f32 %v4928_v42, %v1620_v44  ;;  %v4168_v48 = vpop.f32.mrb[2].mxu0  ;;  %4423 = vmatprep.subr.bf16.mxu1 %v4652_v40 }
  0xe8   : > { %v1623_v51 = vpop.f32.mrb[3].mxu0  ;;  %v1632_v55 = vadd.f32 %v4168_v48, %v4928_v42  ;;  %v2645_v57 = vmax.f32 %v1629_v52, 0.0  ;;  %v4964_v35 = vpop.f32.mrb[0].mxu1 }
  0xe9   : > { %v1624_v53 = vadd.f32 %v4928_v42, %v1623_v51  ;;  %v2643_v54 = vmax.f32 %v1621_v47, 0.0  ;;  %v4970_v39 = vpop.f32.mrb[1].mxu1 }
  0xea   : > { %4274 = vmatmul.mubr.msk.bf16.gmra.mrb[108].mxu0 %vm1201_vm0, %v4545_v45  ;;  %v2646_v63 = vmax.f32 %v1632_v55, 0.0  ;;  %v4975_v47 = vpop.f32.mrb[2].mxu1 }
  0xeb   : > { %v2644_v56 = vmax.f32 %v1624_v53, 0.0  ;;  %4277 = vmatprep.mubr.msk.bf16.mxu0 %vm1201_vm0, %v4548_v49  ;;  %v4977_v49 = vpop.f32.mrb[3].mxu1 }
  0xed   : > { %v2899_v58 = vadd.f32 %v2644_v56, %v2643_v54  ;;  %v4171_v59 = vpop.f32.mrb[4].mxu0 }
  0xee   : > { %v1636_v60 = vpop.f32.mrb[5].mxu0  ;;  %v1645_v6 = vadd.f32 %v4171_v59, %v4928_v42 }
  0xef   : > { %v2900_v0 = vadd.f32 %v2899_v58, %v2645_v57  ;;  %v1637_v1 = vadd.f32 %v4928_v42, %v1636_v60  ;;  %v4172_v2 = vpop.f32.mrb[6].mxu0 }
  0xf0   : > { %v1639_v5 = vpop.f32.mrb[7].mxu0  ;;  %v1648_v11 = vadd.f32 %v4172_v2, %v4928_v42  ;;  %v2649_v13 = vmax.f32 %v1645_v6, 0.0  ;;  %v4985_v60 = vpop.f32.mrb[4].mxu1 }
  0xf1   : > { %v2647_v7 = vmax.f32 %v1637_v1, 0.0  ;;  %v2901_v8 = vadd.f32 %v2900_v0, %v2646_v63  ;;  %v1640_v9 = vadd.f32 %v4928_v42, %v1639_v5  ;;  %v4988_v63 = vpop.f32.mrb[5].mxu1 }
  0xf2   : > { %4278 = vmatmul.mubr.msk.bf16.gmra.mrb[112].mxu0 %vm1201_vm0, %v4549_v61  ;;  %v2650_v19 = vmax.f32 %v1648_v11, 0.0  ;;  %v4992_v5 = vpop.f32.mrb[6].mxu1 }
  0xf3   : > { %v2902_v10 = vadd.f32 %v2901_v8, %v2647_v7  ;;  %v2648_v12 = vmax.f32 %v1640_v9, 0.0  ;;  %4281 = vmatprep.mubr.msk.bf16.mxu0 %vm1201_vm0, %v4552_v3  ;;  %v4994_v7 = vpop.f32.mrb[7].mxu1 }
  0xf5   : > { %v2903_v14 = vadd.f32 %v2902_v10, %v2648_v12  ;;  %v4175_v15 = vpop.f32.mrb[8].mxu0 }
  0xf6   : > { %v1652_v16 = vpop.f32.mrb[9].mxu0  ;;  %v1661_v25 = vadd.f32 %v4175_v15, %v4928_v42  ;;  %v4587_v15 = vld [vmem:[%s5453_s3 + $0x8] sm:$0xff]  }
  0xf7   : > { %v2904_v20 = vadd.f32 %v2903_v14, %v2649_v13  ;;  %v1653_v21 = vadd.f32 %v4928_v42, %v1652_v16  ;;  %v4176_v22 = vpop.f32.mrb[10].mxu0  ;;  %4424 = vmatpush3.bf16.msra.mxu1 %v4587_v15 }
  0xf8   : > { %v1655_v24 = vpop.f32.mrb[11].mxu0  ;;  %v1664_v30 = vadd.f32 %v4176_v22, %v4928_v42  ;;  %v2653_v32 = vmax.f32 %v1661_v25, 0.0  ;;  %4425 = vmatprep.subr.bf16.mxu1 %v4652_v40 }
  0xf9   : > { %v2651_v26 = vmax.f32 %v1653_v21, 0.0  ;;  %v2905_v27 = vadd.f32 %v2904_v20, %v2650_v19  ;;  %v1656_v28 = vadd.f32 %v4928_v42, %v1655_v24  ;;  %v5004_v19 = vpop.f32.mrb[8].mxu1  ;;  %v4565_v21 = vld [vmem:[%s4715_s11 + $0x208] sm:$0xff]  }
  0xfa   : > { %4282 = vmatmul.mubr.msk.bf16.gmra.mrb[116].mxu0 %vm1201_vm0, %v4553_v17  ;;  %v2654_v41 = vmax.f32 %v1664_v30, 0.0  ;;  %v5007_v22 = vpop.f32.mrb[9].mxu1 }
  0xfb   : > { %v2906_v29 = vadd.f32 %v2905_v27, %v2651_v26  ;;  %v2652_v31 = vmax.f32 %v1656_v28, 0.0  ;;  %4285 = vmatprep.mubr.msk.bf16.mxu0 %vm1201_vm0, %v4556_v23  ;;  %v4568_v27 = vld [vmem:[%s4715_s11 + $0x210] sm:$0xff]   ;;  %v5012_v28 = vpop.f32.mrb[10].mxu1 }
  0xfc   : > { %v5014_v30 = vpop.f32.mrb[11].mxu1 }
  0xfd   : > { %v2907_v33 = vadd.f32 %v2906_v29, %v2652_v31  ;;  %v4179_v34 = vpop.f32.mrb[12].mxu0 }
  0xfe   : > { %v1668_v37 = vpop.f32.mrb[13].mxu0  ;;  %v1677_v50 = vadd.f32 %v4179_v34, %v4928_v42 }
  0xff   : > { %v2908_v43 = vadd.f32 %v2907_v33, %v2653_v32  ;;  %v1669_v44 = vadd.f32 %v4928_v42, %v1668_v37  ;;  %v4180_v45 = vpop.f32.mrb[14].mxu0 }
 0x100   : > { %v1671_v48 = vpop.f32.mrb[15].mxu0  ;;  %v1680_v55 = vadd.f32 %v4180_v45, %v4928_v42  ;;  %v2657_v57 = vmax.f32 %v1677_v50, 0.0  ;;  %v4327_v45 = vpop.f32.mrb[12].mxu1 }
 0x101   : > { %v2655_v51 = vmax.f32 %v1669_v44, 0.0  ;;  %v2909_v52 = vadd.f32 %v2908_v43, %v2654_v41  ;;  %v1672_v53 = vadd.f32 %v4928_v42, %v1671_v48  ;;  %v4569_v48 = vld [vmem:[%s4715_s11 + $0x218] sm:$0xff]   ;;  %v2260_v50 = vpop.f32.mrb[13].mxu1 }
 0x102   : > { %4286 = vmatmul.mubr.msk.bf16.gmra.mrb[120].mxu0 %vm1201_vm0, %v4557_v38  ;;  %v2658_v0 = vmax.f32 %v1680_v55, 0.0  ;;  %v4572_v55 = vld [vmem:[%s4715_s11 + $0x220] sm:$0xff]  }
 0x103   : > { %v2910_v54 = vadd.f32 %v2909_v52, %v2655_v51  ;;  %v2656_v56 = vmax.f32 %v1672_v53, 0.0  ;;  %4289 = vmatprep.mubr.msk.bf16.mxu0 %vm1201_vm0, %v4560_v46 }
 0x105   : > { %v2911_v58 = vadd.f32 %v2910_v54, %v2656_v56  ;;  %v4183_v59 = vpop.f32.mrb[16].mxu0  ;;  %v2261_v56 = vadd.f32 %v4928_v42, %v2260_v50 }
 0x106   : > { %v1684_v61 = vpop.f32.mrb[17].mxu0  ;;  %v1693_v8 = vadd.f32 %v4183_v59, %v4928_v42  ;;  %v2269_v59 = vadd.f32 %v4327_v45, %v4928_v42 }
 0x107   : > { %v2912_v1 = vadd.f32 %v2911_v58, %v2657_v57  ;;  %v1685_v2 = vadd.f32 %v4928_v42, %v1684_v61  ;;  %v4184_v3 = vpop.f32.mrb[18].mxu0  ;;  %v4328_v57 = vpop.f32.mrb[14].mxu1 }
 0x108   : > { %v1687_v6 = vpop.f32.mrb[19].mxu0  ;;  %v1696_v13 = vadd.f32 %v4184_v3, %v4928_v42  ;;  %v2661_v16 = vmax.f32 %v1693_v8, 0.0  ;;  %v2263_v61 = vpop.f32.mrb[15].mxu1  ;;  %v2803_v3 = vmax.f32 %v2261_v56, 0.0 }
 0x109   : > { %v2659_v9 = vmax.f32 %v1685_v2, 0.0  ;;  %v2913_v10 = vadd.f32 %v2912_v1, %v2658_v0  ;;  %v1688_v11 = vadd.f32 %v4928_v42, %v1687_v6  ;;  %v2264_v6 = vadd.f32 %v4928_v42, %v2263_v61 }
 0x10a   : > { %4290 = vmatmul.mubr.msk.bf16.gmra.mrb[124].mxu0 %vm1201_vm0, %v4561_v62  ;;  %v2662_v23 = vmax.f32 %v1696_v13, 0.0 }
 0x10b   : > { %v2914_v12 = vadd.f32 %v2913_v10, %v2659_v9  ;;  %v2660_v14 = vmax.f32 %v1688_v11, 0.0  ;;  %4293 = vmatprep.mubr.msk.bf16.mxu0 %vm1201_vm0, %v4564_v4  ;;  %v2272_v4 = vadd.f32 %v4328_v57, %v4928_v42  ;;  %v2805_v11 = vmax.f32 %v2269_v59, 0.0 }
 0x10d   : > { %v2915_v17 = vadd.f32 %v2914_v12, %v2660_v14  ;;  %v4187_v18 = vpop.f32.mrb[20].mxu0  ;;  %v2804_v12 = vmax.f32 %v2264_v6, 0.0 }
 0x10e   : > { %v1700_v20 = vpop.f32.mrb[21].mxu0  ;;  %v1709_v31 = vadd.f32 %v4187_v18, %v4928_v42  ;;  %v4573_v18 = vld [vmem:[%s4715_s11 + $0x228] sm:$0xff]  }
 0x10f   : > { %v2916_v24 = vadd.f32 %v2915_v17, %v2661_v16  ;;  %v1701_v25 = vadd.f32 %v4928_v42, %v1700_v20  ;;  %v4188_v26 = vpop.f32.mrb[22].mxu0  ;;  %v4331_v16 = vpop.f32.mrb[16].mxu1  ;;  %v2806_v20 = vmax.f32 %v2272_v4, 0.0 }
 0x110   : > { %v1703_v29 = vpop.f32.mrb[23].mxu0  ;;  %v1712_v37 = vadd.f32 %v4188_v26, %v4928_v42  ;;  %v2665_v41 = vmax.f32 %v1709_v31, 0.0 }
 0x111   : > { %v2663_v32 = vmax.f32 %v1701_v25, 0.0  ;;  %v2917_v33 = vadd.f32 %v2916_v24, %v2662_v23  ;;  %v1704_v34 = vadd.f32 %v4928_v42, %v1703_v29  ;;  %v2276_v23 = vpop.f32.mrb[17].mxu1  ;;  %v4576_v29 = vld [vmem:[%s4715_s11 + $0x230] sm:$0xff]  }
 0x112   : > { %4294 = vmatmul.mubr.msk.bf16.gmra.mrb[128].mxu0 %vm1201_vm0, %v4565_v21  ;;  %v2666_v51 = vmax.f32 %v1712_v37, 0.0  ;;  %v3084_v21 = vadd.f32 %v2804_v12, %v2803_v3  ;;  %v2277_v31 = vadd.f32 %v4928_v42, %v2276_v23  ;;  %v2285_v37 = vadd.f32 %v4331_v16, %v4928_v42 }
 0x113   : > { %v2918_v36 = vadd.f32 %v2917_v33, %v2663_v32  ;;  %v2664_v38 = vmax.f32 %v1704_v34, 0.0  ;;  %4297 = vmatprep.mubr.msk.bf16.mxu0 %vm1201_vm0, %v4568_v27  ;;  %v4332_v32 = vpop.f32.mrb[18].mxu1 }
 0x114   : > { %v2807_v45 = vmax.f32 %v2277_v31, 0.0 }
 0x115   : > { %v2919_v43 = vadd.f32 %v2918_v36, %v2664_v38  ;;  %v4191_v44 = vpop.f32.mrb[24].mxu0  ;;  %v3085_v36 = vadd.f32 %v3084_v21, %v2805_v11  ;;  %v2279_v38 = vpop.f32.mrb[19].mxu1 }
 0x116   : > { %v1716_v46 = vpop.f32.mrb[25].mxu0  ;;  %v1725_v62 = vadd.f32 %v4191_v44, %v4928_v42  ;;  %v2280_v50 = vadd.f32 %v4928_v42, %v2279_v38  ;;  %v4335_v61 = vpop.f32.mrb[20].mxu1 }
 0x117   : > { %v2920_v52 = vadd.f32 %v2919_v43, %v2665_v41  ;;  %v1717_v53 = vadd.f32 %v4928_v42, %v1716_v46  ;;  %v4192_v54 = vpop.f32.mrb[26].mxu0  ;;  %v3086_v46 = vadd.f32 %v3085_v36, %v2806_v20  ;;  %v2292_v3 = vpop.f32.mrb[21].mxu1 }
 0x118   : > { %v1719_v58 = vpop.f32.mrb[27].mxu0  ;;  %v1728_v9 = vadd.f32 %v4192_v54, %v4928_v42  ;;  %v2669_v13 = vmax.f32 %v1725_v62, 0.0  ;;  %v2809_v54 = vmax.f32 %v2285_v37, 0.0  ;;  %v2808_v56 = vmax.f32 %v2280_v50, 0.0  ;;  %v4336_v12 = vpop.f32.mrb[22].mxu1 }
 0x119   : > { %v2667_v0 = vmax.f32 %v1717_v53, 0.0  ;;  %v2921_v1 = vadd.f32 %v2920_v52, %v2666_v51  ;;  %v1720_v2 = vadd.f32 %v4928_v42, %v1719_v58  ;;  %v2293_v11 = vadd.f32 %v4928_v42, %v2292_v3  ;;  %v2295_v16 = vpop.f32.mrb[23].mxu1 }
 0x11a   : > { %4298 = vmatmul.mubr.msk.bf16.gmra.mrb[132].mxu0 %vm1201_vm0, %v4569_v48  ;;  %v2670_v24 = vmax.f32 %v1728_v9, 0.0  ;;  %v2288_v48 = vadd.f32 %v4332_v32, %v4928_v42  ;;  %v4339_v38 = vpop.f32.mrb[24].mxu1 }
 0x11b   : > { %v2922_v8 = vadd.f32 %v2921_v1, %v2667_v0  ;;  %v2668_v10 = vmax.f32 %v1720_v2, 0.0  ;;  %4301 = vmatprep.mubr.msk.bf16.mxu0 %vm1201_vm0, %v4572_v55  ;;  %v3087_v55 = vadd.f32 %v3086_v46, %v2807_v45  ;;  %v4577_v0 = vld [vmem:[%s4715_s11 + $0x238] sm:$0xff]   ;;  %v2811_v21 = vmax.f32 %v2293_v11, 0.0  ;;  %v2308_v46 = vpop.f32.mrb[25].mxu1 }
 0x11c   : > { %v2810_v1 = vmax.f32 %v2288_v48, 0.0 }
 0x11d   : > { %v2923_v14 = vadd.f32 %v2922_v8, %v2668_v10  ;;  %v4195_v15 = vpop.f32.mrb[28].mxu0  ;;  %v3088_v2 = vadd.f32 %v3087_v55, %v2808_v56  ;;  %v4580_v10 = vld [vmem:[%s4715_s11 + $0x240] sm:$0xff]  }
 0x11e   : > { %v1732_v17 = vpop.f32.mrb[29].mxu0  ;;  %v1741_v33 = vadd.f32 %v4195_v15, %v4928_v42  ;;  %v2301_v15 = vadd.f32 %v4335_v61, %v4928_v42 }
 0x11f   : > { %v2924_v25 = vadd.f32 %v2923_v14, %v2669_v13  ;;  %v1733_v26 = vadd.f32 %v4928_v42, %v1732_v17  ;;  %v4196_v27 = vpop.f32.mrb[30].mxu0  ;;  %v3089_v14 = vadd.f32 %v3088_v2, %v2809_v54  ;;  %v4340_v54 = vpop.f32.mrb[26].mxu1 }
 0x120   : > { %v1735_v34 = vpop.f32.mrb[31].mxu0  ;;  %v1744_v52 = vadd.f32 %v4196_v27, %v4928_v42  ;;  %v2673_v57 = vmax.f32 %v1741_v33, 0.0  ;;  %v2813_v31 = vmax.f32 %v2301_v15, 0.0 }
 0x121   : > { %v2671_v41 = vmax.f32 %v1733_v26, 0.0  ;;  %v2925_v43 = vadd.f32 %v2924_v25, %v2670_v24  ;;  %v1736_v44 = vadd.f32 %v4928_v42, %v1735_v34  ;;  %v3090_v23 = vadd.f32 %v3089_v14, %v2810_v1 }
 0x122   : > { %4302 = vmatmul.mubr.msk.bf16.gmra.mrb[136].mxu0 %vm1201_vm0, %v4573_v18  ;;  %v2674_v4 = vmax.f32 %v1744_v52, 0.0  ;;  %v2304_v24 = vadd.f32 %v4336_v12, %v4928_v42  ;;  %v2296_v25 = vadd.f32 %v4928_v42, %v2295_v16 }
 0x123   : > { %v2926_v51 = vadd.f32 %v2925_v43, %v2671_v41  ;;  %v2672_v53 = vmax.f32 %v1736_v44, 0.0  ;;  %4305 = vmatprep.mubr.msk.bf16.mxu0 %vm1201_vm0, %v4576_v29  ;;  %v3091_v32 = vadd.f32 %v3090_v23, %v2811_v21  ;;  %v4581_v43 = vld [vmem:[%s4715_s11 + $0x248] sm:$0xff]  }
 0x124   : > { %v2812_v33 = vmax.f32 %v2296_v25, 0.0  ;;  %v2814_v44 = vmax.f32 %v2304_v24, 0.0 }
 0x125   : > { %v2927_v58 = vadd.f32 %v2926_v51, %v2672_v53  ;;  %v4199_v59 = vpop.f32.mrb[32].mxu0  ;;  %v2309_v53 = vadd.f32 %v4928_v42, %v2308_v46 }
 0x126   : > { %v1748_v62 = vpop.f32.mrb[33].mxu0  ;;  %v1757_v18 = vadd.f32 %v4199_v59, %v4928_v42  ;;  %v3092_v45 = vadd.f32 %v3091_v32, %v2812_v33 }
 0x127   : > { %v2928_v6 = vadd.f32 %v2927_v58, %v2673_v57  ;;  %v1749_v8 = vadd.f32 %v4928_v42, %v1748_v62  ;;  %v4200_v9 = vpop.f32.mrb[34].mxu0  ;;  %v2311_v57 = vpop.f32.mrb[27].mxu1  ;;  %v2815_v1 = vmax.f32 %v2309_v53, 0.0 }
 0x128   : > { %v1751_v13 = vpop.f32.mrb[35].mxu0  ;;  %v1760_v27 = vadd.f32 %v4200_v9, %v4928_v42  ;;  %v2677_v34 = vmax.f32 %v1757_v18, 0.0  ;;  %v3093_v56 = vadd.f32 %v3092_v45, %v2813_v31  ;;  %v4343_v15 = vpop.f32.mrb[28].mxu1 }
 0x129   : > { %v5050_v17 = vadd.f32 %v2928_v6, %v2674_v4  ;;  %v1752_v20 = vadd.f32 %v4928_v42, %v1751_v13  ;;  %v2675_v26 = vmax.f32 %v1749_v8, 0.0  ;;  %v2312_v8 = vadd.f32 %v4928_v42, %v2311_v57 }
 0x12a   : > { %4306 = vmatmul.mubr.msk.bf16.gmra.mrb[140].mxu0 %vm1201_vm0, %v4577_v0  ;;  %v2678_v48 = vmax.f32 %v1760_v27, 0.0  ;;  %v2317_v0 = vadd.f32 %v4339_v38, %v4928_v42  ;;  %v3094_v2 = vadd.f32 %v3093_v56, %v2814_v44 }
 0x12b   : > { %v2676_v29 = vmax.f32 %v1752_v20, 0.0  ;;  %4309 = vmatprep.mubr.msk.bf16.mxu0 %vm1201_vm0, %v4580_v10  ;;  %v2320_v10 = vadd.f32 %v4340_v54, %v4928_v42  ;;  %v2816_v14 = vmax.f32 %v2312_v8, 0.0  ;;  %v2324_v20 = vpop.f32.mrb[29].mxu1 }
 0x12c   : > { %v3095_v9 = vadd.f32 %v3094_v2, %v2815_v1  ;;  %v2817_v18 = vmax.f32 %v2317_v0, 0.0  ;;  %v4344_v27 = vpop.f32.mrb[30].mxu1  ;;  %v2325_v32 = vadd.f32 %v4928_v42, %v2324_v20 }
 0x12d   : > { %v2936_v36 = vadd.f32 %v2676_v29, %v2675_v26  ;;  %v4203_v37 = vpop.f32.mrb[36].mxu0  ;;  %v2818_v31 = vmax.f32 %v2320_v10, 0.0  ;;  %v2327_v33 = vpop.f32.mrb[31].mxu1 }
 0x12e   : > { %v1764_v41 = vpop.f32.mrb[37].mxu0  ;;  %v1773_v58 = vadd.f32 %v4203_v37, %v4928_v42  ;;  %v3096_v26 = vadd.f32 %v3095_v9, %v2816_v14  ;;  %v2819_v44 = vmax.f32 %v2325_v32, 0.0  ;;  %v4347_v57 = vpop.f32.mrb[32].mxu1  ;;  %v4589_v9 = vld [vmem:[%s5453_s3 + $0x18] sm:$0xff]  }
 0x12f   : > { %v2937_v50 = vadd.f32 %v2936_v36, %v2677_v34  ;;  %v1765_v51 = vadd.f32 %v4928_v42, %v1764_v41  ;;  %v4204_v52 = vpop.f32.mrb[38].mxu0  ;;  %v2340_v0 = vpop.f32.mrb[33].mxu1 }
 0x130   : > { %v1767_v55 = vpop.f32.mrb[39].mxu0  ;;  %v1776_v4 = vadd.f32 %v4204_v52, %v4928_v42  ;;  %v2681_v11 = vmax.f32 %v1773_v58, 0.0  ;;  %v3097_v41 = vadd.f32 %v3096_v26, %v2817_v18  ;;  %v2336_v52 = vadd.f32 %v4344_v27, %v4928_v42  ;;  %v4588_v58 = vld [vmem:[%s5453_s3 + $0x10] sm:$0xff]   ;;  %v4348_v8 = vpop.f32.mrb[34].mxu1 }
 0x131   : > { %v2679_v59 = vmax.f32 %v1765_v51, 0.0  ;;  %v2938_v61 = vadd.f32 %v2937_v50, %v2678_v48  ;;  %v1768_v62 = vadd.f32 %v4928_v42, %v1767_v55  ;;  %v2328_v50 = vadd.f32 %v4928_v42, %v2327_v33  ;;  %4426 = vmatpush3.bf16.msra.mxu1 %v4588_v58 }
 0x132   : > { %4310 = vmatmul.mubr.msk.bf16.gmra.mrb[144].mxu0 %vm1201_vm0, %v4581_v43  ;;  %v2682_v21 = vmax.f32 %v1776_v4, 0.0  ;;  %v2333_v43 = vadd.f32 %v4343_v15, %v4928_v42  ;;  %v3098_v51 = vadd.f32 %v3097_v41, %v2818_v31  ;;  %4427 = vmatprep.subr.bf16.mxu1 %v4652_v40  ;;  %v2352_v31 = vadd.f32 %v4348_v8, %v4928_v42 }
 0x133   : > { %v2939_v3 = vadd.f32 %v2938_v61, %v2679_v59  ;;  %v2680_v6 = vmax.f32 %v1768_v62, 0.0  ;;  %v2820_v56 = vmax.f32 %v2328_v50, 0.0 }
 0x134   : > { %v2821_v61 = vmax.f32 %v2333_v43, 0.0  ;;  %v3099_v62 = vadd.f32 %v3098_v51, %v2819_v44 }
 0x135   : > { %v2940_v12 = vadd.f32 %v2939_v3, %v2680_v6  ;;  %v4207_v13 = vpop.f32.mrb[40].mxu0  ;;  %v2341_v6 = vadd.f32 %v4928_v42, %v2340_v0  ;;  %4428 = vmatpush3.bf16.msra.mxu1 %v4589_v9 }
 0x136   : > { %v1780_v16 = vpop.f32.mrb[41].mxu0  ;;  %v1789_v34 = vadd.f32 %v4207_v13, %v4928_v42  ;;  %v2343_v13 = vpop.f32.mrb[35].mxu1  ;;  %4429 = vmatprep.subr.bf16.mxu1 %v4652_v40 }
 0x137   : > { %v2941_v23 = vadd.f32 %v2940_v12, %v2681_v11  ;;  %v1781_v24 = vadd.f32 %v4928_v42, %v1780_v16  ;;  %v4208_v25 = vpop.f32.mrb[42].mxu0  ;;  %v2822_v11 = vmax.f32 %v2336_v52, 0.0  ;;  %v3100_v12 = vadd.f32 %v3099_v62, %v2820_v56 }
 0x138   : > { %v1783_v29 = vpop.f32.mrb[43].mxu0  ;;  %v1792_v46 = vadd.f32 %v4208_v25, %v4928_v42  ;;  %v2685_v53 = vmax.f32 %v1789_v34, 0.0 }
 0x139   : > { %v2683_v36 = vmax.f32 %v1781_v24, 0.0  ;;  %v2942_v37 = vadd.f32 %v2941_v23, %v2682_v21  ;;  %v1784_v38 = vadd.f32 %v4928_v42, %v1783_v29  ;;  %v3101_v20 = vadd.f32 %v3100_v12, %v2821_v61 }
 0x13a   : > { %v2686_v1 = vmax.f32 %v1792_v46, 0.0  ;;  %v2349_v21 = vadd.f32 %v4347_v57, %v4928_v42  ;;  %v2823_v23 = vmax.f32 %v2341_v6, 0.0  ;;  %v2344_v24 = vadd.f32 %v4928_v42, %v2343_v13 }
 0x13b   : > { %v2943_v45 = vadd.f32 %v2942_v37, %v2683_v36  ;;  %v2684_v48 = vmax.f32 %v1784_v38, 0.0  ;;  %v3102_v29 = vadd.f32 %v3101_v20, %v2822_v11  ;;  %v4351_v37 = vpop.f32.mrb[36].mxu1 }
 0x13c   : > { %v2824_v32 = vmax.f32 %v2344_v24, 0.0  ;;  %v2825_v41 = vmax.f32 %v2349_v21, 0.0  ;;  %v2356_v44 = vpop.f32.mrb[37].mxu1  ;;  %v2365_v0 = vadd.f32 %v4351_v37, %v4928_v42 }
 0x13d   : > { %v2944_v54 = vadd.f32 %v2943_v45, %v2684_v48  ;;  %v4211_v55 = vpop.f32.mrb[44].mxu0  ;;  %v3103_v43 = vadd.f32 %v3102_v29, %v2823_v23  ;;  %v2357_v51 = vadd.f32 %v4928_v42, %v2356_v44  ;;  %v4352_v52 = vpop.f32.mrb[38].mxu1 }
 0x13e   : > { %v1796_v59 = vpop.f32.mrb[45].mxu0  ;;  %v1805_v14 = vadd.f32 %v4211_v55, %v4928_v42  ;;  %v2359_v56 = vpop.f32.mrb[39].mxu1  ;;  %v2368_v9 = vadd.f32 %v4352_v52, %v4928_v42 }
 0x13f   : > { %v2945_v2 = vadd.f32 %v2944_v54, %v2685_v53  ;;  %v1797_v3 = vadd.f32 %v4928_v42, %v1796_v59  ;;  %v4212_v4 = vpop.f32.mrb[46].mxu0  ;;  %v2826_v54 = vmax.f32 %v2352_v31, 0.0  ;;  %v3104_v55 = vadd.f32 %v3103_v43, %v2824_v32 }
 0x140   : > { %v1799_v10 = vpop.f32.mrb[47].mxu0  ;;  %v1808_v26 = vadd.f32 %v4212_v4, %v4928_v42  ;;  %v2689_v33 = vmax.f32 %v1805_v14, 0.0  ;;  %v4355_v14 = vpop.f32.mrb[40].mxu1  ;;  %v2830_v31 = vmax.f32 %v2368_v9, 0.0 }
 0x141   : > { %v2687_v15 = vmax.f32 %v1797_v3, 0.0  ;;  %v2946_v16 = vadd.f32 %v2945_v2, %v2686_v1  ;;  %v1800_v18 = vadd.f32 %v4928_v42, %v1799_v10  ;;  %v3105_v62 = vadd.f32 %v3104_v55, %v2825_v41  ;;  %v2372_v20 = vpop.f32.mrb[41].mxu1 }
 0x142   : > { %v2690_v45 = vmax.f32 %v1808_v26, 0.0  ;;  %v2827_v1 = vmax.f32 %v2357_v51, 0.0  ;;  %v2360_v2 = vadd.f32 %v4928_v42, %v2359_v56  ;;  %v2373_v26 = vadd.f32 %v4928_v42, %v2372_v20 }
 0x143   : > { %v2947_v25 = vadd.f32 %v2946_v16, %v2687_v15  ;;  %v2688_v27 = vmax.f32 %v1800_v18, 0.0  ;;  %v3106_v8 = vadd.f32 %v3105_v62, %v2826_v54  ;;  %v2829_v16 = vmax.f32 %v2365_v0, 0.0 }
 0x144   : > { %v2828_v10 = vmax.f32 %v2360_v2, 0.0  ;;  %v2381_v43 = vadd.f32 %v4355_v14, %v4928_v42  ;;  %v2831_v44 = vmax.f32 %v2373_v26, 0.0 }
 0x145   : > { %v2948_v34 = vadd.f32 %v2947_v25, %v2688_v27  ;;  %v4215_v36 = vpop.f32.mrb[48].mxu0  ;;  %v3107_v18 = vadd.f32 %v3106_v8, %v2827_v1  ;;  %v4356_v27 = vpop.f32.mrb[42].mxu1  ;;  %v2930_v8 = vrot.slane %v5050_v17, 4 }
 0x146   : > { %v1812_v38 = vpop.f32.mrb[49].mxu0  ;;  %v1821_v57 = vadd.f32 %v4215_v36, %v4928_v42  ;;  %v2384_v52 = vadd.f32 %v4356_v27, %v4928_v42 }
 0x147   : > { %v2949_v46 = vadd.f32 %v2948_v34, %v2689_v33  ;;  %v1813_v48 = vadd.f32 %v4928_v42, %v1812_v38  ;;  %v4216_v50 = vpop.f32.mrb[50].mxu0  ;;  %v3108_v32 = vadd.f32 %v3107_v18, %v2828_v10  ;;  %v2375_v33 = vpop.f32.mrb[43].mxu1 }
 0x148   : > { %v1815_v53 = vpop.f32.mrb[51].mxu0  ;;  %v1824_v4 = vadd.f32 %v4216_v50, %v4928_v42  ;;  %v2693_v11 = vmax.f32 %v1821_v57, 0.0  ;;  %v4359_v57 = vpop.f32.mrb[44].mxu1  ;;  %v2834_v10 = vmax.f32 %v2384_v52, 0.0 }
 0x149   : > { %v2691_v58 = vmax.f32 %v1813_v48, 0.0  ;;  %v2950_v59 = vadd.f32 %v2949_v46, %v2690_v45  ;;  %v1816_v61 = vadd.f32 %v4928_v42, %v1815_v53  ;;  %v3109_v41 = vadd.f32 %v3108_v32, %v2829_v16  ;;  %v2388_v62 = vpop.f32.mrb[45].mxu1 }
 0x14a   : > { %v2694_v21 = vmax.f32 %v1824_v4, 0.0  ;;  %v2376_v45 = vadd.f32 %v4928_v42, %v2375_v33  ;;  %v2389_v4 = vadd.f32 %v4928_v42, %v2388_v62 }
 0x14b   : > { %v2951_v3 = vadd.f32 %v2950_v59, %v2691_v58  ;;  %v2692_v6 = vmax.f32 %v1816_v61, 0.0  ;;  %v3110_v51 = vadd.f32 %v3109_v41, %v2830_v31  ;;  %v2833_v59 = vmax.f32 %v2381_v43, 0.0 }
 0x14c   : > { %v2832_v53 = vmax.f32 %v2376_v45, 0.0  ;;  %v2931_v31 = vadd.f32 %v2930_v8, %v5050_v17 }
 0x14d   : > { %v2952_v12 = vadd.f32 %v2951_v3, %v2692_v6  ;;  %v4219_v13 = vpop.f32.mrb[52].mxu0  ;;  %v3111_v61 = vadd.f32 %v3110_v51, %v2831_v44  ;;  %v4360_v6 = vpop.f32.mrb[46].mxu1 }
 0x14e   : > { %v1828_v15 = vpop.f32.mrb[53].mxu0  ;;  %v1837_v34 = vadd.f32 %v4219_v13, %v4928_v42  ;;  %v2391_v13 = vpop.f32.mrb[47].mxu1 }
 0x14f   : > { %v2953_v23 = vadd.f32 %v2952_v12, %v2693_v11  ;;  %v1829_v24 = vadd.f32 %v4928_v42, %v1828_v15  ;;  %v4220_v25 = vpop.f32.mrb[54].mxu0  ;;  %v3112_v11 = vadd.f32 %v3111_v61, %v2832_v53  ;;  %v2397_v12 = vadd.f32 %v4359_v57, %v4928_v42  ;;  %v4363_v41 = vpop.f32.mrb[48].mxu1 }
 0x150   : > { %v1831_v29 = vpop.f32.mrb[55].mxu0  ;;  %v1840_v48 = vadd.f32 %v4220_v25, %v4928_v42  ;;  %v2697_v54 = vmax.f32 %v1837_v34, 0.0 }
 0x151   : > { %v2695_v36 = vmax.f32 %v1829_v24, 0.0  ;;  %v2954_v37 = vadd.f32 %v2953_v23, %v2694_v21  ;;  %v1832_v38 = vadd.f32 %v4928_v42, %v1831_v29  ;;  %v3113_v20 = vadd.f32 %v3112_v11, %v2833_v59  ;;  %v4590_v29 = vld [vmem:[%s5453_s3 + $0x20] sm:$0xff]  }
 0x152   : > { %v2698_v0 = vmax.f32 %v1840_v48, 0.0  ;;  %v2835_v21 = vmax.f32 %v2389_v4, 0.0  ;;  %v2400_v23 = vadd.f32 %v4360_v6, %v4928_v42  ;;  %v2392_v24 = vadd.f32 %v4928_v42, %v2391_v13  ;;  %4430 = vmatpush3.bf16.msra.mxu1 %v4590_v29 }
 0x153   : > { %v2955_v46 = vadd.f32 %v2954_v37, %v2695_v36  ;;  %v2696_v50 = vmax.f32 %v1832_v38, 0.0  ;;  %v5122_v32 = vadd.f32 %v3113_v20, %v2834_v10  ;;  %v2837_v33 = vmax.f32 %v2397_v12, 0.0  ;;  %4431 = vmatprep.subr.bf16.mxu1 %v4652_v40 }
 0x154   : > { %v2836_v34 = vmax.f32 %v2392_v24, 0.0  ;;  %v2838_v44 = vmax.f32 %v2400_v23, 0.0 }
 0x155   : > { %v2956_v55 = vadd.f32 %v2955_v46, %v2696_v50  ;;  %v4223_v56 = vpop.f32.mrb[56].mxu0  ;;  %v2404_v46 = vpop.f32.mrb[49].mxu1 }
 0x156   : > { %v1844_v58 = vpop.f32.mrb[57].mxu0  ;;  %v1853_v14 = vadd.f32 %v4223_v56, %v4928_v42  ;;  %v3121_v45 = vadd.f32 %v2836_v34, %v2835_v21  ;;  %v2405_v52 = vadd.f32 %v4928_v42, %v2404_v46  ;;  %v4364_v53 = vpop.f32.mrb[50].mxu1 }
 0x157   : > { %v2957_v1 = vadd.f32 %v2956_v55, %v2697_v54  ;;  %v1845_v2 = vadd.f32 %v4928_v42, %v1844_v58  ;;  %v4224_v3 = vpop.f32.mrb[58].mxu0  ;;  %v2932_v54 = vrot.slane %v2931_v31, 2  ;;  %v2407_v58 = vpop.f32.mrb[51].mxu1  ;;  %v2416_v8 = vadd.f32 %v4364_v53, %v4928_v42  ;;  %v5142_v53 = vld [vmem:[%s5452_s2] ss:$0 sm:$0xff] }
 0x158   : > { %v1847_v9 = vpop.f32.mrb[59].mxu0  ;;  %v1856_v26 = vadd.f32 %v4224_v3, %v4928_v42  ;;  %v2701_v36 = vmax.f32 %v1853_v14, 0.0  ;;  %v3122_v57 = vadd.f32 %v3121_v45, %v2837_v33 }
 0x159   : > { %v2699_v15 = vmax.f32 %v1845_v2, 0.0  ;;  %v2958_v16 = vadd.f32 %v2957_v1, %v2698_v0  ;;  %v1848_v18 = vadd.f32 %v4928_v42, %v1847_v9  ;;  %v2413_v0 = vadd.f32 %v4363_v41, %v4928_v42 }
 0x15a   : > { %v2702_v48 = vmax.f32 %v1856_v26, 0.0  ;;  %v2839_v2 = vmax.f32 %v2405_v52, 0.0  ;;  %v3123_v3 = vadd.f32 %v3122_v57, %v2838_v44  ;;  %v2408_v9 = vadd.f32 %v4928_v42, %v2407_v58 }
 0x15b   : > { %v2959_v25 = vadd.f32 %v2958_v16, %v2699_v15  ;;  %v2700_v27 = vmax.f32 %v1848_v18, 0.0  ;;  %v2933_v10 = vadd.f32 %v2932_v54, %v2931_v31  ;;  %v2841_v15 = vmax.f32 %v2413_v0, 0.0  ;;  %v4367_v18 = vpop.f32.mrb[52].mxu1 }
 0x15c   : > { %v3124_v11 = vadd.f32 %v3123_v3, %v2839_v2  ;;  %v2840_v16 = vmax.f32 %v2408_v9, 0.0  ;;  %v2842_v23 = vmax.f32 %v2416_v8, 0.0  ;;  %v2420_v24 = vpop.f32.mrb[53].mxu1 }
 0x15d   : > { %v2960_v37 = vadd.f32 %v2959_v25, %v2700_v27  ;;  %v4227_v38 = vpop.f32.mrb[60].mxu0  ;;  %v2421_v33 = vadd.f32 %v4928_v42, %v2420_v24  ;;  %v4368_v34 = vpop.f32.mrb[54].mxu1  ;;  %v2934_v31 = vrot.slane %v2933_v10, 1 }
 0x15e   : > { %v1860_v43 = vpop.f32.mrb[61].mxu0  ;;  %v1869_v55 = vadd.f32 %v4227_v38, %v4928_v42  ;;  %v3125_v29 = vadd.f32 %v3124_v11, %v2840_v16  ;;  %v2423_v38 = vpop.f32.mrb[55].mxu1  ;;  %v2432_v57 = vadd.f32 %v5142_v53, %v4368_v34 }
 0x15f   : > { %v2961_v50 = vadd.f32 %v2960_v37, %v2701_v36  ;;  %v1861_v51 = vadd.f32 %v4928_v42, %v1860_v43  ;;  %v4228_v17 = vpop.f32.mrb[62].mxu0  ;;  %v2424_v54 = vadd.f32 %v5142_v53, %v2423_v38  ;;  %v4371_v0 = vpop.f32.mrb[56].mxu1 }
 0x160   : > { %v1863_v56 = vpop.f32.mrb[63].mxu0  ;;  %v1872_v1 = vadd.f32 %v4228_v17, %v4928_v42  ;;  %v2705_v12 = vmax.f32 %v1869_v55, 0.0  ;;  %v3126_v44 = vadd.f32 %v3125_v29, %v2841_v15  ;;  %v2935_v55 = vadd.f32 %v2934_v31, %v2933_v10 }
 0x161   : > { %v2703_v59 = vmax.f32 %v1861_v51, 0.0  ;;  %v2962_v61 = vadd.f32 %v2961_v50, %v2702_v48  ;;  %v1864_v62 = vadd.f32 %v4928_v42, %v1863_v56  ;;  %v2429_v48 = vadd.f32 %v4367_v18, %v4928_v42 }
 0x162   : > { %v2706_v20 = vmax.f32 %v1872_v1, 0.0  ;;  %v2843_v50 = vmax.f32 %v2421_v33, 0.0  ;;  %v3127_v52 = vadd.f32 %v3126_v44, %v2842_v23  ;;  %v2846_v16 = vmax.f32 %v2432_v57, 0.0 }
 0x163   : > { %v2963_v4 = vadd.f32 %v2962_v61, %v2703_v59  ;;  %v2704_v6 = vmax.f32 %v1864_v62, 0.0  ;;  %v2845_v3 = vmax.f32 %v2429_v48, 0.0  ;;  %v2445_v29 = vadd.f32 %v5142_v53, %v4371_v0 }
 0x164   : > { %v3128_v62 = vadd.f32 %v3127_v52, %v2843_v50 }
 0x165   : > { %v2964_v13 = vadd.f32 %v2963_v4, %v2704_v6  ;;  %v4231_v14 = vpop.f32.mrb[64].mxu0  ;;  %v2436_v4 = vpop.f32.mrb[57].mxu1 }
 0x166   : > { %v1876_v21 = vpop.f32.mrb[65].mxu0  ;;  %v1885_v36 = vadd.f32 %v4231_v14, %v4928_v42  ;;  %v4372_v10 = vpop.f32.mrb[58].mxu1  ;;  %v2437_v18 = vadd.f32 %v5142_v53, %v2436_v4 }
 0x167   : > { %v2965_v25 = vadd.f32 %v2964_v13, %v2705_v12  ;;  %v1877_v26 = vadd.f32 %v4928_v42, %v1876_v21  ;;  %v4232_v27 = vpop.f32.mrb[66].mxu0  ;;  %v3195_v13 = vmul.f32 0.00390625, %v2935_v55 }
 0x168   : > { %v1879_v37 = vpop.f32.mrb[67].mxu0  ;;  %v1888_v46 = vadd.f32 %v4232_v27, %v4928_v42  ;;  %v2709_v56 = vmax.f32 %v1885_v36, 0.0  ;;  %v2847_v33 = vmax.f32 %v2437_v18, 0.0 }
 0x169   : > { %v2966_v41 = vadd.f32 %v2965_v25, %v2706_v20  ;;  %v1880_v43 = vadd.f32 %v4928_v42, %v1879_v37  ;;  %v2707_v45 = vmax.f32 %v1877_v26, 0.0  ;;  %v2844_v42 = vmax.f32 %v2424_v54, 0.0  ;;  %v2439_v20 = vpop.f32.mrb[59].mxu1 }
 0x16a   : > { %v2710_v1 = vmax.f32 %v1888_v46, 0.0  ;;  %v2440_v37 = vadd.f32 %v5142_v53, %v2439_v20  ;;  %v3203_v38 = vpack.c.bf16 %v3195_v13, %v3195_v13  ;;  %v2849_v54 = vmax.f32 %v2445_v29, 0.0 }
 0x16b   : > { %v2967_v51 = vrot.slane %v2966_v41, 4  ;;  %v2708_v17 = vmax.f32 %v1880_v43, 0.0  ;;  %v3129_v12 = vadd.f32 %v3128_v62, %v2844_v42  ;;  %v2448_v43 = vadd.f32 %v5142_v53, %v4372_v10 }
 0x16c   : > { %v2848_v50 = vmax.f32 %v2440_v37, 0.0  ;;  %v3242_v0 = vunpack.c.l.b16 %v3203_v38 }
 0x16d   : > { %v2968_v58 = vadd.f32 %v2967_v51, %v2966_v41  ;;  %v2973_v59 = vadd.f32 %v2708_v17, %v2707_v45  ;;  %v4235_v61 = vpop.f32.mrb[68].mxu0  ;;  %v3130_v27 = vadd.f32 %v3129_v12, %v2845_v3  ;;  %v4375_v51 = vpop.f32.mrb[60].mxu1  ;;  %v2850_v3 = vmax.f32 %v2448_v43, 0.0 }
 0x16e   : > { %v1892_v2 = vpop.f32.mrb[69].mxu0  ;;  %v1901_v14 = vadd.f32 %v5142_v53, %v4235_v61 }
 0x16f   : > { %v2969_v6 = vrot.slane %v2968_v58, 2  ;;  %v2974_v8 = vadd.f32 %v2973_v59, %v2709_v56  ;;  %v1893_v9 = vadd.f32 %v5142_v53, %v1892_v2  ;;  %v4236_v11 = vpop.f32.mrb[70].mxu0  ;;  %v3131_v41 = vadd.f32 %v3130_v27, %v2846_v16  ;;  %v2452_v56 = vpop.f32.mrb[61].mxu1 }
 0x170   : > { %v1895_v15 = vpop.f32.mrb[71].mxu0  ;;  %v1904_v26 = vadd.f32 %v5142_v53, %v4236_v11  ;;  %v2713_v45 = vmax.f32 %v1901_v14, 0.0  ;;  %v2453_v62 = vadd.f32 %v5142_v53, %v2452_v56  ;;  %v4376_v42 = vpop.f32.mrb[62].mxu1  ;;  %v2461_v14 = vadd.f32 %v5142_v53, %v4375_v51 }
 0x171   : > { %v2970_v21 = vadd.f32 %v2969_v6, %v2968_v58  ;;  %v2711_v23 = vmax.f32 %v1893_v9, 0.0  ;;  %v2975_v24 = vadd.f32 %v2974_v8, %v2710_v1  ;;  %v1896_v25 = vadd.f32 %v5142_v53, %v1895_v15  ;;  %v2455_v6 = vpop.f32.mrb[63].mxu1 }
 0x172   : > { %v2714_v17 = vmax.f32 %v1904_v26, 0.0  ;;  %v3132_v55 = vadd.f32 %v3131_v41, %v2847_v33  ;;  %v2851_v15 = vmax.f32 %v2453_v62, 0.0  ;;  %v2853_v37 = vmax.f32 %v2461_v14, 0.0 }
 0x173   : > { %v2971_v34 = vrot.slane %v2970_v21, 1  ;;  %v2976_v31 = vadd.f32 %v2975_v24, %v2711_v23  ;;  %v2712_v36 = vmax.f32 %v1896_v25, 0.0  ;;  %v2464_v24 = vadd.f32 %v5142_v53, %v4376_v42 }
 0x174   : > { %v3133_v4 = vadd.f32 %v3132_v55, %v2848_v50 }
 0x175   : > { %v2972_v44 = vadd.f32 %v2971_v34, %v2970_v21  ;;  %v2977_v46 = vadd.f32 %v2976_v31, %v2712_v36  ;;  %v4239_v48 = vpop.f32.mrb[72].mxu0  ;;  %v2456_v21 = vadd.f32 %v5142_v53, %v2455_v6  ;;  %v4379_v34 = vpop.f32.mrb[64].mxu1  ;;  %v4591_v31 = vld [vmem:[%s5453_s3 + $0x28] sm:$0xff]  }
 0x176   : > { %v1908_v52 = vpop.f32.mrb[73].mxu0  ;;  %v1917_v1 = vadd.f32 %v5142_v53, %v4239_v48  ;;  %v3134_v13 = vadd.f32 %v3133_v4, %v2849_v54  ;;  %v2468_v41 = vpop.f32.mrb[65].mxu1  ;;  %4432 = vmatpush3.bf16.msra.mxu1 %v4591_v31 }
 0x177   : > { %v3196_v57 = vmul.f32 0.00390625, %v2972_v44  ;;  %v2978_v58 = vadd.f32 %v2977_v46, %v2713_v45  ;;  %v1909_v59 = vadd.f32 %v5142_v53, %v1908_v52  ;;  %v4240_v61 = vpop.f32.mrb[74].mxu0  ;;  %v2852_v33 = vmax.f32 %v2456_v21, 0.0  ;;  %v4380_v50 = vpop.f32.mrb[66].mxu1  ;;  %4433 = vmatprep.subr.bf16.mxu1 %v4652_v40 }
 0x178   : > { %v1911_v2 = vpop.f32.mrb[75].mxu0  ;;  %v1920_v10 = vadd.f32 %v5142_v53, %v4240_v61  ;;  %v3135_v23 = vadd.f32 %v3134_v13, %v2850_v3  ;;  %v2717_v26 = vmax.f32 %v1917_v1, 0.0  ;;  %v2469_v48 = vadd.f32 %v5142_v53, %v2468_v41  ;;  %v2471_v54 = vpop.f32.mrb[67].mxu1 }
 0x179   : > { %v3204_v8 = vpack.c.bf16 %v3196_v57, %v3196_v57  ;;  %v2715_v9 = vmax.f32 %v1909_v59, 0.0  ;;  %v2979_v11 = vadd.f32 %v2978_v58, %v2714_v17  ;;  %v1912_v12 = vadd.f32 %v5142_v53, %v1911_v2 }
 0x17a   : > { %v3136_v38 = vadd.f32 %v3135_v23, %v2851_v15  ;;  %v2718_v43 = vmax.f32 %v1920_v10, 0.0  ;;  %v2854_v17 = vmax.f32 %v2464_v24, 0.0  ;;  %v2477_v61 = vadd.f32 %v5142_v53, %v4379_v34 }
 0x17b   : > { %v3243_v16 = vunpack.c.l.b16 %v3204_v8  ;;  %v2980_v18 = vadd.f32 %v2979_v11, %v2715_v9  ;;  %v2716_v20 = vmax.f32 %v1912_v12, 0.0  ;;  %v2855_v62 = vmax.f32 %v2469_v48, 0.0  ;;  %v4383_v12 = vpop.f32.mrb[68].mxu1 }
 0x17c   : > { %v3137_v52 = vadd.f32 %v3136_v38, %v2852_v33  ;;  %v2472_v42 = vadd.f32 %v5142_v53, %v2471_v54  ;;  %v2480_v4 = vadd.f32 %v5142_v53, %v4380_v50  ;;  %v2857_v13 = vmax.f32 %v2477_v61, 0.0  ;;  %v2484_v15 = vpop.f32.mrb[69].mxu1 }
 0x17d   : > { %v5163_v25 = vsel %vm3250_vm1, %v3243_v16, %v3242_v0  ;;  %v2981_v27 = vadd.f32 %v2980_v18, %v2716_v20  ;;  %v4243_v29 = vpop.f32.mrb[76].mxu0  ;;  %v2485_v23 = vadd.f32 %v5142_v53, %v2484_v15  ;;  %v4384_v24 = vpop.f32.mrb[70].mxu1  ;;  %v2493_v41 = vadd.f32 %v5142_v53, %v4383_v12 }
 0x17e   : > { %v1924_v36 = vpop.f32.mrb[77].mxu0  ;;  %v1933_v55 = vadd.f32 %v5142_v53, %v4243_v29  ;;  %v3138_v59 = vadd.f32 %v3137_v52, %v2853_v37  ;;  %v2856_v6 = vmax.f32 %v2472_v42, 0.0  ;;  %v2487_v33 = vpop.f32.mrb[71].mxu1 }
 0x17f   : > { %v2982_v44 = vadd.f32 %v2981_v27, %v2717_v26  ;;  %v1925_v45 = vadd.f32 %v5142_v53, %v1924_v36  ;;  %v4244_v46 = vpop.f32.mrb[78].mxu0  ;;  %v2858_v27 = vmax.f32 %v2480_v4, 0.0 }
 0x180   : > { %v1927_v51 = vpop.f32.mrb[79].mxu0  ;;  %v1936_v1 = vadd.f32 %v5142_v53, %v4244_v46  ;;  %v3139_v3 = vadd.f32 %v3138_v59, %v2854_v17  ;;  %v2721_v8 = vmax.f32 %v1933_v55, 0.0 }
 0x181   : > { %v2719_v56 = vmax.f32 %v1925_v45, 0.0  ;;  %v2983_v57 = vadd.f32 %v2982_v44, %v2718_v43  ;;  %v1928_v58 = vadd.f32 %v5142_v53, %v1927_v51  ;;  %v2859_v43 = vmax.f32 %v2485_v23, 0.0 }
 0x182   : > { %v3140_v14 = vadd.f32 %v3139_v3, %v2855_v62  ;;  %v2722_v16 = vmax.f32 %v1936_v1, 0.0  ;;  %v2488_v44 = vadd.f32 %v5142_v53, %v2487_v33  ;;  %v2496_v51 = vadd.f32 %v5142_v53, %v4384_v24 }
 0x183   : > { %v2984_v0 = vadd.f32 %v2983_v57, %v2719_v56  ;;  %v2720_v2 = vmax.f32 %v1928_v58, 0.0  ;;  %v4387_v56 = vpop.f32.mrb[72].mxu1  ;;  %v2861_v58 = vmax.f32 %v2493_v41, 0.0 }
 0x184   : > { %v3141_v29 = vadd.f32 %v3140_v14, %v2856_v6  ;;  %v2860_v17 = vmax.f32 %v2488_v44, 0.0  ;;  %v2500_v61 = vpop.f32.mrb[73].mxu1  ;;  %v2862_v6 = vmax.f32 %v2496_v51, 0.0  ;;  %v2509_v15 = vadd.f32 %v5142_v53, %v4387_v56 }
 0x185   : > { %v2985_v9 = vadd.f32 %v2984_v0, %v2720_v2  ;;  %v4247_v11 = vpop.f32.mrb[80].mxu0  ;;  %v2501_v2 = vadd.f32 %v5142_v53, %v2500_v61  ;;  %v4388_v3 = vpop.f32.mrb[74].mxu1 }
 0x186   : > { %v1940_v10 = vpop.f32.mrb[81].mxu0  ;;  %v1949_v34 = vadd.f32 %v5142_v53, %v4247_v11  ;;  %v3142_v38 = vadd.f32 %v3141_v29, %v2857_v13 }
 0x187   : > { %v2986_v18 = vadd.f32 %v2985_v9, %v2721_v8  ;;  %v1941_v20 = vadd.f32 %v5142_v53, %v1940_v10  ;;  %v4248_v21 = vpop.f32.mrb[82].mxu0  ;;  %v2503_v9 = vpop.f32.mrb[75].mxu1 }
 0x188   : > { %v1943_v26 = vpop.f32.mrb[83].mxu0  ;;  %v1952_v46 = vadd.f32 %v5142_v53, %v4248_v21  ;;  %v3143_v50 = vadd.f32 %v3142_v38, %v2858_v27  ;;  %v2725_v52 = vmax.f32 %v1949_v34, 0.0 }
 0x189   : > { %v2723_v31 = vmax.f32 %v1941_v20, 0.0  ;;  %v2987_v36 = vadd.f32 %v2986_v18, %v2722_v16  ;;  %v1944_v37 = vadd.f32 %v5142_v53, %v1943_v26  ;;  %v2863_v16 = vmax.f32 %v2501_v2, 0.0 }
 0x18a   : > { %v3144_v59 = vadd.f32 %v3143_v50, %v2859_v43  ;;  %v2726_v62 = vmax.f32 %v1952_v46, 0.0  ;;  %v2504_v18 = vadd.f32 %v5142_v53, %v2503_v9  ;;  %v2512_v26 = vadd.f32 %v5142_v53, %v4388_v3 }
 0x18b   : > { %v2988_v45 = vadd.f32 %v2987_v36, %v2723_v31  ;;  %v2724_v48 = vmax.f32 %v1944_v37, 0.0  ;;  %v4391_v31 = vpop.f32.mrb[76].mxu1  ;;  %v2865_v37 = vmax.f32 %v2509_v15, 0.0 }
 0x18c   : > { %v3145_v8 = vadd.f32 %v3144_v59, %v2860_v17  ;;  %v2864_v27 = vmax.f32 %v2504_v18, 0.0  ;;  %v2516_v41 = vpop.f32.mrb[77].mxu1  ;;  %v2866_v17 = vmax.f32 %v2512_v26, 0.0 }
 0x18d   : > { %v2989_v54 = vadd.f32 %v2988_v45, %v2724_v48  ;;  %v4251_v55 = vpop.f32.mrb[84].mxu0  ;;  %v2517_v48 = vadd.f32 %v5142_v53, %v2516_v41  ;;  %v4392_v50 = vpop.f32.mrb[78].mxu1 }
 0x18e   : > { %v1956_v57 = vpop.f32.mrb[85].mxu0  ;;  %v1965_v11 = vadd.f32 %v5142_v53, %v4251_v55  ;;  %v3146_v14 = vadd.f32 %v3145_v8, %v2861_v58  ;;  %v2519_v55 = vpop.f32.mrb[79].mxu1 }
 0x18f   : > { %v2990_v42 = vadd.f32 %v2989_v54, %v2725_v52  ;;  %v1957_v0 = vadd.f32 %v5142_v53, %v1956_v57  ;;  %v4252_v1 = vpop.f32.mrb[86].mxu0  ;;  %v2525_v54 = vadd.f32 %v5142_v53, %v4391_v31 }
 0x190   : > { %v1959_v4 = vpop.f32.mrb[87].mxu0  ;;  %v1968_v21 = vadd.f32 %v5142_v53, %v4252_v1  ;;  %v3147_v24 = vadd.f32 %v3146_v14, %v2862_v6  ;;  %v2729_v29 = vmax.f32 %v1965_v11, 0.0 }
 0x191   : > { %v2727_v12 = vmax.f32 %v1957_v0, 0.0  ;;  %v2991_v10 = vadd.f32 %v2990_v42, %v2726_v62  ;;  %v1960_v13 = vadd.f32 %v5142_v53, %v1959_v4  ;;  %v2867_v62 = vmax.f32 %v2517_v48, 0.0 }
 0x192   : > { %v3148_v38 = vadd.f32 %v3147_v24, %v2863_v16  ;;  %v2730_v43 = vmax.f32 %v1968_v21, 0.0  ;;  %v2528_v42 = vadd.f32 %v5142_v53, %v4392_v50  ;;  %v2520_v0 = vadd.f32 %v5142_v53, %v2519_v55 }
 0x193   : > { %v2992_v20 = vadd.f32 %v2991_v10, %v2727_v12  ;;  %v2728_v23 = vmax.f32 %v1960_v13, 0.0  ;;  %v2869_v6 = vmax.f32 %v2525_v54, 0.0  ;;  %v4395_v10 = vpop.f32.mrb[80].mxu1 }
 0x194   : > { %v3149_v52 = vadd.f32 %v3148_v38, %v2864_v27  ;;  %v2868_v8 = vmax.f32 %v2520_v0, 0.0  ;;  %v2870_v14 = vmax.f32 %v2528_v42, 0.0  ;;  %v2532_v16 = vpop.f32.mrb[81].mxu1  ;;  %v2541_v38 = vadd.f32 %v5142_v53, %v4395_v10 }
 0x195   : > { %v2993_v33 = vadd.f32 %v2992_v20, %v2728_v23  ;;  %v4255_v34 = vpop.f32.mrb[88].mxu0  ;;  %v2533_v24 = vadd.f32 %v5142_v53, %v2532_v16  ;;  %v4396_v26 = vpop.f32.mrb[82].mxu1 }
 0x196   : > { %v1972_v36 = vpop.f32.mrb[89].mxu0  ;;  %v1981_v56 = vadd.f32 %v5142_v53, %v4255_v34  ;;  %v3150_v61 = vadd.f32 %v3149_v52, %v2865_v37  ;;  %v3158_v15 = vadd.f32 %v2868_v8, %v2867_v62  ;;  %v2535_v34 = vpop.f32.mrb[83].mxu1  ;;  %v2544_v48 = vadd.f32 %v5142_v53, %v4396_v26  ;;  %v4592_v8 = vld [vmem:[%s5453_s3 + $0x30] sm:$0xff]  }
 0x197   : > { %v2994_v44 = vadd.f32 %v2993_v33, %v2729_v29  ;;  %v1973_v45 = vadd.f32 %v5142_v53, %v1972_v36  ;;  %v4256_v46 = vpop.f32.mrb[90].mxu0  ;;  %v2536_v50 = vadd.f32 %v5142_v53, %v2535_v34  ;;  %v2873_v55 = vmax.f32 %v2541_v38, 0.0  ;;  %4434 = vmatpush3.bf16.msra.mxu1 %v4592_v8 }
 0x198   : > { %v1975_v51 = vpop.f32.mrb[91].mxu0  ;;  %v1984_v2 = vadd.f32 %v5142_v53, %v4256_v46  ;;  %v5201_v4 = vadd.f32 %v3150_v61, %v2866_v17  ;;  %v2733_v9 = vmax.f32 %v1981_v56, 0.0  ;;  %v3159_v33 = vadd.f32 %v3158_v15, %v2869_v6  ;;  %v4593_v15 = vld [vmem:[%s5453_s3 + $0x38] sm:$0xff]   ;;  %4435 = vmatprep.subr.bf16.mxu1 %v4652_v40 }
 0x199   : > { %v2731_v57 = vmax.f32 %v1973_v45, 0.0  ;;  %v2995_v58 = vadd.f32 %v2994_v44, %v2730_v43  ;;  %v1976_v59 = vadd.f32 %v5142_v53, %v1975_v51  ;;  %v2871_v43 = vmax.f32 %v2533_v24, 0.0 }
 0x19a   : > { %v2734_v18 = vmax.f32 %v1984_v2, 0.0  ;;  %v3160_v44 = vadd.f32 %v3159_v33, %v2870_v14  ;;  %v2872_v56 = vmax.f32 %v2536_v50, 0.0  ;;  %v2874_v61 = vmax.f32 %v2544_v48, 0.0 }
 0x19b   : > { %v2996_v1 = vadd.f32 %v2995_v58, %v2731_v57  ;;  %v2732_v3 = vmax.f32 %v1976_v59, 0.0  ;;  %v4399_v57 = vpop.f32.mrb[84].mxu1  ;;  %4436 = vmatpush3.bf16.msra.mxu1 %v4593_v15 }
 0x19c   : > { %v3161_v51 = vadd.f32 %v3160_v44, %v2871_v43  ;;  %v2548_v62 = vpop.f32.mrb[85].mxu1 }
 0x19d   : > { %v2997_v11 = vadd.f32 %v2996_v1, %v2732_v3  ;;  %v4259_v12 = vpop.f32.mrb[92].mxu0  ;;  %v2549_v3 = vadd.f32 %v5142_v53, %v2548_v62  ;;  %v4400_v6 = vpop.f32.mrb[86].mxu1 }
 0x19e   : > { %v1988_v13 = vpop.f32.mrb[93].mxu0  ;;  %v1997_v27 = vadd.f32 %v5142_v53, %v4259_v12  ;;  %v3162_v2 = vadd.f32 %v3161_v51, %v2872_v56  ;;  %v2551_v12 = vpop.f32.mrb[87].mxu1  ;;  %v2560_v33 = vadd.f32 %v5142_v53, %v4400_v6 }
 0x19f   : > { %v2998_v20 = vadd.f32 %v2997_v11, %v2733_v9  ;;  %v1989_v21 = vadd.f32 %v5142_v53, %v1988_v13  ;;  %v4260_v23 = vpop.f32.mrb[94].mxu0 }
 0x1a0   : > { %v1991_v29 = vpop.f32.mrb[95].mxu0  ;;  %v2000_v41 = vadd.f32 %v5142_v53, %v4260_v23  ;;  %v2737_v17 = vmax.f32 %v1997_v27, 0.0  ;;  %v3163_v14 = vadd.f32 %v3162_v2, %v2873_v55  ;;  %v2552_v27 = vadd.f32 %v5142_v53, %v2551_v12 }
 0x1a1   : > { %v2735_v31 = vmax.f32 %v1989_v21, 0.0  ;;  %v2999_v36 = vadd.f32 %v2998_v20, %v2734_v18  ;;  %v1992_v37 = vadd.f32 %v5142_v53, %v1991_v29  ;;  %v2557_v20 = vadd.f32 %v5142_v53, %v4399_v57 }
 0x1a2   : > { %v2738_v58 = vmax.f32 %v2000_v41, 0.0  ;;  %v2875_v21 = vmax.f32 %v2549_v3, 0.0  ;;  %v3164_v26 = vadd.f32 %v3163_v14, %v2874_v61  ;;  %v2876_v38 = vmax.f32 %v2552_v27, 0.0  ;;  %v4403_v41 = vpop.f32.mrb[88].mxu1 }
 0x1a3   : > { %v3000_v45 = vadd.f32 %v2999_v36, %v2735_v31  ;;  %v2736_v46 = vmax.f32 %v1992_v37, 0.0  ;;  %v2878_v57 = vmax.f32 %v2560_v33, 0.0  ;;  %v2573_v2 = vadd.f32 %v5142_v53, %v4403_v41 }
 0x1a4   : > { %v3165_v37 = vadd.f32 %v3164_v26, %v2875_v21 }
 0x1a5   : > { %v3001_v52 = vadd.f32 %v3000_v45, %v2736_v46  ;;  %v4263_v54 = vpop.f32.mrb[96].mxu0  ;;  %v2877_v45 = vmax.f32 %v2557_v20, 0.0  ;;  %v2564_v46 = vpop.f32.mrb[89].mxu1 }
 0x1a6   : > { %v2004_v59 = vpop.f32.mrb[97].mxu0  ;;  %v2013_v9 = vadd.f32 %v5142_v53, %v4263_v54  ;;  %v4404_v54 = vpop.f32.mrb[90].mxu1 }
 0x1a7   : > { %v3002_v42 = vadd.f32 %v3001_v52, %v2737_v17  ;;  %v2005_v0 = vadd.f32 %v5142_v53, %v2004_v59  ;;  %v4264_v1 = vpop.f32.mrb[98].mxu0  ;;  %v3166_v52 = vadd.f32 %v3165_v37, %v2876_v38  ;;  %v2567_v59 = vpop.f32.mrb[91].mxu1 }
 0x1a8   : > { %v2007_v11 = vpop.f32.mrb[99].mxu0  ;;  %v2016_v18 = vadd.f32 %v5142_v53, %v4264_v1  ;;  %v2741_v29 = vmax.f32 %v2013_v9, 0.0  ;;  %v4407_v20 = vpop.f32.mrb[92].mxu1 }
 0x1a9   : > { %v3003_v10 = vadd.f32 %v3002_v42, %v2738_v58  ;;  %v2008_v13 = vadd.f32 %v5142_v53, %v2007_v11  ;;  %v2739_v16 = vmax.f32 %v2005_v0, 0.0  ;;  %v2565_v58 = vadd.f32 %v5142_v53, %v2564_v46  ;;  %v2580_v27 = vpop.f32.mrb[93].mxu1 }
 0x1aa   : > { %v2742_v43 = vmax.f32 %v2016_v18, 0.0  ;;  %v3167_v1 = vadd.f32 %v3166_v52, %v2877_v45  ;;  %v2568_v11 = vadd.f32 %v5142_v53, %v2567_v59  ;;  %v4408_v37 = vpop.f32.mrb[94].mxu1 }
 0x1ab   : > { %v3004_v23 = vrot.slane %v3003_v10, 4  ;;  %v2740_v24 = vmax.f32 %v2008_v13, 0.0  ;;  %v2879_v3 = vmax.f32 %v2565_v58, 0.0  ;;  %v2583_v45 = vpop.f32.mrb[95].mxu1 }
 0x1ac   : > { %v3168_v12 = vadd.f32 %v3167_v1, %v2878_v57  ;;  %v2880_v18 = vmax.f32 %v2568_v11, 0.0  ;;  %v2584_v59 = vadd.f32 %v5142_v53, %v2583_v45 }
 0x1ad   : > { %v3005_v34 = vadd.f32 %v3004_v23, %v3003_v10  ;;  %v3010_v31 = vadd.f32 %v2740_v24, %v2739_v16  ;;  %v4267_v36 = vpop.f32.mrb[100].mxu0  ;;  %v2576_v10 = vadd.f32 %v5142_v53, %v4404_v54  ;;  %v2881_v24 = vmax.f32 %v2573_v2, 0.0 }
 0x1ae   : > { %v2020_v44 = vpop.f32.mrb[101].mxu0  ;;  %v2029_v55 = vadd.f32 %v5142_v53, %v4267_v36  ;;  %v3169_v26 = vadd.f32 %v3168_v12, %v2879_v3  ;;  %v2581_v36 = vadd.f32 %v5142_v53, %v2580_v27  ;;  %v2589_v54 = vadd.f32 %v5142_v53, %v4407_v20  ;;  %v4411_v3 = vpop.f32.mrb[96].mxu1 }
 0x1af   : > { %v3006_v48 = vrot.slane %v3005_v34, 2  ;;  %v3011_v50 = vadd.f32 %v3010_v31, %v2741_v29  ;;  %v2021_v51 = vadd.f32 %v5142_v53, %v2020_v44  ;;  %v4268_v17 = vpop.f32.mrb[102].mxu0  ;;  %v2884_v2 = vmax.f32 %v2584_v59, 0.0  ;;  %v2596_v11 = vpop.f32.mrb[97].mxu1 }
 0x1b0   : > { %v2023_v56 = vpop.f32.mrb[103].mxu0  ;;  %v2032_v0 = vadd.f32 %v5142_v53, %v4268_v17  ;;  %v2745_v14 = vmax.f32 %v2029_v55, 0.0  ;;  %v3170_v44 = vadd.f32 %v3169_v26, %v2880_v18  ;;  %v2883_v55 = vmax.f32 %v2581_v36, 0.0 }
 0x1b1   : > { %v3007_v61 = vadd.f32 %v3006_v48, %v3005_v34  ;;  %v2743_v40 = vmax.f32 %v2021_v51, 0.0  ;;  %v3012_v62 = vadd.f32 %v3011_v50, %v2742_v43  ;;  %v2024_v42 = vadd.f32 %v5142_v53, %v2023_v56 }
 0x1b2   : > { %v2746_v21 = vmax.f32 %v2032_v0, 0.0  ;;  %v2882_v43 = vmax.f32 %v2576_v10, 0.0  ;;  %v3171_v52 = vadd.f32 %v3170_v44, %v2881_v24 }
 0x1b3   : > { %v3008_v6 = vrot.slane %v3007_v61, 1  ;;  %v3013_v8 = vadd.f32 %v3012_v62, %v2743_v40  ;;  %v2744_v9 = vmax.f32 %v2024_v42, 0.0  ;;  %v2592_v40 = vadd.f32 %v5142_v53, %v4408_v37 }
 0x1b5   : > { %v3009_v13 = vadd.f32 %v3008_v6, %v3007_v61  ;;  %v3014_v15 = vadd.f32 %v3013_v8, %v2744_v9  ;;  %v4271_v16 = vpop.f32.mrb[104].mxu0  ;;  %v3172_v61 = vadd.f32 %v3171_v52, %v2882_v43  ;;  %v2885_v8 = vmax.f32 %v2589_v54, 0.0 }
 0x1b6   : > { %v2036_v23 = vpop.f32.mrb[105].mxu0  ;;  %v2045_v38 = vadd.f32 %v5142_v53, %v4271_v16  ;;  %v4412_v16 = vpop.f32.mrb[98].mxu1 }
 0x1b7   : > { %v3197_v29 = vmul.f32 0.00390625, %v3009_v13  ;;  %v3015_v33 = vadd.f32 %v3014_v15, %v2745_v14  ;;  %v2037_v34 = vadd.f32 %v5142_v53, %v2036_v23  ;;  %v4272_v31 = vpop.f32.mrb[106].mxu0  ;;  %v3173_v9 = vadd.f32 %v3172_v61, %v2883_v55 }
 0x1b8   : > { %v2039_v41 = vpop.f32.mrb[107].mxu0  ;;  %v2048_v17 = vadd.f32 %v5142_v53, %v4272_v31  ;;  %v2749_v42 = vmax.f32 %v2045_v38, 0.0  ;;  %v2597_v15 = vadd.f32 %v5142_v53, %v2596_v11  ;;  %v2608_v44 = vadd.f32 %v5142_v53, %v4412_v16 }
 0x1b9   : > { %v3205_v46 = vpack.c.bf16 %v3197_v29, %v3197_v29  ;;  %v2747_v48 = vmax.f32 %v2037_v34, 0.0  ;;  %v3016_v50 = vadd.f32 %v3015_v33, %v2746_v21  ;;  %v2040_v51 = vadd.f32 %v5142_v53, %v2039_v41  ;;  %v2599_v21 = vpop.f32.mrb[99].mxu1  ;;  %v4596_v41 = vld [vmem:[%s5455_s5 + $0x4] ss:$16 sps:$4 sm:$0xff]  }
 0x1ba   : > { %v2750_v12 = vmax.f32 %v2048_v17, 0.0  ;;  %v3174_v20 = vadd.f32 %v3173_v9, %v2884_v2  ;;  %v2605_v33 = vadd.f32 %v5142_v53, %v4411_v3  ;;  %v2887_v34 = vmax.f32 %v2597_v15, 0.0  ;;  %3569 = vmatprep.subr.bf16.mxu1 %v4596_v41 }
 0x1bb   : > { %v3244_v56 = vunpack.c.l.b16 %v3205_v46  ;;  %v3017_v57 = vadd.f32 %v3016_v50, %v2747_v48  ;;  %v2748_v58 = vmax.f32 %v2040_v51, 0.0  ;;  %v2600_v31 = vadd.f32 %v5142_v53, %v2599_v21  ;;  %v4415_v51 = vpop.f32.mrb[100].mxu1 }
 0x1bc   : > { %v3175_v29 = vadd.f32 %v3174_v20, %v2885_v8  ;;  %v2889_v52 = vmax.f32 %v2605_v33, 0.0  ;;  %v2612_v55 = vpop.f32.mrb[101].mxu1 }
 0x1bd   : > { %v5245_v62 = vsel %vm3252_vm3, %v3244_v56, %v5163_v25  ;;  %v3018_v0 = vadd.f32 %v3017_v57, %v2748_v58  ;;  %v4275_v1 = vpop.f32.mrb[108].mxu0  ;;  %v2886_v25 = vmax.f32 %v2592_v40, 0.0  ;;  %v2888_v45 = vmax.f32 %v2600_v31, 0.0  ;;  %v4416_v40 = vpop.f32.mrb[102].mxu1 }
 0x1be   : > { %v2052_v6 = vpop.f32.mrb[109].mxu0  ;;  %v2061_v23 = vadd.f32 %v5142_v53, %v4275_v1  ;;  %v2613_v61 = vadd.f32 %v5142_v53, %v2612_v55  ;;  %v2615_v2 = vpop.f32.mrb[103].mxu1 }
 0x1bf   : > { %v3019_v10 = vadd.f32 %v3018_v0, %v2749_v42  ;;  %v2053_v13 = vadd.f32 %v5142_v53, %v2052_v6  ;;  %v4276_v14 = vpop.f32.mrb[110].mxu0  ;;  %v3176_v43 = vadd.f32 %v3175_v29, %v2886_v25  ;;  %v2890_v0 = vmax.f32 %v2608_v44, 0.0 }
 0x1c0   : > { %v2055_v18 = vpop.f32.mrb[111].mxu0  ;;  %v2064_v37 = vadd.f32 %v5142_v53, %v4276_v14  ;;  %v2753_v46 = vmax.f32 %v2061_v23, 0.0  ;;  %v2624_v25 = vadd.f32 %v5142_v53, %v4416_v40 }
 0x1c1   : > { %v2751_v24 = vmax.f32 %v2053_v13, 0.0  ;;  %v3020_v26 = vadd.f32 %v3019_v10, %v2750_v12  ;;  %v2056_v27 = vadd.f32 %v5142_v53, %v2055_v18  ;;  %v3177_v54 = vadd.f32 %v3176_v43, %v2887_v34 }
 0x1c2   : > { %v2754_v56 = vmax.f32 %v2064_v37, 0.0  ;;  %v2621_v12 = vadd.f32 %v5142_v53, %v4415_v51  ;;  %v2891_v10 = vmax.f32 %v2613_v61, 0.0  ;;  %v2616_v13 = vadd.f32 %v5142_v53, %v2615_v2 }
 0x1c3   : > { %v3021_v36 = vadd.f32 %v3020_v26, %v2751_v24  ;;  %v2752_v38 = vmax.f32 %v2056_v27, 0.0  ;;  %v3178_v1 = vadd.f32 %v3177_v54, %v2888_v45  ;;  %v4419_v26 = vpop.f32.mrb[104].mxu1  ;;  %v2894_v45 = vmax.f32 %v2624_v25, 0.0 }
 0x1c4   : > { %v2892_v20 = vmax.f32 %v2616_v13, 0.0  ;;  %v2893_v29 = vmax.f32 %v2621_v12, 0.0  ;;  %v2628_v34 = vpop.f32.mrb[105].mxu1  ;;  %v2637_v55 = vadd.f32 %v5142_v53, %v4419_v26 }
 0x1c5   : > { %v3022_v48 = vadd.f32 %v3021_v36, %v2752_v38  ;;  %v4279_v50 = vpop.f32.mrb[112].mxu0  ;;  %v3179_v11 = vadd.f32 %v3178_v1, %v2889_v52  ;;  %v2629_v41 = vadd.f32 %v5142_v53, %v2628_v34  ;;  %v4420_v43 = vpop.f32.mrb[106].mxu1 }
 0x1c6   : > { %v2068_v17 = vpop.f32.mrb[113].mxu0  ;;  %v2077_v3 = vadd.f32 %v5142_v53, %v4279_v50 }
 0x1c7   : > { %v3023_v57 = vadd.f32 %v3022_v48, %v2753_v46  ;;  %v2069_v58 = vadd.f32 %v5142_v53, %v2068_v17  ;;  %v4280_v59 = vpop.f32.mrb[114].mxu0  ;;  %v3180_v18 = vadd.f32 %v3179_v11, %v2890_v0  ;;  %v2631_v48 = vpop.f32.mrb[107].mxu1 }
 0x1c8   : > { %v2071_v42 = vpop.f32.mrb[115].mxu0  ;;  %v2080_v15 = vadd.f32 %v5142_v53, %v4280_v59  ;;  %v2757_v21 = vmax.f32 %v2077_v3, 0.0 }
 0x1c9   : > { %v2755_v6 = vmax.f32 %v2069_v58, 0.0  ;;  %v3024_v8 = vadd.f32 %v3023_v57, %v2754_v56  ;;  %v2072_v9 = vadd.f32 %v5142_v53, %v2071_v42  ;;  %v3181_v33 = vadd.f32 %v3180_v18, %v2891_v10 }
 0x1ca   : > { %v2758_v31 = vmax.f32 %v2080_v15, 0.0  ;;  %v2895_v56 = vmax.f32 %v2629_v41, 0.0  ;;  %v2632_v57 = vadd.f32 %v5142_v53, %v2631_v48  ;;  %v2640_v42 = vadd.f32 %v5142_v53, %v4420_v43 }
 0x1cb   : > { %v3025_v14 = vadd.f32 %v3024_v8, %v2755_v6  ;;  %v2756_v16 = vmax.f32 %v2072_v9, 0.0  ;;  %v3182_v46 = vadd.f32 %v3181_v33, %v2892_v20  ;;  %v2897_v8 = vmax.f32 %v2637_v55, 0.0 }
 0x1cc   : > { %v2896_v0 = vmax.f32 %v2632_v57, 0.0  ;;  %v2898_v15 = vmax.f32 %v2640_v42, 0.0 }
 0x1cd   : > { %v3026_v23 = vadd.f32 %v3025_v14, %v2756_v16  ;;  %v4283_v24 = vpop.f32.mrb[116].mxu0  ;;  %v3183_v54 = vadd.f32 %v3182_v46, %v2893_v29 }
 0x1ce   : > { %v2084_v27 = vpop.f32.mrb[117].mxu0  ;;  %v2093_v50 = vadd.f32 %v5142_v53, %v4283_v24 }
 0x1cf   : > { %v3027_v36 = vadd.f32 %v3026_v23, %v2757_v21  ;;  %v2085_v37 = vadd.f32 %v5142_v53, %v2084_v27  ;;  %v4284_v38 = vpop.f32.mrb[118].mxu0  ;;  %v3184_v40 = vadd.f32 %v3183_v54, %v2894_v45 }
 0x1d0   : > { %v2087_v44 = vpop.f32.mrb[119].mxu0  ;;  %v2096_v59 = vadd.f32 %v5142_v53, %v4284_v38  ;;  %v2761_v1 = vmax.f32 %v2093_v50, 0.0 }
 0x1d1   : > { %v2759_v51 = vmax.f32 %v2085_v37, 0.0  ;;  %v3028_v17 = vadd.f32 %v3027_v36, %v2758_v31  ;;  %v2088_v52 = vadd.f32 %v5142_v53, %v2087_v44  ;;  %v3185_v9 = vadd.f32 %v3184_v40, %v2895_v56 }
 0x1d2   : > { %v2762_v11 = vmax.f32 %v2096_v59, 0.0 }
 0x1d3   : > { %v3029_v58 = vadd.f32 %v3028_v17, %v2759_v51  ;;  %v2760_v61 = vmax.f32 %v2088_v52, 0.0  ;;  %v3186_v16 = vadd.f32 %v3185_v9, %v2896_v0 }
 0x1d5   : > { %v3030_v2 = vadd.f32 %v3029_v58, %v2760_v61  ;;  %v4287_v3 = vpop.f32.mrb[120].mxu0  ;;  %v3187_v23 = vadd.f32 %v3186_v16, %v2897_v8 }
 0x1d6   : > { %v2100_v6 = vpop.f32.mrb[121].mxu0  ;;  %v2109_v18 = vadd.f32 %v5142_v53, %v4287_v3 }
 0x1d7   : > { %v3031_v12 = vadd.f32 %v3030_v2, %v2761_v1  ;;  %v2101_v10 = vadd.f32 %v5142_v53, %v2100_v6  ;;  %v4288_v13 = vpop.f32.mrb[122].mxu0  ;;  %v5278_v29 = vadd.f32 %v3187_v23, %v2898_v15 }
 0x1d8   : > { %v2103_v14 = vpop.f32.mrb[123].mxu0  ;;  %v2112_v26 = vadd.f32 %v5142_v53, %v4288_v13  ;;  %v2765_v33 = vmax.f32 %v2109_v18, 0.0 }
 0x1d9   : > { %v2763_v25 = vmax.f32 %v2101_v10, 0.0  ;;  %v3032_v20 = vadd.f32 %v3031_v12, %v2762_v11  ;;  %v2104_v21 = vadd.f32 %v5142_v53, %v2103_v14 }
 0x1da   : > { %v2766_v37 = vmax.f32 %v2112_v26, 0.0 }
 0x1db   : > { %v3033_v24 = vadd.f32 %v3032_v20, %v2763_v25  ;;  %v2764_v27 = vmax.f32 %v2104_v21, 0.0  ;;  %v5291_v25 = vld [vmem:[%s5452_s2] ss:$0 sm:$0xff] }
 0x1dd   : > { %v3034_v34 = vadd.f32 %v3033_v24, %v2764_v27  ;;  %v4291_v31 = vpop.f32.mrb[124].mxu0 }
 0x1de   : > { %v2116_v36 = vpop.f32.mrb[125].mxu0  ;;  %v2125_v45 = vadd.f32 %v5142_v53, %v4291_v31 }
 0x1df   : > { %v3035_v38 = vadd.f32 %v3034_v34, %v2765_v33  ;;  %v2117_v41 = vadd.f32 %v5142_v53, %v2116_v36  ;;  %v4292_v43 = vpop.f32.mrb[126].mxu0 }
 0x1e0   : > { %v2119_v44 = vpop.f32.mrb[127].mxu0  ;;  %v2128_v17 = vadd.f32 %v5142_v53, %v4292_v43  ;;  %v2769_v54 = vmax.f32 %v2125_v45, 0.0 }
 0x1e1   : > { %v2767_v46 = vmax.f32 %v2117_v41, 0.0  ;;  %v3036_v48 = vadd.f32 %v3035_v38, %v2766_v37  ;;  %v2120_v50 = vadd.f32 %v5142_v53, %v2119_v44 }
 0x1e2   : > { %v2770_v58 = vmax.f32 %v2128_v17, 0.0 }
 0x1e3   : > { %v3037_v51 = vadd.f32 %v3036_v48, %v2767_v46  ;;  %v2768_v52 = vmax.f32 %v2120_v50, 0.0 }
 0x1e5   : > { %v3038_v55 = vadd.f32 %v3037_v51, %v2768_v52  ;;  %v4295_v56 = vpop.f32.mrb[128].mxu0 }
 0x1e6   : > { %v2132_v57 = vpop.f32.mrb[129].mxu0  ;;  %v2141_v1 = vadd.f32 %v5142_v53, %v4295_v56 }
 0x1e7   : > { %v3039_v59 = vadd.f32 %v3038_v55, %v2769_v54  ;;  %v2133_v61 = vadd.f32 %v5142_v53, %v2132_v57  ;;  %v4296_v40 = vpop.f32.mrb[130].mxu0 }
 0x1e8   : > { %v2135_v42 = vpop.f32.mrb[131].mxu0  ;;  %v2144_v8 = vadd.f32 %v5142_v53, %v4296_v40  ;;  %v2773_v12 = vmax.f32 %v2141_v1, 0.0 }
 0x1e9   : > { %v3040_v0 = vadd.f32 %v3039_v59, %v2770_v58  ;;  %v2136_v2 = vadd.f32 %v5142_v53, %v2135_v42  ;;  %v2771_v6 = vmax.f32 %v2133_v61, 0.0 }
 0x1ea   : > { %v2774_v16 = vmax.f32 %v2144_v8, 0.0 }
 0x1eb   : > { %v3041_v3 = vrot.slane %v3040_v0, 4  ;;  %v2772_v9 = vmax.f32 %v2136_v2, 0.0 }
 0x1ed   : > { %v3042_v11 = vadd.f32 %v3041_v3, %v3040_v0  ;;  %v3047_v10 = vadd.f32 %v2772_v9, %v2771_v6  ;;  %v4299_v13 = vpop.f32.mrb[132].mxu0 }
 0x1ee   : > { %v2148_v14 = vpop.f32.mrb[133].mxu0  ;;  %v2157_v23 = vadd.f32 %v5291_v25, %v4299_v13 }
 0x1ef   : > { %v3043_v15 = vrot.slane %v3042_v11, 2  ;;  %v3048_v18 = vadd.f32 %v3047_v10, %v2773_v12  ;;  %v2149_v20 = vadd.f32 %v5291_v25, %v2148_v14  ;;  %v4300_v21 = vpop.f32.mrb[134].mxu0 }
 0x1f0   : > { %v2151_v53 = vpop.f32.mrb[135].mxu0  ;;  %v2160_v36 = vadd.f32 %v5291_v25, %v4300_v21  ;;  %v2777_v41 = vmax.f32 %v2157_v23, 0.0 }
 0x1f1   : > { %v3044_v24 = vadd.f32 %v3043_v15, %v3042_v11  ;;  %v2775_v26 = vmax.f32 %v2149_v20, 0.0  ;;  %v3049_v27 = vadd.f32 %v3048_v18, %v2774_v16  ;;  %v2152_v33 = vadd.f32 %v5291_v25, %v2151_v53 }
 0x1f2   : > { %v2778_v48 = vmax.f32 %v2160_v36, 0.0 }
 0x1f3   : > { %v3045_v34 = vrot.slane %v3044_v24, 1  ;;  %v3050_v31 = vadd.f32 %v3049_v27, %v2775_v26  ;;  %v2776_v37 = vmax.f32 %v2152_v33, 0.0 }
 0x1f5   : > { %v3046_v38 = vadd.f32 %v3045_v34, %v3044_v24  ;;  %v3051_v43 = vadd.f32 %v3050_v31, %v2776_v37  ;;  %v4303_v44 = vpop.f32.mrb[136].mxu0 }
 0x1f6   : > { %v2164_v45 = vpop.f32.mrb[137].mxu0  ;;  %v2173_v52 = vadd.f32 %v5291_v25, %v4303_v44 }
 0x1f7   : > { %v3198_v46 = vmul.f32 0.00390625, %v3046_v38  ;;  %v3052_v50 = vadd.f32 %v3051_v43, %v2777_v41  ;;  %v2165_v51 = vadd.f32 %v5291_v25, %v2164_v45  ;;  %v4304_v17 = vpop.f32.mrb[138].mxu0 }
 0x1f8   : > { %v2167_v54 = vpop.f32.mrb[139].mxu0  ;;  %v2176_v40 = vadd.f32 %v5291_v25, %v4304_v17  ;;  %v2781_v1 = vmax.f32 %v2173_v52, 0.0 }
 0x1f9   : > { %v3206_v55 = vpack.c.bf16 %v3198_v46, %v3198_v46  ;;  %v2779_v56 = vmax.f32 %v2165_v51, 0.0  ;;  %v3053_v57 = vadd.f32 %v3052_v50, %v2778_v48  ;;  %v2168_v58 = vadd.f32 %v5291_v25, %v2167_v54 }
 0x1fa   : > { %v2782_v8 = vmax.f32 %v2176_v40, 0.0  ;;  %v2213_v46 = vadd.f32 %v5291_v25, %v4970_v39  ;;  %v2216_v51 = vadd.f32 %v5291_v25, %v4977_v49  ;;  %v2221_v54 = vadd.f32 %v5291_v25, %v4964_v35 }
 0x1fb   : > { %v3245_v59 = vunpack.c.l.b16 %v3206_v55  ;;  %v3054_v61 = vadd.f32 %v3053_v57, %v2779_v56  ;;  %v2780_v42 = vmax.f32 %v2168_v58, 0.0  ;;  %v2224_v57 = vadd.f32 %v5291_v25, %v4975_v47 }
 0x1fc   : > { %v2791_v55 = vmax.f32 %v2213_v46, 0.0  ;;  %v2792_v58 = vmax.f32 %v2216_v51, 0.0  ;;  %v2229_v39 = vadd.f32 %v5291_v25, %v4988_v63  ;;  %v2232_v49 = vadd.f32 %v5291_v25, %v4994_v7 }
 0x1fd   : > { %v5302_v0 = vsel %vm3254_vm4, %v3245_v59, %v5245_v62  ;;  %v3055_v2 = vadd.f32 %v3054_v61, %v2780_v42  ;;  %v4307_v3 = vpop.f32.mrb[140].mxu0  ;;  %v2793_v61 = vmax.f32 %v2221_v54, 0.0  ;;  %v2794_v42 = vmax.f32 %v2224_v57, 0.0 }
 0x1fe   : > { %v2180_v6 = vpop.f32.mrb[141].mxu0  ;;  %v2189_v13 = vadd.f32 %v5291_v25, %v4307_v3  ;;  %v2237_v35 = vadd.f32 %v5291_v25, %v4985_v60  ;;  %v2240_v47 = vadd.f32 %v5291_v25, %v4992_v5  ;;  %v2245_v63 = vadd.f32 %v5291_v25, %v5007_v22 }
 0x1ff   : > { %v3056_v9 = vadd.f32 %v3055_v2, %v2781_v1  ;;  %v2181_v11 = vadd.f32 %v5291_v25, %v2180_v6  ;;  %v4308_v12 = vpop.f32.mrb[142].mxu0  ;;  %v2795_v2 = vmax.f32 %v2229_v39, 0.0  ;;  %v2796_v6 = vmax.f32 %v2232_v49, 0.0 }
 0x200   : > { %v2183_v10 = vpop.f32.mrb[143].mxu0  ;;  %v2192_v62 = vadd.f32 %v5291_v25, %v4308_v12  ;;  %v2785_v21 = vmax.f32 %v2189_v13, 0.0  ;;  %v3152_v12 = vrot.slane %v5201_v4, 4  ;;  %v2798_v13 = vmax.f32 %v2240_v47, 0.0  ;;  %v4602_v47 = vld [vmem:[%s5455_s5 + $0x44] ss:$16 sps:$4 sm:$0xff]  }
 0x201   : > { %v2783_v14 = vmax.f32 %v2181_v11, 0.0  ;;  %v3057_v15 = vadd.f32 %v3056_v9, %v2782_v8  ;;  %v2184_v16 = vadd.f32 %v5291_v25, %v2183_v10  ;;  %v3115_v9 = vrot.slane %v5122_v32, 4 }
 0x202   : > { %v2786_v26 = vmax.f32 %v2192_v62, 0.0  ;;  %v2797_v11 = vmax.f32 %v2237_v35, 0.0  ;;  %v3189_v10 = vrot.slane %v5278_v29, 4  ;;  %v2248_v60 = vadd.f32 %v5291_v25, %v5014_v30  ;;  %v4594_v35 = vld [vmem:[%s5455_s5] ss:$16 sps:$4 sm:$0xff]  }
 0x203   : > { %v3058_v18 = vadd.f32 %v3057_v15, %v2783_v14  ;;  %v2784_v20 = vmax.f32 %v2184_v16, 0.0  ;;  %v3116_v5 = vadd.f32 %v3115_v9, %v5122_v32  ;;  %v2253_v15 = vadd.f32 %v5291_v25, %v5004_v19  ;;  %v4603_v9 = vld [vmem:[%s5455_s5 + $0x60] ss:$16 sps:$4 sm:$0xff]  }
 0x204   : > { %v2799_v16 = vmax.f32 %v2245_v63, 0.0  ;;  %v3190_v22 = vadd.f32 %v3189_v10, %v5278_v29  ;;  %v4606_v63 = vld [vmem:[%s5455_s5 + $0x80] ss:$16 sps:$4 sm:$0xff]   ;;  %v4614_v10 = vld [vmem:[%s5455_s5 + $0xc4] ss:$16 sps:$4 sm:$0xff]  }
 0x205   : > { %v3059_v23 = vadd.f32 %v3058_v18, %v2784_v20  ;;  %v4311_v53 = vpop.f32.mrb[144].mxu0  ;;  %v3153_v18 = vadd.f32 %v3152_v12, %v5201_v4  ;;  %v2256_v20 = vadd.f32 %v5291_v25, %v5012_v28  ;;  %v4611_v12 = vld [vmem:[%s5455_s5 + $0xa4] ss:$16 sps:$4 sm:$0xff]  }
 0x206   : > { %v2196_v24 = vpop.f32.mrb[145].mxu0  ;;  %v2205_v36 = vadd.f32 %v5291_v25, %v4311_v53  ;;  %v3117_v53 = vrot.slane %v3116_v5, 2 }
 0x207   : > { %v3060_v27 = vadd.f32 %v3059_v23, %v2785_v21  ;;  %v2197_v33 = vadd.f32 %v5291_v25, %v2196_v24  ;;  %v4312_v34 = vpop.f32.mrb[146].mxu0  ;;  %v2800_v21 = vmax.f32 %v2248_v60, 0.0  ;;  %v2801_v24 = vmax.f32 %v2253_v15, 0.0  ;;  %v4617_v60 = vld [vmem:[%s5455_s5 + $0xe4] ss:$16 sps:$4 sm:$0xff]  }
 0x208   : > { %v2199_v31 = vpop.f32.mrb[147].mxu0  ;;  %v2208_v44 = vadd.f32 %v5291_v25, %v4312_v34  ;;  %v2789_v48 = vmax.f32 %v2205_v36, 0.0  ;;  %v3154_v30 = vrot.slane %v3153_v18, 2  ;;  %v2802_v32 = vmax.f32 %v2256_v20, 0.0 }
 0x209   : > { %v2787_v37 = vmax.f32 %v2197_v33, 0.0  ;;  %v3061_v38 = vadd.f32 %v3060_v27, %v2786_v26  ;;  %v2200_v41 = vadd.f32 %v5291_v25, %v2199_v31  ;;  %v3191_v27 = vrot.slane %v3190_v22, 2 }
 0x20a   : > { %v2790_v17 = vmax.f32 %v2208_v44, 0.0  ;;  %v3118_v34 = vadd.f32 %v3117_v53, %v3116_v5  ;;  %v3155_v19 = vadd.f32 %v3154_v30, %v3153_v18  ;;  %v4620_v5 = vld [vmem:[%s5455_s5 + $0xc] ss:$16 sps:$4 sm:$0xff]   ;;  %v4654_v15 = vmov 0   ;;  %v4621_v30 = vld [vmem:[%s5455_s5 + $0x28] ss:$16 sps:$4 sm:$0xff]  }
 0x20b   : > { %v3062_v43 = vadd.f32 %v3061_v38, %v2787_v37  ;;  %v2788_v45 = vmax.f32 %v2200_v41, 0.0  ;;  %v3192_v36 = vadd.f32 %v3191_v27, %v3190_v22  ;;  %v4624_v27 = vld [vmem:[%s5455_s5 + $0x48] ss:$16 sps:$4 sm:$0xff]  }
 0x20c   : > { %v3119_v37 = vrot.slane %v3118_v34, 1  ;;  %v3156_v38 = vrot.slane %v3155_v19, 1 }
 0x20d   : > { %v3063_v50 = vadd.f32 %v3062_v43, %v2788_v45  ;;  %v3193_v41 = vrot.slane %v3192_v36, 1 }
 0x20e   : > { %v3120_v28 = vadd.f32 %v3119_v37, %v3118_v34  ;;  %v3157_v25 = vadd.f32 %v3156_v38, %v3155_v19  ;;  %v4632_v34 = vld [vmem:[%s5455_s5 + $0x8c] ss:$16 sps:$4 sm:$0xff]   ;;  %v4630_v19 = vld [vmem:[%s5455_s5 + $0x88] ss:$16 sps:$4 sm:$0xff]  }
 0x20f   : > { %v3064_v52 = vadd.f32 %v3063_v50, %v2789_v48  ;;  %v3194_v45 = vadd.f32 %v3193_v41, %v3192_v36  ;;  %v4633_v36 = vld [vmem:[%s5455_s5 + $0xa8] ss:$16 sps:$4 sm:$0xff]   ;;  %v4641_v38 = vld [vmem:[%s5455_s5 + $0xec] ss:$16 sps:$4 sm:$0xff]   ;;  %v3389_v41 = vlaneseq }
 0x210   : > { %v3200_v48 = vmul.f32 0.00390625, %v3120_v28  ;;  %v3201_v50 = vmul.f32 0.00390625, %v3157_v25  ;;  %v4636_v37 = vld [vmem:[%s5455_s5 + $0xc8] ss:$16 sps:$4 sm:$0xff]   ;;  %v3387_v25 = vld [vmem:[%s5456_s6] sm:$0xf] }
 0x211   : > { %v3065_v56 = vadd.f32 %v3064_v52, %v2790_v17  ;;  %v3202_v17 = vmul.f32 0.00390625, %v3194_v45 }
 0x212   : > { %v3208_v54 = vpack.c.bf16 %v3200_v48, %v3200_v48 }
 0x213   : > { %v3066_v59 = vadd.f32 %v3065_v56, %v2791_v55  ;;  %v3209_v55 = vpack.c.bf16 %v3201_v50, %v3201_v50  ;;  %v3210_v57 = vpack.c.bf16 %v3202_v17, %v3202_v17 }
 0x215   : > { %v3067_v40 = vadd.f32 %v3066_v59, %v2792_v58  ;;  %v3247_v59 = vunpack.c.l.b16 %v3208_v54 }
 0x217   : > { %v3068_v1 = vadd.f32 %v3067_v40, %v2793_v61  ;;  %v3248_v61 = vunpack.c.l.b16 %v3209_v55  ;;  %v3249_v40 = vunpack.c.l.b16 %v3210_v57 }
 0x219   : > { %v3069_v3 = vadd.f32 %v3068_v1, %v2794_v42 }
 0x21b   : > { %v3070_v8 = vadd.f32 %v3069_v3, %v2795_v2  ;;  %v4599_v3 = vld [vmem:[%s5455_s5 + $0x24] ss:$16 sps:$4 sm:$0xff]  }
 0x21d   : > { %v3071_v7 = vadd.f32 %v3070_v8, %v2796_v6  ;;  %v4600_v6 = vld [vmem:[%s5455_s5 + $0x40] ss:$16 sps:$4 sm:$0xff]   ;;  %v4605_v8 = vld [vmem:[%s5455_s5 + $0x64] ss:$16 sps:$4 sm:$0xff]  }
 0x21f   : > { %v3072_v14 = vadd.f32 %v3071_v7, %v2797_v11  ;;  %v4608_v11 = vld [vmem:[%s5455_s5 + $0x84] ss:$16 sps:$4 sm:$0xff]   ;;  %v4609_v7 = vld [vmem:[%s5455_s5 + $0xa0] ss:$16 sps:$4 sm:$0xff]  }
 0x221   : > { %v3073_v62 = vadd.f32 %v3072_v14, %v2798_v13  ;;  %v4612_v13 = vld [vmem:[%s5455_s5 + $0xc0] ss:$16 sps:$4 sm:$0xff]  }
 0x222   : > { %v4615_v14 = vld [vmem:[%s5455_s5 + $0xe0] ss:$16 sps:$4 sm:$0xff]  }
 0x223   : > { %v3074_v23 = vadd.f32 %v3073_v62, %v2799_v16  ;;  %v3978_v16 = vld [vmem:[%s5454_s4] ss:$0 sm:$0xff] }
 0x225   : > { %v3075_v26 = vadd.f32 %v3074_v23, %v2800_v21  ;;  %v4618_v21 = vld [vmem:[%s5455_s5 + $0x8] ss:$16 sps:$4 sm:$0xff]  }
 0x227   : > { %v3076_v33 = vadd.f32 %v3075_v26, %v2801_v24  ;;  %v4623_v24 = vld [vmem:[%s5455_s5 + $0x2c] ss:$16 sps:$4 sm:$0xff]  }
 0x228   : > { %v4626_v26 = vld [vmem:[%s5455_s5 + $0x4c] ss:$16 sps:$4 sm:$0xff]  }
 0x229   : > { %v3077_v31 = vadd.f32 %v3076_v33, %v2802_v32  ;;  %v4629_v32 = vld [vmem:[%s5455_s5 + $0x6c] ss:$16 sps:$4 sm:$0xff]   ;;  %v4627_v33 = vld [vmem:[%s5455_s5 + $0x68] ss:$16 sps:$4 sm:$0xff]  }
 0x22b   : > { %v3078_v4 = vrot.slane %v3077_v31, 4 }
 0x22d   : > { %v3079_v29 = vadd.f32 %v3078_v4, %v3077_v31  ;;  %v4635_v31 = vld [vmem:[%s5455_s5 + $0xac] ss:$16 sps:$4 sm:$0xff]  }
 0x22e   : > { %v4638_v4 = vld [vmem:[%s5455_s5 + $0xcc] ss:$16 sps:$4 sm:$0xff]  }
 0x22f   : > { %v3080_v43 = vrot.slane %v3079_v29, 2 }
 0x231   : > { %v3081_v44 = vadd.f32 %v3080_v43, %v3079_v29  ;;  %v4639_v29 = vld [vmem:[%s5455_s5 + $0xe8] ss:$16 sps:$4 sm:$0xff]   ;;  %v3390_v43 = vshrl.u32 %v3389_v41, 7 }
 0x233   : > { %v3082_v46 = vrot.slane %v3081_v44, 1  ;;  %v3391_v28 = vsub.s32 0, %v3390_v43  ;;  %v3399_v55 = vsub.s32 2, %v3390_v43 }
 0x235   : > { %v3083_v51 = vadd.f32 %v3082_v46, %v3081_v44  ;;  %v3395_v44 = vsub.s32 1, %v3390_v43  ;;  %v3392_v45 = vrot.slane %v3387_v25, %v3391_v28  ;;  %v3400_v57 = vrot.slane %v3387_v25, %v3399_v55 }
 0x237   : > { %v3199_v52 = vmul.f32 0.00390625, %v3083_v51  ;;  %v3396_v46 = vrot.slane %v3387_v25, %v3395_v44 }
 0x239   : > { %v3207_v56 = vpack.c.bf16 %v3199_v52, %v3199_v52 }
 0x23b   : > { %v3246_v58 = vunpack.c.l.b16 %v3207_v56  ;;  %v3403_v56 = vsub.s32 3, %v3390_v43 }
 0x23d   : > { %v3257_v39 = vsel %vm3256_vm5, %v3246_v58, %v5302_v0  ;;  %v4597_v0 = vld [vmem:[%s5455_s5 + $0x20] ss:$16 sps:$4 sm:$0xff]   ;;  %v3404_v58 = vrot.slane %v3387_v25, %v3403_v56 }
 0x23e   : > { %v3259_v42 = vsel %vm3258_vm6, %v3247_v59, %v3257_v39 }
 0x23f   : > { %v3261_v49 = vsel %vm3260_vm7, %v3248_v61, %v3259_v42 }
 0x240   : > { %v3263_v1 = vsel %vm3262_vm8, %v3249_v40, %v3261_v49 }
 0x241   : > { %v3264_v2 = vpack.c.b16 %v3263_v1, %v3263_v1 }
 0x243   : > { %4438 = vmatmul.mubr.bf16.vlgmr.msra.gmra.mrb[108].mxu1 %v3264_v2 }
 0x244   : > { %3570 = vmatpush1.bf16.msra.mxu1 %v4594_v35  ;;  %3601 = vmatprep.mubr.bf16.mxu1 %v4654_v15 }
 0x245   : > { %3571 = vmatprep.subr.bf16.mxu1 %v4599_v3 }
 0x248   : > { %3572 = vmatpush1.bf16.msra.mxu1 %v4597_v0 }
 0x249   : > { %3573 = vmatprep.subr.bf16.mxu1 %v4602_v47 }
 0x24c   : > { %3574 = vmatpush1.bf16.msra.mxu1 %v4600_v6 }
 0x24d   : > { %3575 = vmatprep.subr.bf16.mxu1 %v4605_v8 }
 0x250   : > { %3576 = vmatpush1.bf16.msra.mxu1 %v4603_v9 }
 0x251   : > { %3577 = vmatprep.subr.bf16.mxu1 %v4608_v11 }
 0x254   : > { %3578 = vmatpush1.bf16.msra.mxu1 %v4606_v63 }
 0x255   : > { %3579 = vmatprep.subr.bf16.mxu1 %v4611_v12 }
 0x258   : > { %3580 = vmatpush1.bf16.msra.mxu1 %v4609_v7 }
 0x259   : > { %3581 = vmatprep.subr.bf16.mxu1 %v4614_v10 }
 0x25c   : > { %3582 = vmatpush1.bf16.msra.mxu1 %v4612_v13 }
 0x25d   : > { %3583 = vmatprep.subr.bf16.mxu1 %v4617_v60 }
 0x260   : > { %3584 = vmatpush1.bf16.msra.mxu1 %v4615_v14 }
 0x261   : > { %3610 = vmatprep.subr.bf16.mxu1 %v4620_v5 }
 0x316   : > { %v3348_v18 = vpop.f32.mrb[108].mxu1 }
 0x317   : > { %v3349_v62 = vadd.f32 %v3978_v16, %v3348_v18  ;;  %v4439_v22 = vpop.f32.mrb[109].mxu1 }
 0x318   : > { %v3351_v20 = vpop.f32.mrb[110].mxu1 }
 0x319   : > { %v3354_v23 = vpack.c.bf16 %v3349_v62, %v3349_v62  ;;  %v4440_v53 = vpop.f32.mrb[111].mxu1 }
 0x31b   : > { %3602 = vmatmul.mubr.bf16.vlgmr.msra.gmra.mrb[112].mxu1 %v3354_v23 }
 0x31c   : > { %3611 = vmatpush1.bf16.msra.mxu1 %v4618_v21  ;;  %3642 = vmatprep.mubr.bf16.mxu1 %v4654_v15 }
 0x31d   : > { %3612 = vmatprep.subr.bf16.mxu1 %v4623_v24 }
 0x320   : > { %3613 = vmatpush1.bf16.msra.mxu1 %v4621_v30 }
 0x321   : > { %3614 = vmatprep.subr.bf16.mxu1 %v4626_v26 }
 0x324   : > { %3615 = vmatpush1.bf16.msra.mxu1 %v4624_v27 }
 0x325   : > { %3616 = vmatprep.subr.bf16.mxu1 %v4629_v32 }
 0x328   : > { %3617 = vmatpush1.bf16.msra.mxu1 %v4627_v33 }
 0x329   : > { %3618 = vmatprep.subr.bf16.mxu1 %v4632_v34 }
 0x32c   : > { %3619 = vmatpush1.bf16.msra.mxu1 %v4630_v19 }
 0x32d   : > { %3620 = vmatprep.subr.bf16.mxu1 %v4635_v31 }
 0x330   : > { %3621 = vmatpush1.bf16.msra.mxu1 %v4633_v36 }
 0x331   : > { %3622 = vmatprep.subr.bf16.mxu1 %v4638_v4 }
 0x334   : > { %3623 = vmatpush1.bf16.msra.mxu1 %v4636_v37 }
 0x335   : > { %3624 = vmatprep.subr.bf16.mxu1 %v4641_v38 }
 0x338   : > { %3625 = vmatpush1.bf16.msra.mxu1 %v4639_v29 }
 0x33b   : > { %3643 = vmatmul.mubr.bf16.vlgmr.msra.gmra.mrb[116].mxu1 %v3354_v23 }
 0x3ee   : > { %v3603_v48 = vpop.f32.mrb[112].mxu1 }
 0x3ef   : > { %v3604_v50 = vadd.f32 %v3603_v48, %v3392_v45  ;;  %v3605_v51 = vpop.f32.mrb[113].mxu1 }
 0x3f0   : > { %v3606_v17 = vadd.f32 %v3605_v51, %v3396_v46  ;;  %v3607_v52 = vpop.f32.mrb[114].mxu1 }
 0x3f1   : > { %3651 = vst [vmem:[%s280_s21] sm:$0xff] %v3604_v50  ;;  %v3608_v54 = vpop.f32.mrb[115].mxu1 }
 0x3f2   : > { %3652 = vst [vmem:[%s280_s21 + $0x8] sm:$0xff] %v3606_v17 }
 0x40e   : > { %v3644_v59 = vpop.f32.mrb[116].mxu1 }
 0x40f   : > { %v3645_v61 = vadd.f32 %v3644_v59, %v3400_v57  ;;  %v3646_v39 = vpop.f32.mrb[117].mxu1 }
 0x410   : > { %v3647_v40 = vadd.f32 %v3646_v39, %v3404_v58  ;;  %v3648_v42 = vpop.f32.mrb[118].mxu1 }
 0x411   : > { %3653 = vst [vmem:[%s280_s21 + $0x10] sm:$0xff] %v3645_v61  ;;  %v3649_v49 = vpop.f32.mrb[119].mxu1 }
 0x412   : > { %3654 = vst [vmem:[%s280_s21 + $0x18] sm:$0xff] %v3647_v40 }
 0x413 PF: > { %s17_s24 = sadd.s32 1, %s4650_s24  }
 0x414   : > { %p14_p5 = scmp.ge.s32.totalorder %s17_s24, 4  }
 0x416   :  { %16 = sbr.rel (!%p14_p5) target bundleno = 1 (0x1), region = 78 }

</bundles_post_ra>
